<compile_context>
chip_gen: v7x
topology: tpu7x:2x2x1
jax: 0.10.0
libtpu: 0.0.40
codegen_flags: <defaults>
</compile_context>

<pallas_src>
import numpy as np
import jax
import jax.numpy as jnp
from jax import lax
from jax.experimental import pallas as pl
from jax.experimental.pallas import tpu as pltpu

POOL_K, POOL_S = 5, 3        # F.avg_pool2d(kernel_size=5, stride=3)
C_MID, C_OUT = 128, 768      # conv0 / conv1 output channels (fixed by the module)
N_TAP = POOL_K * POOL_K      # 25 taps of the 5x5 conv1
K_TOT = N_TAP * C_MID        # 3200 -- conv1 contraction length after tap folding


def _inception_aux_kernel(pooled_ref, w0t_ref, s0_ref, b0_ref,
                          w1_ref, s1_ref, b1_ref, fcw_ref,
                          out_ref, h0_scr):
    """One grid step = one C_OUT slice. Grid axis 0 is 'parallel' (megacore)."""
    # --- conv0 (1x1) + folded BN0 + ReLU, laid out lane-major ----------------
    # pooled_ref: (25, B, C_in). Each tap is a tiny (B, C_in) x (C_in, 128) dot
    # whose result lands in lanes [t*128, (t+1)*128) of the (B, 3200) scratch.
    w0t = w0t_ref[...]
    s0 = s0_ref[...]
    b0 = b0_ref[...]
    for t in range(N_TAP):                      # static unroll: 25 small MXU dots
        c0 = jnp.dot(pooled_ref[t], w0t, preferred_element_type=jnp.float32)
        h0_scr[:, t * C_MID:(t + 1) * C_MID] = jnp.maximum(
            c0 * s0 + b0, 0.0).astype(h0_scr.dtype)

    # --- conv1 (5x5 -> 1x1) as a single K=3200 matmul on this C_OUT slice ----
    acc = jnp.dot(h0_scr[...], w1_ref[...],
                  preferred_element_type=jnp.float32)            # (B, c_half) f32
    h1 = jnp.maximum(acc * s1_ref[...] + b1_ref[...], 0.0)        # folded BN1 + ReLU

    # adaptive_avg_pool2d((1,1)) is the identity on the 1x1 map.
    # Partial FC over this C_OUT (= FC input) slice; the slices are summed and
    # the bias added in the wrapper epilogue.
    out_ref[...] = jnp.dot(h1, fcw_ref[...], preferred_element_type=jnp.float32)


def inception_aux_forward(x_nchw, params, *, n_split=2):
    B, C_in, H, W = x_nchw.shape
    OH = (H - POOL_K) // POOL_S + 1
    OW = (W - POOL_K) // POOL_S + 1
    # conv1 is a 5x5 VALID conv, so the pooled map must be exactly 5x5 (17x17
    # input, the canonical InceptionAux case) for its output to be 1x1.
    assert OH == 5 and OW == 5, "expects a 17x17 spatial input (pooled map must be 5x5)"
    # TODO(synk): larger spatial inputs (conv1 output > 1x1) would need an extra adaptive-pool stage.
    assert C_OUT % n_split == 0 and (C_OUT // n_split) % 128 == 0
    c_half = C_OUT // n_split

    # avg-pool hoisted to the wrapper (linear, commutes with the 1x1 conv0);
    # taps tap-major so the kernel indexes them along the leading dim.
    pooled = lax.reduce_window(x_nchw, 0.0, lax.add, (1, 1, POOL_K, POOL_K),
                               (1, 1, POOL_S, POOL_S), "VALID") / (POOL_K * POOL_K)
    pooled_t = jnp.transpose(pooled, (2, 3, 0, 1)).reshape(N_TAP, B, C_in)   # (25,B,Cin) f32

    # Conv weights in matmul form.
    w0t = params["w0"].reshape(C_MID, C_in).T                                # (Cin, 128) f32
    # conv1: (768,128,5,5) -> (kh,kw,cin,cout) -> (25*128, 768); bf16 halves the
    # dominant HBM stream (f32 accumulation on the MXU keeps precision).
    w1flat = jnp.transpose(params["w1"], (2, 3, 1, 0)).reshape(K_TOT, C_OUT)
    w1flat = w1flat.astype(jnp.bfloat16)

    s0 = params["bn0_scale"].reshape(1, C_MID)
    b0 = params["bn0_bias"].reshape(1, C_MID)
    s1 = params["bn1_scale"].reshape(1, C_OUT)
    b1 = params["bn1_bias"].reshape(1, C_OUT)

    fcw = params["fc_w"].T                                                   # (768, NC)
    NC = fcw.shape[1]
    NC_PAD = ((NC + 127) // 128) * 128        # lane-dense FC output -> unmasked store
    fcw_pad = jnp.zeros((C_OUT, NC_PAD), jnp.float32).at[:, :NC].set(fcw)

    partials = pl.pallas_call(
        _inception_aux_kernel,
        out_shape=jax.ShapeDtypeStruct((n_split, B, NC_PAD), jnp.float32),
        grid_spec=pltpu.PrefetchScalarGridSpec(
            num_scalar_prefetch=0,
            grid=(n_split,),
            in_specs=[
                pl.BlockSpec(pooled_t.shape, lambda p: (0, 0, 0)),
                pl.BlockSpec(w0t.shape, lambda p: (0, 0)),
                pl.BlockSpec(s0.shape, lambda p: (0, 0)),
                pl.BlockSpec(b0.shape, lambda p: (0, 0)),
                pl.BlockSpec((K_TOT, c_half), lambda p: (0, p)),     # w1 C_OUT slice
                pl.BlockSpec((1, c_half), lambda p: (0, p)),         # s1 slice
                pl.BlockSpec((1, c_half), lambda p: (0, p)),         # b1 slice
                pl.BlockSpec((c_half, NC_PAD), lambda p: (p, 0)),    # fcw K slice
            ],
            out_specs=pl.BlockSpec((None, B, NC_PAD), lambda p: (p, 0, 0)),
            scratch_shapes=[
                pltpu.VMEM((B, K_TOT), jnp.bfloat16),   # conv0 activations, lane-major
            ],
        ),
        compiler_params=pltpu.CompilerParams(
            dimension_semantics=("parallel",)),
    )(pooled_t, w0t, s0, b0, w1flat, s1, b1, fcw_pad)

    # Epilogue: sum the C_OUT-slice partials, drop lane padding, add FC bias.
    return partials.sum(axis=0)[:, :NC] + params["fc_b"]


def make_params(key, in_channels, num_classes):
    """Deterministic synthetic parameters matching the module's shapes (BN folded, eval mode)."""
    ks = jax.random.split(key, 12)
    eps = 1e-3  # BatchNorm2d(eps=0.001)

    def bn_fold(kg, kb, km, kv, n):
        gamma = 1.0 + 0.1 * jax.random.normal(kg, (n,), jnp.float32)
        beta = 0.1 * jax.random.normal(kb, (n,), jnp.float32)
        mean = 0.1 * jax.random.normal(km, (n,), jnp.float32)
        var = jax.random.uniform(kv, (n,), jnp.float32, minval=0.5, maxval=1.5)
        scale = gamma / jnp.sqrt(var + eps)
        return scale, beta - mean * scale

    w0 = 0.1 * jax.random.normal(ks[0], (C_MID, in_channels, 1, 1), jnp.float32)
    w1 = 0.01 * jax.random.normal(ks[1], (C_OUT, C_MID, 5, 5), jnp.float32)   # conv1.stddev = 0.01
    s0, b0 = bn_fold(ks[2], ks[3], ks[4], ks[5], C_MID)
    s1, b1 = bn_fold(ks[6], ks[7], ks[8], ks[9], C_OUT)
    fc_w = 0.001 * jax.random.normal(ks[10], (num_classes, C_OUT), jnp.float32)  # fc.stddev = 0.001
    fc_b = 0.01 * jax.random.normal(ks[11], (num_classes,), jnp.float32)
    return dict(w0=w0, w1=w1, bn0_scale=s0, bn0_bias=b0,
                bn1_scale=s1, bn1_bias=b1, fc_w=fc_w, fc_b=fc_b)


def reference_forward(x, params):
    """Pure-JAX reference of InceptionAux.forward (NCHW, eval-mode BN)."""
    pooled = lax.reduce_window(x, 0.0, lax.add, (1, 1, POOL_K, POOL_K),
                               (1, 1, POOL_S, POOL_S), "VALID") / (POOL_K * POOL_K)
    c0 = lax.conv_general_dilated(pooled, params["w0"], (1, 1), "VALID",
                                  dimension_numbers=("NCHW", "OIHW", "NCHW"))
    c0 = jnp.maximum(c0 * params["bn0_scale"][None, :, None, None]
                     + params["bn0_bias"][None, :, None, None], 0.0)
    c1 = lax.conv_general_dilated(c0, params["w1"], (1, 1), "VALID",
                                  dimension_numbers=("NCHW", "OIHW", "NCHW"))
    c1 = jnp.maximum(c1 * params["bn1_scale"][None, :, None, None]
                     + params["bn1_bias"][None, :, None, None], 0.0)
    g = jnp.mean(c1, axis=(2, 3))             # adaptive_avg_pool2d((1,1)) + flatten
    return g @ params["fc_w"].T + params["fc_b"]


if __name__ == "__main__":
    key = jax.random.PRNGKey(0)
    kx, kp = jax.random.split(key)
    B, C_in, H, W, NUM_CLASSES = 2, 8, 17, 17, 10

    x = jax.random.normal(kx, (B, C_in, H, W), jnp.float32)   # NCHW, like PyTorch
    params = make_params(kp, C_in, NUM_CLASSES)

    out = inception_aux_forward(x, params)
    out = jax.block_until_ready(out)

    ref = reference_forward(x, params)
    np.testing.assert_allclose(np.asarray(out), np.asarray(ref), rtol=2e-2, atol=2e-3)
    print("KERNEL_OK")
</pallas_src>

<mosaic_0001>
module attributes {stable_mosaic.version = 11 : i64} {
  func.func @_inception_aux_kernel(%arg0: i32, %arg1: memref<25x2x8xf32, #tpu.memory_space<vmem>>, %arg2: memref<8x128xf32, #tpu.memory_space<vmem>>, %arg3: memref<1x128xf32, #tpu.memory_space<vmem>>, %arg4: memref<1x128xf32, #tpu.memory_space<vmem>>, %arg5: memref<3200x384xbf16, #tpu.memory_space<vmem>>, %arg6: memref<1x384xf32, #tpu.memory_space<vmem>>, %arg7: memref<1x384xf32, #tpu.memory_space<vmem>>, %arg8: memref<384x128xf32, #tpu.memory_space<vmem>>, %arg9: memref<1x2x128xf32, #tpu.memory_space<vmem>>, %arg10: memref<2x3200xbf16, #tpu.memory_space<vmem>>) attributes {dimension_semantics = [#tpu.dimension_semantics<parallel>], iteration_bounds = array<i64: 2>, scalar_prefetch = 0 : i64, scratch_operands = 1 : i64, tpu.core_type = #tpu.core_type<tc>, window_params = [{pipeline_mode = #tpu.pipeline_mode<synchronous>, transform_indices = @transform_0, window_bounds = array<i64: 25, 2, 8>}, {pipeline_mode = #tpu.pipeline_mode<synchronous>, transform_indices = @transform_1, window_bounds = array<i64: 8, 128>}, {pipeline_mode = #tpu.pipeline_mode<synchronous>, transform_indices = @transform_2, window_bounds = array<i64: 1, 128>}, {pipeline_mode = #tpu.pipeline_mode<synchronous>, transform_indices = @transform_3, window_bounds = array<i64: 1, 128>}, {transform_indices = @transform_4, window_bounds = array<i64: 3200, 384>}, {transform_indices = @transform_5, window_bounds = array<i64: 1, 384>}, {transform_indices = @transform_6, window_bounds = array<i64: 1, 384>}, {transform_indices = @transform_7, window_bounds = array<i64: 384, 128>}, {transform_indices = @transform_8, window_bounds = array<i64: 1, 2, 128>}]} {
    %c0 = arith.constant 0 : index
    %c0_0 = arith.constant 0 : index
    %0 = vector.load %arg2[%c0, %c0_0] : memref<8x128xf32, #tpu.memory_space<vmem>>, vector<8x128xf32>
    %c0_1 = arith.constant 0 : index
    %c0_2 = arith.constant 0 : index
    %1 = vector.load %arg3[%c0_1, %c0_2] : memref<1x128xf32, #tpu.memory_space<vmem>>, vector<1x128xf32>
    %c0_3 = arith.constant 0 : index
    %c0_4 = arith.constant 0 : index
    %2 = vector.load %arg4[%c0_3, %c0_4] : memref<1x128xf32, #tpu.memory_space<vmem>>, vector<1x128xf32>
    %c0_5 = arith.constant 0 : index
    %c0_6 = arith.constant 0 : index
    %c0_7 = arith.constant 0 : index
    %3 = vector.load %arg1[%c0_5, %c0_6, %c0_7] : memref<25x2x8xf32, #tpu.memory_space<vmem>>, vector<1x2x8xf32>
    %4 = vector.shape_cast %3 : vector<1x2x8xf32> to vector<2x8xf32>
    %cst = arith.constant dense<0.000000e+00> : vector<2x128xf32>
    %5 = tpu.matmul %4, %0, %cst {dimension_numbers = #tpu.dot_dimension_numbers<[1], [0], [0], [1], [0, 0, 1, 1], [], []>} : vector<2x8xf32>, vector<8x128xf32>, vector<2x128xf32> -> vector<2x128xf32>
    %6 = vector.broadcast %1 : vector<1x128xf32> to vector<2x128xf32>
    %7 = arith.mulf %5, %6 : vector<2x128xf32>
    %8 = vector.broadcast %2 : vector<1x128xf32> to vector<2x128xf32>
    %9 = arith.addf %7, %8 : vector<2x128xf32>
    %cst_8 = arith.constant 0.000000e+00 : f32
    %10 = vector.broadcast %cst_8 : f32 to vector<2x128xf32>
    %11 = arith.maximumf %9, %10 : vector<2x128xf32>
    %12 = arith.truncf %11 : vector<2x128xf32> to vector<2x128xbf16>
    %c0_9 = arith.constant 0 : index
    %c0_10 = arith.constant 0 : index
    %13 = vector.load %arg10[%c0_9, %c0_10] : memref<2x3200xbf16, #tpu.memory_space<vmem>>, vector<2x128xbf16>
    tpu.vector_store %arg10[%c0_9, %c0_10], %12 {strides = array<i32>} : memref<2x3200xbf16, #tpu.memory_space<vmem>>, vector<2x128xbf16>,
    %c1 = arith.constant 1 : index
    %c0_11 = arith.constant 0 : index
    %c0_12 = arith.constant 0 : index
    %14 = vector.load %arg1[%c1, %c0_11, %c0_12] : memref<25x2x8xf32, #tpu.memory_space<vmem>>, vector<1x2x8xf32>
    %15 = vector.shape_cast %14 : vector<1x2x8xf32> to vector<2x8xf32>
    %cst_13 = arith.constant dense<0.000000e+00> : vector<2x128xf32>
    %16 = tpu.matmul %15, %0, %cst_13 {dimension_numbers = #tpu.dot_dimension_numbers<[1], [0], [0], [1], [0, 0, 1, 1], [], []>} : vector<2x8xf32>, vector<8x128xf32>, vector<2x128xf32> -> vector<2x128xf32>
    %17 = vector.broadcast %1 : vector<1x128xf32> to vector<2x128xf32>
    %18 = arith.mulf %16, %17 : vector<2x128xf32>
    %19 = vector.broadcast %2 : vector<1x128xf32> to vector<2x128xf32>
    %20 = arith.addf %18, %19 : vector<2x128xf32>
    %cst_14 = arith.constant 0.000000e+00 : f32
    %21 = vector.broadcast %cst_14 : f32 to vector<2x128xf32>
    %22 = arith.maximumf %20, %21 : vector<2x128xf32>
    %23 = arith.truncf %22 : vector<2x128xf32> to vector<2x128xbf16>
    %c0_15 = arith.constant 0 : index
    %c128 = arith.constant 128 : index
    %24 = vector.load %arg10[%c0_15, %c128] : memref<2x3200xbf16, #tpu.memory_space<vmem>>, vector<2x128xbf16>
    tpu.vector_store %arg10[%c0_15, %c128], %23 {strides = array<i32>} : memref<2x3200xbf16, #tpu.memory_space<vmem>>, vector<2x128xbf16>,
    %c2 = arith.constant 2 : index
    %c0_16 = arith.constant 0 : index
    %c0_17 = arith.constant 0 : index
    %25 = vector.load %arg1[%c2, %c0_16, %c0_17] : memref<25x2x8xf32, #tpu.memory_space<vmem>>, vector<1x2x8xf32>
    %26 = vector.shape_cast %25 : vector<1x2x8xf32> to vector<2x8xf32>
    %cst_18 = arith.constant dense<0.000000e+00> : vector<2x128xf32>
    %27 = tpu.matmul %26, %0, %cst_18 {dimension_numbers = #tpu.dot_dimension_numbers<[1], [0], [0], [1], [0, 0, 1, 1], [], []>} : vector<2x8xf32>, vector<8x128xf32>, vector<2x128xf32> -> vector<2x128xf32>
    %28 = vector.broadcast %1 : vector<1x128xf32> to vector<2x128xf32>
    %29 = arith.mulf %27, %28 : vector<2x128xf32>
    %30 = vector.broadcast %2 : vector<1x128xf32> to vector<2x128xf32>
    %31 = arith.addf %29, %30 : vector<2x128xf32>
    %cst_19 = arith.constant 0.000000e+00 : f32
    %32 = vector.broadcast %cst_19 : f32 to vector<2x128xf32>
    %33 = arith.maximumf %31, %32 : vector<2x128xf32>
    %34 = arith.truncf %33 : vector<2x128xf32> to vector<2x128xbf16>
    %c0_20 = arith.constant 0 : index
    %c256 = arith.constant 256 : index
    %35 = vector.load %arg10[%c0_20, %c256] : memref<2x3200xbf16, #tpu.memory_space<vmem>>, vector<2x128xbf16>
    tpu.vector_store %arg10[%c0_20, %c256], %34 {strides = array<i32>} : memref<2x3200xbf16, #tpu.memory_space<vmem>>, vector<2x128xbf16>,
    %c3 = arith.constant 3 : index
    %c0_21 = arith.constant 0 : index
    %c0_22 = arith.constant 0 : index
    %36 = vector.load %arg1[%c3, %c0_21, %c0_22] : memref<25x2x8xf32, #tpu.memory_space<vmem>>, vector<1x2x8xf32>
    %37 = vector.shape_cast %36 : vector<1x2x8xf32> to vector<2x8xf32>
    %cst_23 = arith.constant dense<0.000000e+00> : vector<2x128xf32>
    %38 = tpu.matmul %37, %0, %cst_23 {dimension_numbers = #tpu.dot_dimension_numbers<[1], [0], [0], [1], [0, 0, 1, 1], [], []>} : vector<2x8xf32>, vector<8x128xf32>, vector<2x128xf32> -> vector<2x128xf32>
    %39 = vector.broadcast %1 : vector<1x128xf32> to vector<2x128xf32>
    %40 = arith.mulf %38, %39 : vector<2x128xf32>
    %41 = vector.broadcast %2 : vector<1x128xf32> to vector<2x128xf32>
    %42 = arith.addf %40, %41 : vector<2x128xf32>
    %cst_24 = arith.constant 0.000000e+00 : f32
    %43 = vector.broadcast %cst_24 : f32 to vector<2x128xf32>
    %44 = arith.maximumf %42, %43 : vector<2x128xf32>
    %45 = arith.truncf %44 : vector<2x128xf32> to vector<2x128xbf16>
    %c0_25 = arith.constant 0 : index
    %c384 = arith.constant 384 : index
    %46 = vector.load %arg10[%c0_25, %c384] : memref<2x3200xbf16, #tpu.memory_space<vmem>>, vector<2x128xbf16>
    tpu.vector_store %arg10[%c0_25, %c384], %45 {strides = array<i32>} : memref<2x3200xbf16, #tpu.memory_space<vmem>>, vector<2x128xbf16>,
    %c4 = arith.constant 4 : index
    %c0_26 = arith.constant 0 : index
    %c0_27 = arith.constant 0 : index
    %47 = vector.load %arg1[%c4, %c0_26, %c0_27] : memref<25x2x8xf32, #tpu.memory_space<vmem>>, vector<1x2x8xf32>
    %48 = vector.shape_cast %47 : vector<1x2x8xf32> to vector<2x8xf32>
    %cst_28 = arith.constant dense<0.000000e+00> : vector<2x128xf32>
    %49 = tpu.matmul %48, %0, %cst_28 {dimension_numbers = #tpu.dot_dimension_numbers<[1], [0], [0], [1], [0, 0, 1, 1], [], []>} : vector<2x8xf32>, vector<8x128xf32>, vector<2x128xf32> -> vector<2x128xf32>
    %50 = vector.broadcast %1 : vector<1x128xf32> to vector<2x128xf32>
    %51 = arith.mulf %49, %50 : vector<2x128xf32>
    %52 = vector.broadcast %2 : vector<1x128xf32> to vector<2x128xf32>
    %53 = arith.addf %51, %52 : vector<2x128xf32>
    %cst_29 = arith.constant 0.000000e+00 : f32
    %54 = vector.broadcast %cst_29 : f32 to vector<2x128xf32>
    %55 = arith.maximumf %53, %54 : vector<2x128xf32>
    %56 = arith.truncf %55 : vector<2x128xf32> to vector<2x128xbf16>
    %c0_30 = arith.constant 0 : index
    %c512 = arith.constant 512 : index
    %57 = vector.load %arg10[%c0_30, %c512] : memref<2x3200xbf16, #tpu.memory_space<vmem>>, vector<2x128xbf16>
    tpu.vector_store %arg10[%c0_30, %c512], %56 {strides = array<i32>} : memref<2x3200xbf16, #tpu.memory_space<vmem>>, vector<2x128xbf16>,
    %c5 = arith.constant 5 : index
    %c0_31 = arith.constant 0 : index
    %c0_32 = arith.constant 0 : index
    %58 = vector.load %arg1[%c5, %c0_31, %c0_32] : memref<25x2x8xf32, #tpu.memory_space<vmem>>, vector<1x2x8xf32>
    %59 = vector.shape_cast %58 : vector<1x2x8xf32> to vector<2x8xf32>
    %cst_33 = arith.constant dense<0.000000e+00> : vector<2x128xf32>
    %60 = tpu.matmul %59, %0, %cst_33 {dimension_numbers = #tpu.dot_dimension_numbers<[1], [0], [0], [1], [0, 0, 1, 1], [], []>} : vector<2x8xf32>, vector<8x128xf32>, vector<2x128xf32> -> vector<2x128xf32>
    %61 = vector.broadcast %1 : vector<1x128xf32> to vector<2x128xf32>
    %62 = arith.mulf %60, %61 : vector<2x128xf32>
    %63 = vector.broadcast %2 : vector<1x128xf32> to vector<2x128xf32>
    %64 = arith.addf %62, %63 : vector<2x128xf32>
    %cst_34 = arith.constant 0.000000e+00 : f32
    %65 = vector.broadcast %cst_34 : f32 to vector<2x128xf32>
    %66 = arith.maximumf %64, %65 : vector<2x128xf32>
    %67 = arith.truncf %66 : vector<2x128xf32> to vector<2x128xbf16>
    %c0_35 = arith.constant 0 : index
    %c640 = arith.constant 640 : index
    %68 = vector.load %arg10[%c0_35, %c640] : memref<2x3200xbf16, #tpu.memory_space<vmem>>, vector<2x128xbf16>
    tpu.vector_store %arg10[%c0_35, %c640], %67 {strides = array<i32>} : memref<2x3200xbf16, #tpu.memory_space<vmem>>, vector<2x128xbf16>,
    %c6 = arith.constant 6 : index
    %c0_36 = arith.constant 0 : index
    %c0_37 = arith.constant 0 : index
    %69 = vector.load %arg1[%c6, %c0_36, %c0_37] : memref<25x2x8xf32, #tpu.memory_space<vmem>>, vector<1x2x8xf32>
    %70 = vector.shape_cast %69 : vector<1x2x8xf32> to vector<2x8xf32>
    %cst_38 = arith.constant dense<0.000000e+00> : vector<2x128xf32>
    %71 = tpu.matmul %70, %0, %cst_38 {dimension_numbers = #tpu.dot_dimension_numbers<[1], [0], [0], [1], [0, 0, 1, 1], [], []>} : vector<2x8xf32>, vector<8x128xf32>, vector<2x128xf32> -> vector<2x128xf32>
    %72 = vector.broadcast %1 : vector<1x128xf32> to vector<2x128xf32>
    %73 = arith.mulf %71, %72 : vector<2x128xf32>
    %74 = vector.broadcast %2 : vector<1x128xf32> to vector<2x128xf32>
    %75 = arith.addf %73, %74 : vector<2x128xf32>
    %cst_39 = arith.constant 0.000000e+00 : f32
    %76 = vector.broadcast %cst_39 : f32 to vector<2x128xf32>
    %77 = arith.maximumf %75, %76 : vector<2x128xf32>
    %78 = arith.truncf %77 : vector<2x128xf32> to vector<2x128xbf16>
    %c0_40 = arith.constant 0 : index
    %c768 = arith.constant 768 : index
    %79 = vector.load %arg10[%c0_40, %c768] : memref<2x3200xbf16, #tpu.memory_space<vmem>>, vector<2x128xbf16>
    tpu.vector_store %arg10[%c0_40, %c768], %78 {strides = array<i32>} : memref<2x3200xbf16, #tpu.memory_space<vmem>>, vector<2x128xbf16>,
    %c7 = arith.constant 7 : index
    %c0_41 = arith.constant 0 : index
    %c0_42 = arith.constant 0 : index
    %80 = vector.load %arg1[%c7, %c0_41, %c0_42] : memref<25x2x8xf32, #tpu.memory_space<vmem>>, vector<1x2x8xf32>
    %81 = vector.shape_cast %80 : vector<1x2x8xf32> to vector<2x8xf32>
    %cst_43 = arith.constant dense<0.000000e+00> : vector<2x128xf32>
    %82 = tpu.matmul %81, %0, %cst_43 {dimension_numbers = #tpu.dot_dimension_numbers<[1], [0], [0], [1], [0, 0, 1, 1], [], []>} : vector<2x8xf32>, vector<8x128xf32>, vector<2x128xf32> -> vector<2x128xf32>
    %83 = vector.broadcast %1 : vector<1x128xf32> to vector<2x128xf32>
    %84 = arith.mulf %82, %83 : vector<2x128xf32>
    %85 = vector.broadcast %2 : vector<1x128xf32> to vector<2x128xf32>
    %86 = arith.addf %84, %85 : vector<2x128xf32>
    %cst_44 = arith.constant 0.000000e+00 : f32
    %87 = vector.broadcast %cst_44 : f32 to vector<2x128xf32>
    %88 = arith.maximumf %86, %87 : vector<2x128xf32>
    %89 = arith.truncf %88 : vector<2x128xf32> to vector<2x128xbf16>
    %c0_45 = arith.constant 0 : index
    %c896 = arith.constant 896 : index
    %90 = vector.load %arg10[%c0_45, %c896] : memref<2x3200xbf16, #tpu.memory_space<vmem>>, vector<2x128xbf16>
    tpu.vector_store %arg10[%c0_45, %c896], %89 {strides = array<i32>} : memref<2x3200xbf16, #tpu.memory_space<vmem>>, vector<2x128xbf16>,
    %c8 = arith.constant 8 : index
    %c0_46 = arith.constant 0 : index
    %c0_47 = arith.constant 0 : index
    %91 = vector.load %arg1[%c8, %c0_46, %c0_47] : memref<25x2x8xf32, #tpu.memory_space<vmem>>, vector<1x2x8xf32>
    %92 = vector.shape_cast %91 : vector<1x2x8xf32> to vector<2x8xf32>
    %cst_48 = arith.constant dense<0.000000e+00> : vector<2x128xf32>
    %93 = tpu.matmul %92, %0, %cst_48 {dimension_numbers = #tpu.dot_dimension_numbers<[1], [0], [0], [1], [0, 0, 1, 1], [], []>} : vector<2x8xf32>, vector<8x128xf32>, vector<2x128xf32> -> vector<2x128xf32>
    %94 = vector.broadcast %1 : vector<1x128xf32> to vector<2x128xf32>
    %95 = arith.mulf %93, %94 : vector<2x128xf32>
    %96 = vector.broadcast %2 : vector<1x128xf32> to vector<2x128xf32>
    %97 = arith.addf %95, %96 : vector<2x128xf32>
    %cst_49 = arith.constant 0.000000e+00 : f32
    %98 = vector.broadcast %cst_49 : f32 to vector<2x128xf32>
    %99 = arith.maximumf %97, %98 : vector<2x128xf32>
    %100 = arith.truncf %99 : vector<2x128xf32> to vector<2x128xbf16>
    %c0_50 = arith.constant 0 : index
    %c1024 = arith.constant 1024 : index
    %101 = vector.load %arg10[%c0_50, %c1024] : memref<2x3200xbf16, #tpu.memory_space<vmem>>, vector<2x128xbf16>
    tpu.vector_store %arg10[%c0_50, %c1024], %100 {strides = array<i32>} : memref<2x3200xbf16, #tpu.memory_space<vmem>>, vector<2x128xbf16>,
    %c9 = arith.constant 9 : index
    %c0_51 = arith.constant 0 : index
    %c0_52 = arith.constant 0 : index
    %102 = vector.load %arg1[%c9, %c0_51, %c0_52] : memref<25x2x8xf32, #tpu.memory_space<vmem>>, vector<1x2x8xf32>
    %103 = vector.shape_cast %102 : vector<1x2x8xf32> to vector<2x8xf32>
    %cst_53 = arith.constant dense<0.000000e+00> : vector<2x128xf32>
    %104 = tpu.matmul %103, %0, %cst_53 {dimension_numbers = #tpu.dot_dimension_numbers<[1], [0], [0], [1], [0, 0, 1, 1], [], []>} : vector<2x8xf32>, vector<8x128xf32>, vector<2x128xf32> -> vector<2x128xf32>
    %105 = vector.broadcast %1 : vector<1x128xf32> to vector<2x128xf32>
    %106 = arith.mulf %104, %105 : vector<2x128xf32>
    %107 = vector.broadcast %2 : vector<1x128xf32> to vector<2x128xf32>
    %108 = arith.addf %106, %107 : vector<2x128xf32>
    %cst_54 = arith.constant 0.000000e+00 : f32
    %109 = vector.broadcast %cst_54 : f32 to vector<2x128xf32>
    %110 = arith.maximumf %108, %109 : vector<2x128xf32>
    %111 = arith.truncf %110 : vector<2x128xf32> to vector<2x128xbf16>
    %c0_55 = arith.constant 0 : index
    %c1152 = arith.constant 1152 : index
    %112 = vector.load %arg10[%c0_55, %c1152] : memref<2x3200xbf16, #tpu.memory_space<vmem>>, vector<2x128xbf16>
    tpu.vector_store %arg10[%c0_55, %c1152], %111 {strides = array<i32>} : memref<2x3200xbf16, #tpu.memory_space<vmem>>, vector<2x128xbf16>,
    %c10 = arith.constant 10 : index
    %c0_56 = arith.constant 0 : index
    %c0_57 = arith.constant 0 : index
    %113 = vector.load %arg1[%c10, %c0_56, %c0_57] : memref<25x2x8xf32, #tpu.memory_space<vmem>>, vector<1x2x8xf32>
    %114 = vector.shape_cast %113 : vector<1x2x8xf32> to vector<2x8xf32>
    %cst_58 = arith.constant dense<0.000000e+00> : vector<2x128xf32>
    %115 = tpu.matmul %114, %0, %cst_58 {dimension_numbers = #tpu.dot_dimension_numbers<[1], [0], [0], [1], [0, 0, 1, 1], [], []>} : vector<2x8xf32>, vector<8x128xf32>, vector<2x128xf32> -> vector<2x128xf32>
    %116 = vector.broadcast %1 : vector<1x128xf32> to vector<2x128xf32>
    %117 = arith.mulf %115, %116 : vector<2x128xf32>
    %118 = vector.broadcast %2 : vector<1x128xf32> to vector<2x128xf32>
    %119 = arith.addf %117, %118 : vector<2x128xf32>
    %cst_59 = arith.constant 0.000000e+00 : f32
    %120 = vector.broadcast %cst_59 : f32 to vector<2x128xf32>
    %121 = arith.maximumf %119, %120 : vector<2x128xf32>
    %122 = arith.truncf %121 : vector<2x128xf32> to vector<2x128xbf16>
    %c0_60 = arith.constant 0 : index
    %c1280 = arith.constant 1280 : index
    %123 = vector.load %arg10[%c0_60, %c1280] : memref<2x3200xbf16, #tpu.memory_space<vmem>>, vector<2x128xbf16>
    tpu.vector_store %arg10[%c0_60, %c1280], %122 {strides = array<i32>} : memref<2x3200xbf16, #tpu.memory_space<vmem>>, vector<2x128xbf16>,
    %c11 = arith.constant 11 : index
    %c0_61 = arith.constant 0 : index
    %c0_62 = arith.constant 0 : index
    %124 = vector.load %arg1[%c11, %c0_61, %c0_62] : memref<25x2x8xf32, #tpu.memory_space<vmem>>, vector<1x2x8xf32>
    %125 = vector.shape_cast %124 : vector<1x2x8xf32> to vector<2x8xf32>
    %cst_63 = arith.constant dense<0.000000e+00> : vector<2x128xf32>
    %126 = tpu.matmul %125, %0, %cst_63 {dimension_numbers = #tpu.dot_dimension_numbers<[1], [0], [0], [1], [0, 0, 1, 1], [], []>} : vector<2x8xf32>, vector<8x128xf32>, vector<2x128xf32> -> vector<2x128xf32>
    %127 = vector.broadcast %1 : vector<1x128xf32> to vector<2x128xf32>
    %128 = arith.mulf %126, %127 : vector<2x128xf32>
    %129 = vector.broadcast %2 : vector<1x128xf32> to vector<2x128xf32>
    %130 = arith.addf %128, %129 : vector<2x128xf32>
    %cst_64 = arith.constant 0.000000e+00 : f32
    %131 = vector.broadcast %cst_64 : f32 to vector<2x128xf32>
    %132 = arith.maximumf %130, %131 : vector<2x128xf32>
    %133 = arith.truncf %132 : vector<2x128xf32> to vector<2x128xbf16>
    %c0_65 = arith.constant 0 : index
    %c1408 = arith.constant 1408 : index
    %134 = vector.load %arg10[%c0_65, %c1408] : memref<2x3200xbf16, #tpu.memory_space<vmem>>, vector<2x128xbf16>
    tpu.vector_store %arg10[%c0_65, %c1408], %133 {strides = array<i32>} : memref<2x3200xbf16, #tpu.memory_space<vmem>>, vector<2x128xbf16>,
    %c12 = arith.constant 12 : index
    %c0_66 = arith.constant 0 : index
    %c0_67 = arith.constant 0 : index
    %135 = vector.load %arg1[%c12, %c0_66, %c0_67] : memref<25x2x8xf32, #tpu.memory_space<vmem>>, vector<1x2x8xf32>
    %136 = vector.shape_cast %135 : vector<1x2x8xf32> to vector<2x8xf32>
    %cst_68 = arith.constant dense<0.000000e+00> : vector<2x128xf32>
    %137 = tpu.matmul %136, %0, %cst_68 {dimension_numbers = #tpu.dot_dimension_numbers<[1], [0], [0], [1], [0, 0, 1, 1], [], []>} : vector<2x8xf32>, vector<8x128xf32>, vector<2x128xf32> -> vector<2x128xf32>
    %138 = vector.broadcast %1 : vector<1x128xf32> to vector<2x128xf32>
    %139 = arith.mulf %137, %138 : vector<2x128xf32>
    %140 = vector.broadcast %2 : vector<1x128xf32> to vector<2x128xf32>
    %141 = arith.addf %139, %140 : vector<2x128xf32>
    %cst_69 = arith.constant 0.000000e+00 : f32
    %142 = vector.broadcast %cst_69 : f32 to vector<2x128xf32>
    %143 = arith.maximumf %141, %142 : vector<2x128xf32>
    %144 = arith.truncf %143 : vector<2x128xf32> to vector<2x128xbf16>
    %c0_70 = arith.constant 0 : index
    %c1536 = arith.constant 1536 : index
    %145 = vector.load %arg10[%c0_70, %c1536] : memref<2x3200xbf16, #tpu.memory_space<vmem>>, vector<2x128xbf16>
    tpu.vector_store %arg10[%c0_70, %c1536], %144 {strides = array<i32>} : memref<2x3200xbf16, #tpu.memory_space<vmem>>, vector<2x128xbf16>,
    %c13 = arith.constant 13 : index
    %c0_71 = arith.constant 0 : index
    %c0_72 = arith.constant 0 : index
    %146 = vector.load %arg1[%c13, %c0_71, %c0_72] : memref<25x2x8xf32, #tpu.memory_space<vmem>>, vector<1x2x8xf32>
    %147 = vector.shape_cast %146 : vector<1x2x8xf32> to vector<2x8xf32>
    %cst_73 = arith.constant dense<0.000000e+00> : vector<2x128xf32>
    %148 = tpu.matmul %147, %0, %cst_73 {dimension_numbers = #tpu.dot_dimension_numbers<[1], [0], [0], [1], [0, 0, 1, 1], [], []>} : vector<2x8xf32>, vector<8x128xf32>, vector<2x128xf32> -> vector<2x128xf32>
    %149 = vector.broadcast %1 : vector<1x128xf32> to vector<2x128xf32>
    %150 = arith.mulf %148, %149 : vector<2x128xf32>
    %151 = vector.broadcast %2 : vector<1x128xf32> to vector<2x128xf32>
    %152 = arith.addf %150, %151 : vector<2x128xf32>
    %cst_74 = arith.constant 0.000000e+00 : f32
    %153 = vector.broadcast %cst_74 : f32 to vector<2x128xf32>
    %154 = arith.maximumf %152, %153 : vector<2x128xf32>
    %155 = arith.truncf %154 : vector<2x128xf32> to vector<2x128xbf16>
    %c0_75 = arith.constant 0 : index
    %c1664 = arith.constant 1664 : index
    %156 = vector.load %arg10[%c0_75, %c1664] : memref<2x3200xbf16, #tpu.memory_space<vmem>>, vector<2x128xbf16>
    tpu.vector_store %arg10[%c0_75, %c1664], %155 {strides = array<i32>} : memref<2x3200xbf16, #tpu.memory_space<vmem>>, vector<2x128xbf16>,
    %c14 = arith.constant 14 : index
    %c0_76 = arith.constant 0 : index
    %c0_77 = arith.constant 0 : index
    %157 = vector.load %arg1[%c14, %c0_76, %c0_77] : memref<25x2x8xf32, #tpu.memory_space<vmem>>, vector<1x2x8xf32>
    %158 = vector.shape_cast %157 : vector<1x2x8xf32> to vector<2x8xf32>
    %cst_78 = arith.constant dense<0.000000e+00> : vector<2x128xf32>
    %159 = tpu.matmul %158, %0, %cst_78 {dimension_numbers = #tpu.dot_dimension_numbers<[1], [0], [0], [1], [0, 0, 1, 1], [], []>} : vector<2x8xf32>, vector<8x128xf32>, vector<2x128xf32> -> vector<2x128xf32>
    %160 = vector.broadcast %1 : vector<1x128xf32> to vector<2x128xf32>
    %161 = arith.mulf %159, %160 : vector<2x128xf32>
    %162 = vector.broadcast %2 : vector<1x128xf32> to vector<2x128xf32>
    %163 = arith.addf %161, %162 : vector<2x128xf32>
    %cst_79 = arith.constant 0.000000e+00 : f32
    %164 = vector.broadcast %cst_79 : f32 to vector<2x128xf32>
    %165 = arith.maximumf %163, %164 : vector<2x128xf32>
    %166 = arith.truncf %165 : vector<2x128xf32> to vector<2x128xbf16>
    %c0_80 = arith.constant 0 : index
    %c1792 = arith.constant 1792 : index
    %167 = vector.load %arg10[%c0_80, %c1792] : memref<2x3200xbf16, #tpu.memory_space<vmem>>, vector<2x128xbf16>
    tpu.vector_store %arg10[%c0_80, %c1792], %166 {strides = array<i32>} : memref<2x3200xbf16, #tpu.memory_space<vmem>>, vector<2x128xbf16>,
    %c15 = arith.constant 15 : index
    %c0_81 = arith.constant 0 : index
    %c0_82 = arith.constant 0 : index
    %168 = vector.load %arg1[%c15, %c0_81, %c0_82] : memref<25x2x8xf32, #tpu.memory_space<vmem>>, vector<1x2x8xf32>
    %169 = vector.shape_cast %168 : vector<1x2x8xf32> to vector<2x8xf32>
    %cst_83 = arith.constant dense<0.000000e+00> : vector<2x128xf32>
    %170 = tpu.matmul %169, %0, %cst_83 {dimension_numbers = #tpu.dot_dimension_numbers<[1], [0], [0], [1], [0, 0, 1, 1], [], []>} : vector<2x8xf32>, vector<8x128xf32>, vector<2x128xf32> -> vector<2x128xf32>
    %171 = vector.broadcast %1 : vector<1x128xf32> to vector<2x128xf32>
    %172 = arith.mulf %170, %171 : vector<2x128xf32>
    %173 = vector.broadcast %2 : vector<1x128xf32> to vector<2x128xf32>
    %174 = arith.addf %172, %173 : vector<2x128xf32>
    %cst_84 = arith.constant 0.000000e+00 : f32
    %175 = vector.broadcast %cst_84 : f32 to vector<2x128xf32>
    %176 = arith.maximumf %174, %175 : vector<2x128xf32>
    %177 = arith.truncf %176 : vector<2x128xf32> to vector<2x128xbf16>
    %c0_85 = arith.constant 0 : index
    %c1920 = arith.constant 1920 : index
    %178 = vector.load %arg10[%c0_85, %c1920] : memref<2x3200xbf16, #tpu.memory_space<vmem>>, vector<2x128xbf16>
    tpu.vector_store %arg10[%c0_85, %c1920], %177 {strides = array<i32>} : memref<2x3200xbf16, #tpu.memory_space<vmem>>, vector<2x128xbf16>,
    %c16 = arith.constant 16 : index
    %c0_86 = arith.constant 0 : index
    %c0_87 = arith.constant 0 : index
    %179 = vector.load %arg1[%c16, %c0_86, %c0_87] : memref<25x2x8xf32, #tpu.memory_space<vmem>>, vector<1x2x8xf32>
    %180 = vector.shape_cast %179 : vector<1x2x8xf32> to vector<2x8xf32>
    %cst_88 = arith.constant dense<0.000000e+00> : vector<2x128xf32>
    %181 = tpu.matmul %180, %0, %cst_88 {dimension_numbers = #tpu.dot_dimension_numbers<[1], [0], [0], [1], [0, 0, 1, 1], [], []>} : vector<2x8xf32>, vector<8x128xf32>, vector<2x128xf32> -> vector<2x128xf32>
    %182 = vector.broadcast %1 : vector<1x128xf32> to vector<2x128xf32>
    %183 = arith.mulf %181, %182 : vector<2x128xf32>
    %184 = vector.broadcast %2 : vector<1x128xf32> to vector<2x128xf32>
    %185 = arith.addf %183, %184 : vector<2x128xf32>
    %cst_89 = arith.constant 0.000000e+00 : f32
    %186 = vector.broadcast %cst_89 : f32 to vector<2x128xf32>
    %187 = arith.maximumf %185, %186 : vector<2x128xf32>
    %188 = arith.truncf %187 : vector<2x128xf32> to vector<2x128xbf16>
    %c0_90 = arith.constant 0 : index
    %c2048 = arith.constant 2048 : index
    %189 = vector.load %arg10[%c0_90, %c2048] : memref<2x3200xbf16, #tpu.memory_space<vmem>>, vector<2x128xbf16>
    tpu.vector_store %arg10[%c0_90, %c2048], %188 {strides = array<i32>} : memref<2x3200xbf16, #tpu.memory_space<vmem>>, vector<2x128xbf16>,
    %c17 = arith.constant 17 : index
    %c0_91 = arith.constant 0 : index
    %c0_92 = arith.constant 0 : index
    %190 = vector.load %arg1[%c17, %c0_91, %c0_92] : memref<25x2x8xf32, #tpu.memory_space<vmem>>, vector<1x2x8xf32>
    %191 = vector.shape_cast %190 : vector<1x2x8xf32> to vector<2x8xf32>
    %cst_93 = arith.constant dense<0.000000e+00> : vector<2x128xf32>
    %192 = tpu.matmul %191, %0, %cst_93 {dimension_numbers = #tpu.dot_dimension_numbers<[1], [0], [0], [1], [0, 0, 1, 1], [], []>} : vector<2x8xf32>, vector<8x128xf32>, vector<2x128xf32> -> vector<2x128xf32>
    %193 = vector.broadcast %1 : vector<1x128xf32> to vector<2x128xf32>
    %194 = arith.mulf %192, %193 : vector<2x128xf32>
    %195 = vector.broadcast %2 : vector<1x128xf32> to vector<2x128xf32>
    %196 = arith.addf %194, %195 : vector<2x128xf32>
    %cst_94 = arith.constant 0.000000e+00 : f32
    %197 = vector.broadcast %cst_94 : f32 to vector<2x128xf32>
    %198 = arith.maximumf %196, %197 : vector<2x128xf32>
    %199 = arith.truncf %198 : vector<2x128xf32> to vector<2x128xbf16>
    %c0_95 = arith.constant 0 : index
    %c2176 = arith.constant 2176 : index
    %200 = vector.load %arg10[%c0_95, %c2176] : memref<2x3200xbf16, #tpu.memory_space<vmem>>, vector<2x128xbf16>
    tpu.vector_store %arg10[%c0_95, %c2176], %199 {strides = array<i32>} : memref<2x3200xbf16, #tpu.memory_space<vmem>>, vector<2x128xbf16>,
    %c18 = arith.constant 18 : index
    %c0_96 = arith.constant 0 : index
    %c0_97 = arith.constant 0 : index
    %201 = vector.load %arg1[%c18, %c0_96, %c0_97] : memref<25x2x8xf32, #tpu.memory_space<vmem>>, vector<1x2x8xf32>
    %202 = vector.shape_cast %201 : vector<1x2x8xf32> to vector<2x8xf32>
    %cst_98 = arith.constant dense<0.000000e+00> : vector<2x128xf32>
    %203 = tpu.matmul %202, %0, %cst_98 {dimension_numbers = #tpu.dot_dimension_numbers<[1], [0], [0], [1], [0, 0, 1, 1], [], []>} : vector<2x8xf32>, vector<8x128xf32>, vector<2x128xf32> -> vector<2x128xf32>
    %204 = vector.broadcast %1 : vector<1x128xf32> to vector<2x128xf32>
    %205 = arith.mulf %203, %204 : vector<2x128xf32>
    %206 = vector.broadcast %2 : vector<1x128xf32> to vector<2x128xf32>
    %207 = arith.addf %205, %206 : vector<2x128xf32>
    %cst_99 = arith.constant 0.000000e+00 : f32
    %208 = vector.broadcast %cst_99 : f32 to vector<2x128xf32>
    %209 = arith.maximumf %207, %208 : vector<2x128xf32>
    %210 = arith.truncf %209 : vector<2x128xf32> to vector<2x128xbf16>
    %c0_100 = arith.constant 0 : index
    %c2304 = arith.constant 2304 : index
    %211 = vector.load %arg10[%c0_100, %c2304] : memref<2x3200xbf16, #tpu.memory_space<vmem>>, vector<2x128xbf16>
    tpu.vector_store %arg10[%c0_100, %c2304], %210 {strides = array<i32>} : memref<2x3200xbf16, #tpu.memory_space<vmem>>, vector<2x128xbf16>,
    %c19 = arith.constant 19 : index
    %c0_101 = arith.constant 0 : index
    %c0_102 = arith.constant 0 : index
    %212 = vector.load %arg1[%c19, %c0_101, %c0_102] : memref<25x2x8xf32, #tpu.memory_space<vmem>>, vector<1x2x8xf32>
    %213 = vector.shape_cast %212 : vector<1x2x8xf32> to vector<2x8xf32>
    %cst_103 = arith.constant dense<0.000000e+00> : vector<2x128xf32>
    %214 = tpu.matmul %213, %0, %cst_103 {dimension_numbers = #tpu.dot_dimension_numbers<[1], [0], [0], [1], [0, 0, 1, 1], [], []>} : vector<2x8xf32>, vector<8x128xf32>, vector<2x128xf32> -> vector<2x128xf32>
    %215 = vector.broadcast %1 : vector<1x128xf32> to vector<2x128xf32>
    %216 = arith.mulf %214, %215 : vector<2x128xf32>
    %217 = vector.broadcast %2 : vector<1x128xf32> to vector<2x128xf32>
    %218 = arith.addf %216, %217 : vector<2x128xf32>
    %cst_104 = arith.constant 0.000000e+00 : f32
    %219 = vector.broadcast %cst_104 : f32 to vector<2x128xf32>
    %220 = arith.maximumf %218, %219 : vector<2x128xf32>
    %221 = arith.truncf %220 : vector<2x128xf32> to vector<2x128xbf16>
    %c0_105 = arith.constant 0 : index
    %c2432 = arith.constant 2432 : index
    %222 = vector.load %arg10[%c0_105, %c2432] : memref<2x3200xbf16, #tpu.memory_space<vmem>>, vector<2x128xbf16>
    tpu.vector_store %arg10[%c0_105, %c2432], %221 {strides = array<i32>} : memref<2x3200xbf16, #tpu.memory_space<vmem>>, vector<2x128xbf16>,
    %c20 = arith.constant 20 : index
    %c0_106 = arith.constant 0 : index
    %c0_107 = arith.constant 0 : index
    %223 = vector.load %arg1[%c20, %c0_106, %c0_107] : memref<25x2x8xf32, #tpu.memory_space<vmem>>, vector<1x2x8xf32>
    %224 = vector.shape_cast %223 : vector<1x2x8xf32> to vector<2x8xf32>
    %cst_108 = arith.constant dense<0.000000e+00> : vector<2x128xf32>
    %225 = tpu.matmul %224, %0, %cst_108 {dimension_numbers = #tpu.dot_dimension_numbers<[1], [0], [0], [1], [0, 0, 1, 1], [], []>} : vector<2x8xf32>, vector<8x128xf32>, vector<2x128xf32> -> vector<2x128xf32>
    %226 = vector.broadcast %1 : vector<1x128xf32> to vector<2x128xf32>
    %227 = arith.mulf %225, %226 : vector<2x128xf32>
    %228 = vector.broadcast %2 : vector<1x128xf32> to vector<2x128xf32>
    %229 = arith.addf %227, %228 : vector<2x128xf32>
    %cst_109 = arith.constant 0.000000e+00 : f32
    %230 = vector.broadcast %cst_109 : f32 to vector<2x128xf32>
    %231 = arith.maximumf %229, %230 : vector<2x128xf32>
    %232 = arith.truncf %231 : vector<2x128xf32> to vector<2x128xbf16>
    %c0_110 = arith.constant 0 : index
    %c2560 = arith.constant 2560 : index
    %233 = vector.load %arg10[%c0_110, %c2560] : memref<2x3200xbf16, #tpu.memory_space<vmem>>, vector<2x128xbf16>
    tpu.vector_store %arg10[%c0_110, %c2560], %232 {strides = array<i32>} : memref<2x3200xbf16, #tpu.memory_space<vmem>>, vector<2x128xbf16>,
    %c21 = arith.constant 21 : index
    %c0_111 = arith.constant 0 : index
    %c0_112 = arith.constant 0 : index
    %234 = vector.load %arg1[%c21, %c0_111, %c0_112] : memref<25x2x8xf32, #tpu.memory_space<vmem>>, vector<1x2x8xf32>
    %235 = vector.shape_cast %234 : vector<1x2x8xf32> to vector<2x8xf32>
    %cst_113 = arith.constant dense<0.000000e+00> : vector<2x128xf32>
    %236 = tpu.matmul %235, %0, %cst_113 {dimension_numbers = #tpu.dot_dimension_numbers<[1], [0], [0], [1], [0, 0, 1, 1], [], []>} : vector<2x8xf32>, vector<8x128xf32>, vector<2x128xf32> -> vector<2x128xf32>
    %237 = vector.broadcast %1 : vector<1x128xf32> to vector<2x128xf32>
    %238 = arith.mulf %236, %237 : vector<2x128xf32>
    %239 = vector.broadcast %2 : vector<1x128xf32> to vector<2x128xf32>
    %240 = arith.addf %238, %239 : vector<2x128xf32>
    %cst_114 = arith.constant 0.000000e+00 : f32
    %241 = vector.broadcast %cst_114 : f32 to vector<2x128xf32>
    %242 = arith.maximumf %240, %241 : vector<2x128xf32>
    %243 = arith.truncf %242 : vector<2x128xf32> to vector<2x128xbf16>
    %c0_115 = arith.constant 0 : index
    %c2688 = arith.constant 2688 : index
    %244 = vector.load %arg10[%c0_115, %c2688] : memref<2x3200xbf16, #tpu.memory_space<vmem>>, vector<2x128xbf16>
    tpu.vector_store %arg10[%c0_115, %c2688], %243 {strides = array<i32>} : memref<2x3200xbf16, #tpu.memory_space<vmem>>, vector<2x128xbf16>,
    %c22 = arith.constant 22 : index
    %c0_116 = arith.constant 0 : index
    %c0_117 = arith.constant 0 : index
    %245 = vector.load %arg1[%c22, %c0_116, %c0_117] : memref<25x2x8xf32, #tpu.memory_space<vmem>>, vector<1x2x8xf32>
    %246 = vector.shape_cast %245 : vector<1x2x8xf32> to vector<2x8xf32>
    %cst_118 = arith.constant dense<0.000000e+00> : vector<2x128xf32>
    %247 = tpu.matmul %246, %0, %cst_118 {dimension_numbers = #tpu.dot_dimension_numbers<[1], [0], [0], [1], [0, 0, 1, 1], [], []>} : vector<2x8xf32>, vector<8x128xf32>, vector<2x128xf32> -> vector<2x128xf32>
    %248 = vector.broadcast %1 : vector<1x128xf32> to vector<2x128xf32>
    %249 = arith.mulf %247, %248 : vector<2x128xf32>
    %250 = vector.broadcast %2 : vector<1x128xf32> to vector<2x128xf32>
    %251 = arith.addf %249, %250 : vector<2x128xf32>
    %cst_119 = arith.constant 0.000000e+00 : f32
    %252 = vector.broadcast %cst_119 : f32 to vector<2x128xf32>
    %253 = arith.maximumf %251, %252 : vector<2x128xf32>
    %254 = arith.truncf %253 : vector<2x128xf32> to vector<2x128xbf16>
    %c0_120 = arith.constant 0 : index
    %c2816 = arith.constant 2816 : index
    %255 = vector.load %arg10[%c0_120, %c2816] : memref<2x3200xbf16, #tpu.memory_space<vmem>>, vector<2x128xbf16>
    tpu.vector_store %arg10[%c0_120, %c2816], %254 {strides = array<i32>} : memref<2x3200xbf16, #tpu.memory_space<vmem>>, vector<2x128xbf16>,
    %c23 = arith.constant 23 : index
    %c0_121 = arith.constant 0 : index
    %c0_122 = arith.constant 0 : index
    %256 = vector.load %arg1[%c23, %c0_121, %c0_122] : memref<25x2x8xf32, #tpu.memory_space<vmem>>, vector<1x2x8xf32>
    %257 = vector.shape_cast %256 : vector<1x2x8xf32> to vector<2x8xf32>
    %cst_123 = arith.constant dense<0.000000e+00> : vector<2x128xf32>
    %258 = tpu.matmul %257, %0, %cst_123 {dimension_numbers = #tpu.dot_dimension_numbers<[1], [0], [0], [1], [0, 0, 1, 1], [], []>} : vector<2x8xf32>, vector<8x128xf32>, vector<2x128xf32> -> vector<2x128xf32>
    %259 = vector.broadcast %1 : vector<1x128xf32> to vector<2x128xf32>
    %260 = arith.mulf %258, %259 : vector<2x128xf32>
    %261 = vector.broadcast %2 : vector<1x128xf32> to vector<2x128xf32>
    %262 = arith.addf %260, %261 : vector<2x128xf32>
    %cst_124 = arith.constant 0.000000e+00 : f32
    %263 = vector.broadcast %cst_124 : f32 to vector<2x128xf32>
    %264 = arith.maximumf %262, %263 : vector<2x128xf32>
    %265 = arith.truncf %264 : vector<2x128xf32> to vector<2x128xbf16>
    %c0_125 = arith.constant 0 : index
    %c2944 = arith.constant 2944 : index
    %266 = vector.load %arg10[%c0_125, %c2944] : memref<2x3200xbf16, #tpu.memory_space<vmem>>, vector<2x128xbf16>
    tpu.vector_store %arg10[%c0_125, %c2944], %265 {strides = array<i32>} : memref<2x3200xbf16, #tpu.memory_space<vmem>>, vector<2x128xbf16>,
    %c24 = arith.constant 24 : index
    %c0_126 = arith.constant 0 : index
    %c0_127 = arith.constant 0 : index
    %267 = vector.load %arg1[%c24, %c0_126, %c0_127] : memref<25x2x8xf32, #tpu.memory_space<vmem>>, vector<1x2x8xf32>
    %268 = vector.shape_cast %267 : vector<1x2x8xf32> to vector<2x8xf32>
    %cst_128 = arith.constant dense<0.000000e+00> : vector<2x128xf32>
    %269 = tpu.matmul %268, %0, %cst_128 {dimension_numbers = #tpu.dot_dimension_numbers<[1], [0], [0], [1], [0, 0, 1, 1], [], []>} : vector<2x8xf32>, vector<8x128xf32>, vector<2x128xf32> -> vector<2x128xf32>
    %270 = vector.broadcast %1 : vector<1x128xf32> to vector<2x128xf32>
    %271 = arith.mulf %269, %270 : vector<2x128xf32>
    %272 = vector.broadcast %2 : vector<1x128xf32> to vector<2x128xf32>
    %273 = arith.addf %271, %272 : vector<2x128xf32>
    %cst_129 = arith.constant 0.000000e+00 : f32
    %274 = vector.broadcast %cst_129 : f32 to vector<2x128xf32>
    %275 = arith.maximumf %273, %274 : vector<2x128xf32>
    %276 = arith.truncf %275 : vector<2x128xf32> to vector<2x128xbf16>
    %c0_130 = arith.constant 0 : index
    %c3072 = arith.constant 3072 : index
    %277 = vector.load %arg10[%c0_130, %c3072] : memref<2x3200xbf16, #tpu.memory_space<vmem>>, vector<2x128xbf16>
    tpu.vector_store %arg10[%c0_130, %c3072], %276 {strides = array<i32>} : memref<2x3200xbf16, #tpu.memory_space<vmem>>, vector<2x128xbf16>,
    %c0_131 = arith.constant 0 : index
    %c0_132 = arith.constant 0 : index
    %278 = vector.load %arg10[%c0_131, %c0_132] : memref<2x3200xbf16, #tpu.memory_space<vmem>>, vector<2x3200xbf16>
    %c0_133 = arith.constant 0 : index
    %c0_134 = arith.constant 0 : index
    %279 = vector.load %arg5[%c0_133, %c0_134] : memref<3200x384xbf16, #tpu.memory_space<vmem>>, vector<3200x384xbf16>
    %cst_135 = arith.constant dense<0.000000e+00> : vector<2x384xf32>
    %280 = tpu.matmul %278, %279, %cst_135 {dimension_numbers = #tpu.dot_dimension_numbers<[1], [0], [0], [1], [0, 0, 1, 1], [], []>} : vector<2x3200xbf16>, vector<3200x384xbf16>, vector<2x384xf32> -> vector<2x384xf32>
    %c0_136 = arith.constant 0 : index
    %c0_137 = arith.constant 0 : index
    %281 = vector.load %arg6[%c0_136, %c0_137] : memref<1x384xf32, #tpu.memory_space<vmem>>, vector<1x384xf32>
    %282 = vector.broadcast %281 : vector<1x384xf32> to vector<2x384xf32>
    %283 = arith.mulf %280, %282 : vector<2x384xf32>
    %c0_138 = arith.constant 0 : index
    %c0_139 = arith.constant 0 : index
    %284 = vector.load %arg7[%c0_138, %c0_139] : memref<1x384xf32, #tpu.memory_space<vmem>>, vector<1x384xf32>
    %285 = vector.broadcast %284 : vector<1x384xf32> to vector<2x384xf32>
    %286 = arith.addf %283, %285 : vector<2x384xf32>
    %cst_140 = arith.constant 0.000000e+00 : f32
    %287 = vector.broadcast %cst_140 : f32 to vector<2x384xf32>
    %288 = arith.maximumf %286, %287 : vector<2x384xf32>
    %c0_141 = arith.constant 0 : index
    %c0_142 = arith.constant 0 : index
    %289 = vector.load %arg8[%c0_141, %c0_142] : memref<384x128xf32, #tpu.memory_space<vmem>>, vector<384x128xf32>
    %cst_143 = arith.constant dense<0.000000e+00> : vector<2x128xf32>
    %290 = tpu.matmul %288, %289, %cst_143 {dimension_numbers = #tpu.dot_dimension_numbers<[1], [0], [0], [1], [0, 0, 1, 1], [], []>} : vector<2x384xf32>, vector<384x128xf32>, vector<2x128xf32> -> vector<2x128xf32>
    %c0_144 = arith.constant 0 : index
    %c0_145 = arith.constant 0 : index
    %c0_146 = arith.constant 0 : index
    %291 = vector.load %arg9[%c0_144, %c0_145, %c0_146] : memref<1x2x128xf32, #tpu.memory_space<vmem>>, vector<1x2x128xf32>
    %292 = vector.shape_cast %291 : vector<1x2x128xf32> to vector<2x128xf32>
    %293 = vector.shape_cast %290 : vector<2x128xf32> to vector<1x2x128xf32>
    tpu.vector_store %arg9[%c0_144, %c0_145, %c0_146], %293 {strides = array<i32>} : memref<1x2x128xf32, #tpu.memory_space<vmem>>, vector<1x2x128xf32>,
    return
  }
  func.func @transform_0(%arg0: i32) -> (i32, i32, i32) {
    %c0_i32 = arith.constant 0 : i32
    %c0_i32_0 = arith.constant 0 : i32
    %c0_i32_1 = arith.constant 0 : i32
    %c0_i32_2 = arith.constant 0 : i32
    return %c0_i32, %c0_i32_0, %c0_i32_1 : i32, i32, i32
  }
  func.func @transform_1(%arg0: i32) -> (i32, i32) {
    %c0_i32 = arith.constant 0 : i32
    %c0_i32_0 = arith.constant 0 : i32
    %c0_i32_1 = arith.constant 0 : i32
    return %c0_i32, %c0_i32_0 : i32, i32
  }
  func.func @transform_2(%arg0: i32) -> (i32, i32) {
    %c0_i32 = arith.constant 0 : i32
    %c0_i32_0 = arith.constant 0 : i32
    %c0_i32_1 = arith.constant 0 : i32
    return %c0_i32, %c0_i32_0 : i32, i32
  }
  func.func @transform_3(%arg0: i32) -> (i32, i32) {
    %c0_i32 = arith.constant 0 : i32
    %c0_i32_0 = arith.constant 0 : i32
    %c0_i32_1 = arith.constant 0 : i32
    return %c0_i32, %c0_i32_0 : i32, i32
  }
  func.func @transform_4(%arg0: i32) -> (i32, i32) {
    %c0_i32 = arith.constant 0 : i32
    %c0_i32_0 = arith.constant 0 : i32
    return %c0_i32, %arg0 : i32, i32
  }
  func.func @transform_5(%arg0: i32) -> (i32, i32) {
    %c0_i32 = arith.constant 0 : i32
    %c0_i32_0 = arith.constant 0 : i32
    return %c0_i32, %arg0 : i32, i32
  }
  func.func @transform_6(%arg0: i32) -> (i32, i32) {
    %c0_i32 = arith.constant 0 : i32
    %c0_i32_0 = arith.constant 0 : i32
    return %c0_i32, %arg0 : i32, i32
  }
  func.func @transform_7(%arg0: i32) -> (i32, i32) {
    %c0_i32 = arith.constant 0 : i32
    %c0_i32_0 = arith.constant 0 : i32
    return %arg0, %c0_i32 : i32, i32
  }
  func.func @transform_8(%arg0: i32) -> (i32, i32, i32) {
    %c0_i32 = arith.constant 0 : i32
    %c0_i32_0 = arith.constant 0 : i32
    %c0_i32_1 = arith.constant 0 : i32
    return %arg0, %c0_i32, %c0_i32_0 : i32, i32, i32
  }
}

</mosaic_0001>

<bundles_post_ra>
// kernel: tpu_custom_call.1
= control target key start
LH: loop header
LB: loop body
LE: loop exit
PB: predicated region body
PF: predicated region fallthrough
CT: control target
= control target key end

     0   :  { %s12223_s0 = inlined_call_operand.vmem [shape: f32[25,2,8], index: 0, kind: input, shape index: {}]   ;;  %s12224_s1 = inlined_call_operand.hbm [shape: f32[8,128], index: 1, kind: input, shape index: {}]   ;;  %s12225_s2 = inlined_call_operand.hbm [shape: f32[1,128], index: 2, kind: input, shape index: {}]   ;;  %s12226_s3 = inlined_call_operand.hbm [shape: f32[1,128], index: 3, kind: input, shape index: {}]   ;;  %s12227_s4 = inlined_call_operand.hbm [shape: bf16[3200,768], index: 4, kind: input, shape index: {}]   ;;  %s12228_s5 = inlined_call_operand.hbm [shape: f32[1,768], index: 5, kind: input, shape index: {}]   ;;  %s12229_s6 = inlined_call_operand.hbm [shape: f32[1,768], index: 6, kind: input, shape index: {}]   ;;  %s12230_s7 = inlined_call_operand.hbm [shape: f32[768,128], index: 7, kind: input, shape index: {}]   ;;  %s12231_s8 = inlined_call_operand.hbm [shape: f32[2,2,128], index: 8, kind: output, shape index: {}]  }
   0x1   :  { %12253 = sst [smem:[#allocation27_spill]] %s12223_s0 }
   0x2   :  { %12254 = sst [smem:[#allocation28_spill]] %s12225_s2 }
   0x3   :  { %12255 = sst [smem:[#allocation29_spill]] %s12227_s4 }
   0x4   :  { %12256 = sst [smem:[#allocation30_spill]] %s12229_s6 }
   0x5   :  { %12257 = sst [smem:[#allocation31_spill]] %s12231_s8 }
   0x6   :  { %13 = vsyncpa [#allocation4], 0 }
   0x7   :  { %14 = vsyncpa [#allocation7], 0 }
   0x8   :  { %15 = vsyncpa [#allocation10], 0 }
   0x9   :  { %17 = vsyncpa [#allocation10 + $0x1], 0 }
   0xa   :  { %18 = vsyncpa [#allocation13], 0 }
   0xb   :  { %20 = vsyncpa [#allocation13 + $0x1], 0 }
   0xc   :  { %21 = vsyncpa [#allocation5], 0 }
   0xd   :  { %23 = vsyncpa [#allocation5 + $0x1], 0  ;;  %s10740_s27 = smov 0   ;;  %s10742_s28 = smov 0  }
   0xe   :  { %s10744_s29 = smov 0   ;;  %s10746_s30 = smov 0  }
   0xf LB: > { %12258 = sst [smem:[#allocation21_spill]] %s10663_s27  ;;  %s10761_s9 = sadd.s32 4294967295, %s10675_s30   ;;  %s10675_s30 = sphi %s10746_s30, %s12298_s30   ;;  %s10671_s29 = sphi %s10744_s29, %s12300_s29   ;;  %s10667_s28 = sphi %s10742_s28, %s12302_s28   ;;  %s10663_s27 = sphi %s10740_s27, %s12301_s27  }
  0x10   : > { %12259 = sst [smem:[#allocation22_spill]] %s10671_s29  ;;  %s8149_s10 = sadd.s32 4294967294, %s10675_s30  }
  0x11   : > { %s10765_s11 = sadd.s32 1, %s10675_s30   ;;  %s120_s12 = sadd.s32 1, %s10671_s29 }
  0x12   : > { %12260 = sst [smem:[#allocation23_spill]] %s10765_s11  ;;  %s117_s13 = ssub.s32 %s10675_s30, %s10765_s11 }
  0x13   : > { %p127_p0 = scmp.ne.s32.totalorder %s10671_s29, %s10667_s28  ;;  %p118_p1 = scmp.eq.s32.totalorder %s117_s13, 0 }
  0x14   : > { %p128_p2 = scmp.eq.s32.totalorder %s10675_s30, 0  ;;  %p133_p3 = scmp.ne.s32.totalorder %s10667_s28, %s10663_s27 }
  0x15   : > { %p12232_p4 = scmp.eq.s32.totalorder %s10761_s9, 0  ;;  %p235_p7 = scmp.eq.s32.totalorder %s10761_s9, 1 }
  0x16   : > { %s10777_s14 = scalar_select %p118_p1, %s10671_s29, %s120_s12  }
  0x17   : > { %p10779_p5 = por %p128_p2, %p127_p0  ;;  %p10785_p6 = por %p12232_p4, %p133_p3 }
  0x18   : > { %12261 = sst [smem:[#allocation24_spill]] %s10777_s14  ;;  %p241_p8 = scmp.eq.s32.totalorder %s8149_s10, 1 }
  0x19   : > { %s12263_s16 = scalar_select %p10785_p6, 1, 0 }
  0x1a   : > { %p8150_p9 = scmp.ge.s32.totalorder %s10675_s30, 1  ;;  %p248_p10 = scmp.lt.s32.totalorder %s10675_s30, 3 }
  0x1b   : > { %p10792_p11 = por %p235_p7, %p127_p0  ;;  %p10796_p12 = por %p241_p8, %p133_p3 }
  0x1c   : > { %p10800_p13 = pnand %p8150_p9, %p248_p10  ;;  %s10677_s20 = smov [#allocation6]  }
  0x1d   : > { %s12264_s17 = scalar_select %p10792_p11, 1, 0 }
  0x1e   : > { %s12266_s18 = scalar_select %p10796_p12, 1, 0 }
  0x1f   : > { %12265 = sst [smem:[#allocation25_spill]] %s12264_s17  ;;  %p9508_p2 = pneg %p10800_p13 }
  0x20   : > { %12267 = sst [smem:[#allocation26_spill]] %s12266_s18  ;;  %s275_s21 = sshll.u32 %s10677_s20, 4  ;;  %s276_s21 = int_to_ptr.vmem [resolvable:$true] %s275_s21 }
  0x21   : > { %s12268_s19 = scalar_select %p10800_p13, 1, 0 }
  0x22   : > { %p9538_p4 = scmp.lt.s32.totalorder %s10675_s30, 2  ;;  %p12269_p0 = scmp.eq.s32.totalorder %s10761_s9, 0 }
  0x23   : > { %s10822_s25 = sand.u32 1, %s10671_s29   ;;  %s12272_s2 = sld [smem:[#allocation28_spill]] }
  0x24   : > { %p10810_p7 = pnand %p9508_p2, %p12269_p0  ;;  %p10817_p3 = pnand %p9538_p4, %p10779_p5 }
  0x26   : > { %s12270_s22 = scalar_select %p10810_p7, 1, 0 }
  0x27   : > { %s12271_s24 = scalar_select %p10817_p3, 1, 0 }
  0x28   : > { %p10832_p9 = pneg %p10810_p7 }
  0x29   : > { %s10393_s12 = scalar_lea.hbm %s12272_s2, 16 }
  0x2a   : > { %p10394_p8 = scmp.ne.s32.totalorder %s12272_s2, %s10393_s12  ;;  %p10400_p10 = scmp.lt.u32.totalorder %s10393_s12, %s12272_s2 }
  0x2b   : > { %s12273_s14 = scalar_select %p10832_p9, 1, 0 }
  0x2c   : > { %p10396_p4 = pnand %p10832_p9, %p10394_p8 }
  0x2e   : > { %p10397_p5 = pneg %p10396_p4 }
  0x30   : > { %p10402_p2 = pnand %p10400_p10, %p10397_p5 }
  0x32   : > { %10405 = shalt.err (!%p10402_p2)
}
  0x33   : > { %s10406_s26 = scalar_lea.vmem %s276_s21, 16  ;;  %s10413_s10 = scalar_lea.vmem %s276_s21, 32 }
  0x34   : > { %p10407_p0 = scmp.ne.s32.totalorder %s276_s21, %s10406_s26  ;;  %p10414_p11 = scmp.lt.s32.totalorder %s276_s21, %s276_s21 }
  0x35   : > { %p10415_p6 = scmp.lt.s32.totalorder %s10413_s10, %s10406_s26 }
  0x36   : > { %p10409_p1 = pnand %p10407_p0, %p10832_p9 }
  0x37   : > { %p10416_p13 = por %p10415_p6, %p10414_p11 }
  0x38   : > { %p10410_p12 = pneg %p10409_p1 }
  0x3a   : > { %p10417_p3 = pnand %p10416_p13, %p10410_p12 }
  0x3c   : > { %10420 = shalt.err (!%p10417_p3)
}
  0x3d   : > { %9514 = dma.hbm_to_vmem [thread:$0]  (!%p10810_p7), %s12272_s2, 16, %s276_s21, [#allocation7]  }
  0x3e   : > { %s9479_s23 = smul.u32 4800, %s10822_s25  ;;  %s12274_s4 = sld [smem:[#allocation29_spill]] }
  0x3f   : > { %s8820_s12 = smul.u32 192, %s10675_s30  ;;  %s12275_s13 = sand.u32 1, %s10675_s30  }
  0x40   : > { %s301_s26 = scalar_lea.vmem [#allocation9], %s9479_s23  ;;  %s10859_s20 = scalar_lea.sflag [#allocation10], %s12275_s13 }
  0x41   : > { %s308_s10 = sshll.u32 %s301_s26, 4  ;;  %p12276_p11 = scmp.ne.s32.totalorder %s12271_s24, 0  ;;  %s10855_s10 = int_to_ptr.vmem [resolvable:$true] %s308_s10 }
  0x43   : > { %p10865_p12 = pneg %p12276_p11 }
  0x44   : > { %s10853_s11 = scalar_lea.hbm %s12274_s4, %s8820_s12  ;;  %s10426_s23 = scalar_lea.hbm %s12274_s4, 153600 }
  0x45   : > { %s10421_s18 = scalar_lea.hbm %s10853_s11, 76800  ;;  %p10427_p3 = scmp.lt.u32.totalorder %s10853_s11, %s12274_s4 }
  0x46   : > { %p10422_p6 = scmp.ne.s32.totalorder %s10853_s11, %s10421_s18  ;;  %p10428_p8 = scmp.lt.u32.totalorder %s10426_s23, %s10421_s18 }
  0x47   : > { %s12277_s21 = scalar_select %p10865_p12, 1, 0 }
  0x48   : > { %p10424_p13 = pnand %p10865_p12, %p10422_p6  ;;  %p10429_p4 = por %p10428_p8, %p10427_p3 }
  0x49   : > { %p10430_p5 = scmp.lt.u32.totalorder %s10421_s18, %s10853_s11 }
  0x4a   : > { %p10425_p1 = pneg %p10424_p13 }
  0x4b   : > { %p10431_p10 = por %p10430_p5, %p10429_p4 }
  0x4d   : > { %p10432_p2 = pnand %p10431_p10, %p10425_p1 }
  0x4f   : > { %10435 = shalt.err (!%p10432_p2)
}
  0x50   : > { %s10436_s13 = scalar_lea.vmem %s10855_s10, 76800  ;;  %s10678_s29 = smov [#allocation9]  }
  0x51   : > { %p10437_p0 = scmp.ne.s32.totalorder %s10855_s10, %s10436_s13  ;;  %s10441_s12 = sshll.u32 %s10678_s29, 4  ;;  %s10442_s12 = int_to_ptr.vmem [resolvable:$false] %s10441_s12 }
  0x52   : > { %s10443_s15 = scalar_lea.vmem %s10442_s12, 153600  ;;  %p10444_p7 = scmp.lt.s32.totalorder %s10855_s10, %s10442_s12 }
  0x53   : > { %p10439_p6 = pnand %p10437_p0, %p10865_p12  ;;  %p10445_p9 = scmp.lt.s32.totalorder %s10443_s15, %s10436_s13 }
  0x55   : > { %p10440_p13 = pneg %p10439_p6  ;;  %p10446_p3 = por %p10445_p9, %p10444_p7 }
  0x57   : > { %p10447_p8 = pnand %p10446_p3, %p10440_p13 }
  0x59   : > { %10450 = shalt.err (!%p10447_p8)
}
  0x5a   : > { %s10679_s18 = smov 384   ;;  %s10680_s23 = smov 192  }
  0x5b   : > { %s10681_s26 = smov 12   ;;  %s9480_s29 = smul.u32 3, %s10822_s25 }
  0x5c   : > { %9521 = dma.hbm_to_vmem [thread:$0]  (!%p12276_p11), %s10853_s11, 76800, %s10855_s10, %s10859_s20, %s10679_s18, %s10680_s23, %s10681_s26  }
  0x5d   : > { %s8821_s13 = smul.u32 48, %s10675_s30  ;;  %s10682_s12 = smov [#allocation3]  }
  0x5e   : > { %s264_s15 = sshll.u32 %s10682_s12, 4  ;;  %s12278_s6 = sld [smem:[#allocation30_spill]]  ;;  %s10902_s15 = int_to_ptr.vmem [resolvable:$true] %s264_s15 }
  0x5f   : > { %s341_s8 = scalar_lea.vmem [#allocation12], %s9480_s29  ;;  %s12279_s11 = sand.u32 1, %s10675_s30  }
  0x60   : > { %s349_s17 = sshll.u32 %s341_s8, 4  ;;  %s10906_s10 = scalar_lea.sflag [#allocation13], %s12279_s11  ;;  %s10900_s17 = int_to_ptr.vmem [resolvable:$true] %s349_s17 }
  0x64   : > { %s10896_s27 = scalar_lea.hbm %s12278_s6, %s8821_s13  ;;  %s10456_s23 = scalar_lea.hbm %s12278_s6, 96 }
  0x65   : > { %s10451_s18 = scalar_lea.hbm %s10896_s27, 48  ;;  %p10457_p4 = scmp.lt.u32.totalorder %s10896_s27, %s12278_s6 }
  0x66   : > { %p10452_p7 = scmp.ne.s32.totalorder %s10896_s27, %s10451_s18  ;;  %p10458_p5 = scmp.lt.u32.totalorder %s10456_s23, %s10451_s18 }
  0x67   : > { %p10460_p2 = scmp.lt.u32.totalorder %s10451_s18, %s10896_s27 }
  0x68   : > { %p10454_p9 = pnand %p10452_p7, %p10865_p12  ;;  %p10459_p10 = por %p10458_p5, %p10457_p4 }
  0x6a   : > { %p10455_p1 = pneg %p10454_p9  ;;  %p10461_p0 = por %p10460_p2, %p10459_p10 }
  0x6c   : > { %p10462_p6 = pnand %p10461_p0, %p10455_p1 }
  0x6e   : > { %10465 = shalt.err (!%p10462_p6)
}
  0x6f   : > { %s10466_s8 = scalar_lea.vmem %s10900_s17, 48  ;;  %s10683_s11 = smov [#allocation12]  }
  0x70   : > { %p10467_p13 = scmp.ne.s32.totalorder %s10900_s17, %s10466_s8  ;;  %s10471_s2 = sshll.u32 %s10683_s11, 4  ;;  %s10472_s2 = int_to_ptr.vmem [resolvable:$false] %s10471_s2 }
  0x71   : > { %s10473_s4 = scalar_lea.vmem %s10472_s2, 96  ;;  %p10474_p7 = scmp.lt.s32.totalorder %s10900_s17, %s10472_s2 }
  0x72   : > { %p10469_p3 = pnand %p10467_p13, %p10865_p12  ;;  %p10475_p9 = scmp.lt.s32.totalorder %s10473_s4, %s10466_s8 }
  0x74   : > { %p10470_p8 = pneg %p10469_p3  ;;  %p10476_p4 = por %p10475_p9, %p10474_p7 }
  0x76   : > { %p10477_p5 = pnand %p10476_p4, %p10470_p8 }
  0x78   : > { %10480 = shalt.err (!%p10477_p5)
}
  0x79   : > { %9527 = dma.hbm_to_vmem [thread:$0]  (!%p12276_p11), %s10896_s27, 48, %s10900_s17, %s10906_s10  }
  0x7a   : > { %s10481_s26 = scalar_lea.hbm %s12224_s1, 128  ;;  %p12280_p10 = scmp.ne.s32.totalorder %s12273_s14, 0 }
  0x7b   : > { %p10482_p1 = scmp.ne.s32.totalorder %s12224_s1, %s10481_s26  ;;  %p10488_p6 = scmp.lt.u32.totalorder %s10481_s26, %s12224_s1 }
  0x7d   : > { %p10484_p2 = pnand %p10482_p1, %p12280_p10 }
  0x7f   : > { %p10485_p0 = pneg %p10484_p2 }
  0x81   : > { %p10490_p13 = pnand %p10488_p6, %p10485_p0 }
  0x83   : > { %10493 = shalt.err (!%p10490_p13)
}
  0x84   : > { %s10494_s27 = scalar_lea.vmem %s10902_s15, 128  ;;  %p10502_p9 = scmp.lt.s32.totalorder %s10902_s15, %s10902_s15 }
  0x85   : > { %p10495_p3 = scmp.ne.s32.totalorder %s10902_s15, %s10494_s27  ;;  %p10503_p4 = scmp.lt.s32.totalorder %s10494_s27, %s10494_s27 }
  0x87   : > { %p10497_p8 = pnand %p10495_p3, %p12280_p10  ;;  %p10504_p5 = por %p10503_p4, %p10502_p9 }
  0x89   : > { %p10498_p7 = pneg %p10497_p8 }
  0x8b   : > { %p10505_p1 = pnand %p10504_p5, %p10498_p7 }
  0x8d   : > { %10508 = shalt.err (!%p10505_p1)
}
  0x8e   : > { %p12281_p2 = scmp.ne.s32.totalorder %s12270_s22, 0  ;;  %s10684_s18 = smov [#allocation8]  }
  0x8f   : > { %s286_s23 = sshll.u32 %s10684_s18, 4  ;;  %s10958_s11 = scalar_lea.hbm %s12228_s5, %s8821_s13  ;;  %s287_s23 = int_to_ptr.vmem [resolvable:$true] %s286_s23 }
  0x90   : > { %9511 = dma.hbm_to_vmem [thread:$0]  (!%p12281_p2), %s12224_s1, 128, %s10902_s15, [#allocation4]  }
  0x91   : > { %s322_s8 = scalar_lea.vmem [#allocation11], %s9480_s29  ;;  %s10509_s17 = scalar_lea.hbm %s12226_s3, 16 }
  0x92   : > { %s330_s2 = sshll.u32 %s322_s8, 4  ;;  %p10510_p0 = scmp.ne.s32.totalorder %s12226_s3, %s10509_s17  ;;  %s331_s2 = int_to_ptr.vmem [resolvable:$true] %s330_s2 }
  0x93   : > { %p10516_p3 = scmp.lt.u32.totalorder %s10509_s17, %s12226_s3 }
  0x94   : > { %p10512_p6 = pnand %p10510_p0, %p12280_p10 }
  0x96   : > { %p10513_p13 = pneg %p10512_p6 }
  0x98   : > { %p10518_p8 = pnand %p10516_p3, %p10513_p13 }
  0x9a   : > { %10521 = shalt.err (!%p10518_p8)
}
  0x9b   : > { %s10522_s13 = scalar_lea.vmem %s287_s23, 16  ;;  %s10529_s6 = scalar_lea.vmem %s287_s23, 32 }
  0x9c   : > { %p10523_p7 = scmp.ne.s32.totalorder %s287_s23, %s10522_s13  ;;  %p10530_p5 = scmp.lt.s32.totalorder %s287_s23, %s287_s23 }
  0x9d   : > { %p10531_p1 = scmp.lt.s32.totalorder %s10529_s6, %s10522_s13 }
  0x9e   : > { %p10525_p9 = pnand %p10523_p7, %p12280_p10 }
  0x9f   : > { %p10532_p11 = por %p10531_p1, %p10530_p5 }
  0xa0   : > { %p10526_p4 = pneg %p10525_p9 }
  0xa2   : > { %p10533_p12 = pnand %p10532_p11, %p10526_p4 }
  0xa4   : > { %10536 = shalt.err (!%p10533_p12)
}
  0xa5   : > { %9517 = dma.hbm_to_vmem [thread:$0]  (!%p12281_p2), %s12226_s3, 16, %s287_s23, [#allocation7]  }
  0xa6   : > { %s9482_s14 = smul.u32 384, %s10822_s25  ;;  %s10537_s26 = scalar_lea.hbm %s10958_s11, 48 }
  0xa7   : > { %p10538_p10 = scmp.ne.s32.totalorder %s10958_s11, %s10537_s26  ;;  %p12282_p0 = scmp.ne.s32.totalorder %s12277_s21, 0 }
  0xa8   : > { %s10542_s22 = scalar_lea.hbm %s12228_s5, 96  ;;  %p10543_p12 = scmp.lt.u32.totalorder %s10958_s11, %s12228_s5 }
  0xa9   : > { %p10540_p6 = pnand %p10538_p10, %p12282_p0  ;;  %p10544_p13 = scmp.lt.u32.totalorder %s10542_s22, %s10537_s26 }
  0xaa   : > { %p10546_p8 = scmp.lt.u32.totalorder %s10537_s26, %s10958_s11 }
  0xab   : > { %p10541_p11 = pneg %p10540_p6  ;;  %p10545_p3 = por %p10544_p13, %p10543_p12 }
  0xad   : > { %p10547_p7 = por %p10546_p8, %p10545_p3 }
  0xaf   : > { %p10548_p2 = pnand %p10547_p7, %p10541_p11 }
  0xb1   : > { %10551 = shalt.err (!%p10548_p2)
}
  0xb2   : > { %s10552_s25 = scalar_lea.vmem %s331_s2, 48  ;;  %s10685_s23 = smov [#allocation11]  }
  0xb3   : > { %p10553_p9 = scmp.ne.s32.totalorder %s331_s2, %s10552_s25  ;;  %s10557_s4 = sshll.u32 %s10685_s23, 4  ;;  %s10558_s4 = int_to_ptr.vmem [resolvable:$false] %s10557_s4 }
  0xb4   : > { %s10559_s15 = scalar_lea.vmem %s10558_s4, 96  ;;  %p10560_p1 = scmp.lt.s32.totalorder %s331_s2, %s10558_s4 }
  0xb5   : > { %p10555_p4 = pnand %p10553_p9, %p12282_p0  ;;  %p10561_p10 = scmp.lt.s32.totalorder %s10559_s15, %s10552_s25 }
  0xb7   : > { %p10556_p5 = pneg %p10555_p4  ;;  %p10562_p6 = por %p10561_p10, %p10560_p1 }
  0xb9   : > { %p10563_p12 = pnand %p10562_p6, %p10556_p5 }
  0xbb   : > { %10566 = shalt.err (!%p10563_p12)
}
  0xbc   : > { %p12283_p13 = scmp.ne.s32.totalorder %s12271_s24, 0  ;;  %s8823_s18 = smul.u32 6144, %s10675_s30 }
  0xbd   : > { %s360_s13 = scalar_lea.vmem [#allocation14], %s9482_s14 }
  0xbe   : > { %9524 = dma.hbm_to_vmem [thread:$0]  (!%p12283_p13), %s10958_s11, 48, %s331_s2, %s10859_s20  }
  0xbf   : > { %s367_s6 = sshll.u32 %s360_s13, 4  ;;  %s11003_s26 = scalar_lea.hbm %s12230_s7, %s8823_s18  ;;  %s11005_s6 = int_to_ptr.vmem [resolvable:$true] %s367_s6 }
  0xc0   : > { %s10567_s12 = scalar_lea.hbm %s11003_s26, 6144  ;;  %s10572_s2 = scalar_lea.hbm %s12230_s7, 12288 }
  0xc1   : > { %p10568_p11 = scmp.ne.s32.totalorder %s11003_s26, %s10567_s12  ;;  %p10573_p7 = scmp.lt.u32.totalorder %s11003_s26, %s12230_s7 }
  0xc2   : > { %p10574_p2 = scmp.lt.u32.totalorder %s10572_s2, %s10567_s12  ;;  %p10576_p4 = scmp.lt.u32.totalorder %s10567_s12, %s11003_s26 }
  0xc3   : > { %p10570_p3 = pnand %p10568_p11, %p12282_p0 }
  0xc4   : > { %p10575_p9 = por %p10574_p2, %p10573_p7 }
  0xc5   : > { %p10571_p8 = pneg %p10570_p3 }
  0xc6   : > { %p10577_p5 = por %p10576_p4, %p10575_p9 }
  0xc8   : > { %p10578_p1 = pnand %p10577_p5, %p10571_p8 }
  0xca   : > { %10581 = shalt.err (!%p10578_p1)
}
  0xcb   : > { %s10582_s22 = scalar_lea.vmem %s11005_s6, 6144  ;;  %s10686_s27 = smov [#allocation14]  }
  0xcc   : > { %p10583_p10 = scmp.ne.s32.totalorder %s11005_s6, %s10582_s22  ;;  %s10587_s17 = sshll.u32 %s10686_s27, 4  ;;  %s10588_s17 = int_to_ptr.vmem [resolvable:$false] %s10587_s17 }
  0xcd   : > { %s10589_s25 = scalar_lea.vmem %s10588_s17, 12288  ;;  %p10590_p11 = scmp.lt.s32.totalorder %s11005_s6, %s10588_s17 }
  0xce   : > { %p10585_p6 = pnand %p10583_p10, %p12282_p0  ;;  %p10591_p3 = scmp.lt.s32.totalorder %s10589_s25, %s10582_s22 }
  0xd0   : > { %p10586_p12 = pneg %p10585_p6  ;;  %p10592_p7 = por %p10591_p3, %p10590_p11 }
  0xd2   : > { %p10593_p2 = pnand %p10592_p7, %p10586_p12 }
  0xd4   : > { %10596 = shalt.err (!%p10593_p2)
}
  0xd5   : > { %s10687_s23 = smov 128   ;;  %s10688_s4 = smov 8  }
  0xd6   : > { %9530 = dma.hbm_to_vmem [thread:$0]  (!%p12283_p13), %s11003_s26, 6144, %s11005_s6, %s10906_s10, %s10687_s23, %s10687_s23, %s10688_s4  }
  0xd7   : > { %p12284_p0 = scmp.ne.s32.totalorder %s12268_s19, 0 }
  0xd8   : > { %p12285_p8 = scmp.eq.s32.totalorder (!%p12284_p0), %s10761_s9, 0 }
  0xd9   : > { %379 = sbr.rel (%p12284_p0) target bundleno = 1554 (0x612), region = 52 }
  0xe0   : > { %10642 = dma.done.wait (%p12285_p8), [#allocation4], 128   ;;  %p12286_p9 = pmov %p12285_p8 }
  0xe1   : > { %p12287_p4 = pmov %p12285_p8 }
  0xe2   : > { %10644 = vsyncadd (%p12286_p9), [#allocation4], 4294967168 }
  0xe3   : > { %10646 = dma.done.wait (%p12287_p4), [#allocation7], 32   ;;  %p12288_p5 = pmov %p12287_p4 }
  0xe4   : > { %s393_s24 = sand.u32 1, %s10761_s9   ;;  %s11041_s21 = sand.u32 1, %s10667_s28  }
  0xe5   : > { %10648 = vsyncadd (%p12288_p5), [#allocation7], 4294967264  ;;  %s9483_s19 = smul.u32 4800, %s11041_s21  ;;  %s394_s10 = scalar_lea.sflag [#allocation10], %s393_s24 }
  0xe6   : > { %p12289_p13 = scmp.ne.s32.totalorder %s12263_s16, 0 }
  0xe7   : > { %s11044_s15 = scalar_lea.vmem [#allocation9], %s9483_s19 }
  0xe8   : > { %10650 = dma.done.wait (%p12289_p13), %s394_s10, 76848  }
  0xe9   : > { %10652 = vsyncadd (%p12289_p13), %s394_s10, 4294890448  ;;  %s9484_s18 = smul.u32 3, %s11041_s21  ;;  %s412_s6 = scalar_lea.sflag [#allocation13], %s393_s24 }
  0xeb   : > { %s11051_s13 = scalar_lea.vmem [#allocation11], %s9484_s18  ;;  %s11053_s0 = scalar_lea.vmem [#allocation12], %s9484_s18 }
  0xec   : > { %10654 = dma.done.wait (%p12289_p13), %s412_s6, 6192  }
  0xed   : > { %10656 = vsyncadd (%p12289_p13), %s412_s6, 4294961104  ;;  %v10689_v0 = vmov 0.0   ;;  %vm10690_vm0 = vmmov 0   ;;  %vm481_vm1 = vcmask 64512   ;;  %v11065_v1 = vld [vmem:[#allocation3] sm:$0xff]  ;;  %s12290_s12 = sld [smem:[#allocation27_spill]] }
  0xee   : > { %9199 = vmatprep.subr.mxu0 %v10689_v0  ;;  %9204 = vmatprep.subr.mxu1 %v10689_v0  ;;  %v9590_v25 = vld [vmem:[%s11044_s15 + $0x4] ss:$12 sps:$4 sm:$0xff]   ;;  %v9591_v28 = vld [vmem:[%s11044_s15 + $0x300] ss:$12 sps:$4 sm:$0xff]   ;;  %v9599_v31 = vld [vmem:[%s11044_s15 + $0x31c] ss:$12 sps:$4 sm:$0xff]  }
  0xef   : > { %9201 = vmatprep.mubr.msk.f32.mxu0 %vm10690_vm0, %v10689_v0  ;;  %9206 = vmatprep.mubr.msk.f32.mxu1 %vm10690_vm0, %v10689_v0  ;;  %v9593_v27 = vld [vmem:[%s11044_s15 + $0x304] ss:$12 sps:$4 sm:$0xff]   ;;  %v9588_v30 = vld [vmem:[%s11044_s15] ss:$12 sps:$4 sm:$0xff]   ;;  %v9596_v32 = vld [vmem:[%s11044_s15 + $0x1c] ss:$12 sps:$4 sm:$0xff]  }
  0xf0   : > { %9200 = vmatpush3.msra.mxu0 %v11065_v1  ;;  %9205 = vmatpush3.msra.mxu1 %v11065_v1  ;;  %v9597_v33 = vld [vmem:[%s11044_s15 + $0x318] ss:$12 sps:$4 sm:$0xff]   ;;  %v9605_v35 = vld [vmem:[%s11044_s15 + $0x334] ss:$12 sps:$4 sm:$0xff]   ;;  %v9603_v37 = vld [vmem:[%s11044_s15 + $0x330] ss:$12 sps:$4 sm:$0xff]  }
  0xf1   : > { %9209 = vmatprep.subr.mxu0 %v10689_v0  ;;  %9214 = vmatprep.subr.mxu1 %v10689_v0  ;;  %v9594_v34 = vld [vmem:[%s11044_s15 + $0x18] ss:$12 sps:$4 sm:$0xff]   ;;  %v9602_v36 = vld [vmem:[%s11044_s15 + $0x34] ss:$12 sps:$4 sm:$0xff]   ;;  %v9600_v38 = vld [vmem:[%s11044_s15 + $0x30] ss:$12 sps:$4 sm:$0xff]  }
  0xf2   : > { %v9611_v39 = vld [vmem:[%s11044_s15 + $0x34c] ss:$12 sps:$4 sm:$0xff]   ;;  %v9609_v41 = vld [vmem:[%s11044_s15 + $0x348] ss:$12 sps:$4 sm:$0xff]   ;;  %v9617_v43 = vld [vmem:[%s11044_s15 + $0x364] ss:$12 sps:$4 sm:$0xff]  }
  0xf3   : > { %v480_v2 = vld [vmem:[%s12290_s12] sm:$0x3]  ;;  %v8167_v3 = vld [vmem:[%s12290_s12 + $0x2] sm:$0x3]  ;;  %v8169_v4 = vld [vmem:[%s12290_s12 + $0x4] sm:$0x3] }
  0xf4   : > { %9202 = vmatmul.mubr.msk.f32.vlgmr.msra.gmra.mrb[0].mxu0 %vm481_vm1, %v480_v2  ;;  %9207 = vmatmul.mubr.msk.f32.vlgmr.msra.gmra.mrb[0].mxu1 %vm481_vm1, %v8167_v3  ;;  %v8171_v5 = vld [vmem:[%s12290_s12 + $0x6] sm:$0x3]  ;;  %v8173_v6 = vld [vmem:[%s12290_s12 + $0x8] sm:$0x3]  ;;  %v8175_v7 = vld [vmem:[%s12290_s12 + $0xa] sm:$0x3] }
  0xf5   : > { %9210 = vmatpush3.msra.mxu0 %v11065_v1  ;;  %9215 = vmatpush3.msra.mxu1 %v11065_v1  ;;  %v8177_v8 = vld [vmem:[%s12290_s12 + $0xc] sm:$0x3]  ;;  %v8179_v9 = vld [vmem:[%s12290_s12 + $0xe] sm:$0x3]  ;;  %v8181_v10 = vld [vmem:[%s12290_s12 + $0x10] sm:$0x3] }
  0xf6   : > { %9211 = vmatprep.mubr.msk.f32.mxu0 %vm10690_vm0, %v10689_v0  ;;  %9216 = vmatprep.mubr.msk.f32.mxu1 %vm10690_vm0, %v10689_v0  ;;  %v8183_v11 = vld [vmem:[%s12290_s12 + $0x12] sm:$0x3]  ;;  %v8185_v12 = vld [vmem:[%s12290_s12 + $0x14] sm:$0x3]  ;;  %v8187_v13 = vld [vmem:[%s12290_s12 + $0x16] sm:$0x3] }
  0xf7   : > { %9219 = vmatprep.subr.mxu0 %v10689_v0  ;;  %9224 = vmatprep.subr.mxu1 %v10689_v0  ;;  %v8189_v14 = vld [vmem:[%s12290_s12 + $0x18] sm:$0x3]  ;;  %v8191_v15 = vld [vmem:[%s12290_s12 + $0x1a] sm:$0x3]  ;;  %v8193_v16 = vld [vmem:[%s12290_s12 + $0x1c] sm:$0x3] }
  0xf8   : > { %9212 = vmatmul.mubr.msk.f32.vlgmr.msra.gmra.mrb[2].mxu0 %vm481_vm1, %v8169_v4  ;;  %9217 = vmatmul.mubr.msk.f32.vlgmr.msra.gmra.mrb[2].mxu1 %vm481_vm1, %v8171_v5  ;;  %v8197_v17 = vld [vmem:[%s12290_s12 + $0x20] sm:$0x3]  ;;  %v8195_v18 = vld [vmem:[%s12290_s12 + $0x1e] sm:$0x3]  ;;  %v8199_v19 = vld [vmem:[%s12290_s12 + $0x22] sm:$0x3] }
  0xf9   : > { %9220 = vmatpush3.msra.mxu0 %v11065_v1  ;;  %9225 = vmatpush3.msra.mxu1 %v11065_v1  ;;  %v8201_v20 = vld [vmem:[%s12290_s12 + $0x24] sm:$0x3]  ;;  %v8203_v21 = vld [vmem:[%s12290_s12 + $0x26] sm:$0x3]  ;;  %v8205_v22 = vld [vmem:[%s12290_s12 + $0x28] sm:$0x3] }
  0xfa   : > { %9221 = vmatprep.mubr.msk.f32.mxu0 %vm10690_vm0, %v10689_v0  ;;  %9226 = vmatprep.mubr.msk.f32.mxu1 %vm10690_vm0, %v10689_v0  ;;  %v8207_v23 = vld [vmem:[%s12290_s12 + $0x2a] sm:$0x3]  ;;  %v8209_v24 = vld [vmem:[%s12290_s12 + $0x2c] sm:$0x3]  ;;  %v8211_v26 = vld [vmem:[%s12290_s12 + $0x2e] sm:$0x3] }
  0xfb   : > { %9229 = vmatprep.subr.mxu0 %v10689_v0  ;;  %9234 = vmatprep.subr.mxu1 %v10689_v0  ;;  %v8213_v29 = vld [vmem:[%s12290_s12 + $0x30] sm:$0x3]  ;;  %v9614_v44 = vld [vmem:[%s11044_s15 + $0x64] ss:$12 sps:$4 sm:$0xff]   ;;  %v9629_v51 = vld [vmem:[%s11044_s15 + $0x394] ss:$12 sps:$4 sm:$0xff]  }
  0xfc   : > { %9222 = vmatmul.mubr.msk.f32.vlgmr.msra.gmra.mrb[4].mxu0 %vm481_vm1, %v8173_v6  ;;  %9227 = vmatmul.mubr.msk.f32.vlgmr.msra.gmra.mrb[4].mxu1 %vm481_vm1, %v8175_v7  ;;  %v9608_v40 = vld [vmem:[%s11044_s15 + $0x4c] ss:$12 sps:$4 sm:$0xff]   ;;  %v9606_v42 = vld [vmem:[%s11044_s15 + $0x48] ss:$12 sps:$4 sm:$0xff]   ;;  %v9627_v53 = vld [vmem:[%s11044_s15 + $0x390] ss:$12 sps:$4 sm:$0xff]  }
  0xfd   : > { %9230 = vmatpush3.msra.mxu0 %v11065_v1  ;;  %9235 = vmatpush3.msra.mxu1 %v11065_v1  ;;  %v9615_v45 = vld [vmem:[%s11044_s15 + $0x360] ss:$12 sps:$4 sm:$0xff]   ;;  %v9623_v47 = vld [vmem:[%s11044_s15 + $0x37c] ss:$12 sps:$4 sm:$0xff]   ;;  %v9621_v49 = vld [vmem:[%s11044_s15 + $0x378] ss:$12 sps:$4 sm:$0xff]  }
  0xfe   : > { %9231 = vmatprep.mubr.msk.f32.mxu0 %vm10690_vm0, %v10689_v0  ;;  %9236 = vmatprep.mubr.msk.f32.mxu1 %vm10690_vm0, %v10689_v0  ;;  %v9612_v46 = vld [vmem:[%s11044_s15 + $0x60] ss:$12 sps:$4 sm:$0xff]   ;;  %v9620_v48 = vld [vmem:[%s11044_s15 + $0x7c] ss:$12 sps:$4 sm:$0xff]   ;;  %v9618_v50 = vld [vmem:[%s11044_s15 + $0x78] ss:$12 sps:$4 sm:$0xff]  }
  0xff   : > { %9239 = vmatprep.subr.mxu0 %v10689_v0  ;;  %9244 = vmatprep.subr.mxu1 %v10689_v0  ;;  %v9626_v52 = vld [vmem:[%s11044_s15 + $0x94] ss:$12 sps:$4 sm:$0xff]   ;;  %v9624_v54 = vld [vmem:[%s11044_s15 + $0x90] ss:$12 sps:$4 sm:$0xff]   ;;  %v9632_v55 = vld [vmem:[%s11044_s15 + $0xac] ss:$12 sps:$4 sm:$0xff]  }
 0x100   : > { %9232 = vmatmul.mubr.msk.f32.vlgmr.msra.gmra.mrb[6].mxu0 %vm481_vm1, %v8177_v8  ;;  %9237 = vmatmul.mubr.msk.f32.vlgmr.msra.gmra.mrb[6].mxu1 %vm481_vm1, %v8179_v9  ;;  %v9630_v56 = vld [vmem:[%s11044_s15 + $0xa8] ss:$12 sps:$4 sm:$0xff]   ;;  %v9635_v57 = vld [vmem:[%s11044_s15 + $0x3ac] ss:$12 sps:$4 sm:$0xff]   ;;  %v9638_v59 = vld [vmem:[%s11044_s15 + $0xc4] ss:$12 sps:$4 sm:$0xff]  }
 0x101   : > { %9241 = vmatprep.mubr.msk.f32.mxu0 %vm10690_vm0, %v10689_v0  ;;  %9240 = vmatpush3.msra.mxu0 %v11065_v1  ;;  %v9633_v58 = vld [vmem:[%s11044_s15 + $0x3a8] ss:$12 sps:$4 sm:$0xff]   ;;  %v9636_v60 = vld [vmem:[%s11044_s15 + $0xc0] ss:$12 sps:$4 sm:$0xff]   ;;  %v9641_v61 = vld [vmem:[%s11044_s15 + $0x3c4] ss:$12 sps:$4 sm:$0xff]  }
 0x102   : > { %9249 = vmatprep.subr.mxu0 %v10689_v0  ;;  %9245 = vmatpush3.msra.mxu1 %v11065_v1  ;;  %v9639_v62 = vld [vmem:[%s11044_s15 + $0x3c0] ss:$12 sps:$4 sm:$0xff]   ;;  %v9644_v63 = vld [vmem:[%s11044_s15 + $0xdc] ss:$12 sps:$4 sm:$0xff]   ;;  %v9645_v3 = vld [vmem:[%s11044_s15 + $0x3d8] ss:$12 sps:$4 sm:$0xff]  }
 0x103   : > { %9246 = vmatprep.mubr.msk.f32.mxu1 %vm10690_vm0, %v10689_v0  ;;  %9254 = vmatprep.subr.mxu1 %v10689_v0  ;;  %v9647_v2 = vld [vmem:[%s11044_s15 + $0x3dc] ss:$12 sps:$4 sm:$0xff]   ;;  %v9650_v4 = vld [vmem:[%s11044_s15 + $0xf4] ss:$12 sps:$4 sm:$0xff]   ;;  %v9656_v8 = vld [vmem:[%s11044_s15 + $0x10c] ss:$12 sps:$4 sm:$0xff]  }
 0x104   : > { %9242 = vmatmul.mubr.msk.f32.vlgmr.msra.gmra.mrb[8].mxu0 %vm481_vm1, %v8181_v10  ;;  %9247 = vmatmul.mubr.msk.f32.vlgmr.msra.gmra.mrb[8].mxu1 %vm481_vm1, %v8183_v11  ;;  %v9648_v5 = vld [vmem:[%s11044_s15 + $0xf0] ss:$12 sps:$4 sm:$0xff]   ;;  %v9653_v6 = vld [vmem:[%s11044_s15 + $0x3f4] ss:$12 sps:$4 sm:$0xff]   ;;  %v9659_v10 = vld [vmem:[%s11044_s15 + $0x40c] ss:$12 sps:$4 sm:$0xff]  }
 0x105   : > { %9250 = vmatpush3.msra.mxu0 %v11065_v1  ;;  %9251 = vmatprep.mubr.msk.f32.mxu0 %vm10690_vm0, %v10689_v0  ;;  %v9651_v7 = vld [vmem:[%s11044_s15 + $0x3f0] ss:$12 sps:$4 sm:$0xff]   ;;  %v9654_v9 = vld [vmem:[%s11044_s15 + $0x108] ss:$12 sps:$4 sm:$0xff]   ;;  %s9485_s23 = smul.u32 384, %s11041_s21  ;;  %s12292_s6 = sld [smem:[#allocation31_spill]] }
 0x106   : > { %9259 = vmatprep.subr.mxu0 %v10689_v0  ;;  %9256 = vmatprep.mubr.msk.f32.mxu1 %vm10690_vm0, %v10689_v0  ;;  %v9657_v11 = vld [vmem:[%s11044_s15 + $0x408] ss:$12 sps:$4 sm:$0xff]   ;;  %s7972_s26 = scalar_lea.sflag [#allocation5], %s11041_s21 }
 0x107   : > { %9255 = vmatpush3.msra.mxu1 %v11065_v1  ;;  %s12102_s4 = scalar_lea.vmem [#allocation14], %s9485_s23 }
 0x108   : > { %9252 = vmatmul.mubr.msk.f32.vlgmr.msra.gmra.mrb[10].mxu0 %vm481_vm1, %v8185_v12  ;;  %9257 = vmatmul.mubr.msk.f32.vlgmr.msra.gmra.mrb[10].mxu1 %vm481_vm1, %v8187_v13  ;;  %v9662_v12 = vld [vmem:[%s11044_s15 + $0x124] ss:$12 sps:$4 sm:$0xff]   ;;  %v9660_v13 = vld [vmem:[%s11044_s15 + $0x120] ss:$12 sps:$4 sm:$0xff]  }
 0x109   : > { %9260 = vmatpush3.msra.mxu0 %v11065_v1  ;;  %9261 = vmatprep.mubr.msk.f32.mxu0 %vm10690_vm0, %v10689_v0 }
 0x10a   : > { %9269 = vmatprep.subr.mxu0 %v10689_v0  ;;  %9264 = vmatprep.subr.mxu1 %v10689_v0 }
 0x10b   : > { %9266 = vmatprep.mubr.msk.f32.mxu1 %vm10690_vm0, %v10689_v0  ;;  %9265 = vmatpush3.msra.mxu1 %v11065_v1 }
 0x10c   : > { %9262 = vmatmul.mubr.msk.f32.vlgmr.msra.gmra.mrb[12].mxu0 %vm481_vm1, %v8189_v14  ;;  %9267 = vmatmul.mubr.msk.f32.vlgmr.msra.gmra.mrb[12].mxu1 %vm481_vm1, %v8191_v15  ;;  %v9665_v14 = vld [vmem:[%s11044_s15 + $0x424] ss:$12 sps:$4 sm:$0xff]   ;;  %v9663_v15 = vld [vmem:[%s11044_s15 + $0x420] ss:$12 sps:$4 sm:$0xff]  }
 0x10d   : > { %9270 = vmatpush3.msra.mxu0 %v11065_v1  ;;  %9271 = vmatprep.mubr.msk.f32.mxu0 %vm10690_vm0, %v10689_v0 }
 0x10e   : > { %9279 = vmatprep.subr.mxu0 %v10689_v0  ;;  %9274 = vmatprep.subr.mxu1 %v10689_v0 }
 0x10f   : > { %9276 = vmatprep.mubr.msk.f32.mxu1 %vm10690_vm0, %v10689_v0  ;;  %9275 = vmatpush3.msra.mxu1 %v11065_v1 }
 0x110   : > { %9272 = vmatmul.mubr.msk.f32.vlgmr.msra.gmra.mrb[14].mxu0 %vm481_vm1, %v8193_v16  ;;  %9277 = vmatmul.mubr.msk.f32.vlgmr.msra.gmra.mrb[14].mxu1 %vm481_vm1, %v8195_v18  ;;  %v9666_v16 = vld [vmem:[%s11044_s15 + $0x138] ss:$12 sps:$4 sm:$0xff]  }
 0x111   : > { %9280 = vmatpush3.msra.mxu0 %v11065_v1  ;;  %9281 = vmatprep.mubr.msk.f32.mxu0 %vm10690_vm0, %v10689_v0  ;;  %v9669_v18 = vld [vmem:[%s11044_s15 + $0x438] ss:$12 sps:$4 sm:$0xff]  }
 0x112   : > { %9289 = vmatprep.subr.mxu0 %v10689_v0  ;;  %9284 = vmatprep.subr.mxu1 %v10689_v0 }
 0x113   : > { %9286 = vmatprep.mubr.msk.f32.mxu1 %vm10690_vm0, %v10689_v0  ;;  %9285 = vmatpush3.msra.mxu1 %v11065_v1 }
 0x114   : > { %9282 = vmatmul.mubr.msk.f32.vlgmr.msra.gmra.mrb[16].mxu0 %vm481_vm1, %v8197_v17  ;;  %9287 = vmatmul.mubr.msk.f32.vlgmr.msra.gmra.mrb[16].mxu1 %vm481_vm1, %v8199_v19  ;;  %v9668_v17 = vld [vmem:[%s11044_s15 + $0x13c] ss:$12 sps:$4 sm:$0xff]  }
 0x115   : > { %9290 = vmatpush3.msra.mxu0 %v11065_v1  ;;  %9291 = vmatprep.mubr.msk.f32.mxu0 %vm10690_vm0, %v10689_v0  ;;  %v9671_v19 = vld [vmem:[%s11044_s15 + $0x43c] ss:$12 sps:$4 sm:$0xff]  }
 0x116   : > { %9299 = vmatprep.subr.mxu0 %v10689_v0  ;;  %9294 = vmatprep.subr.mxu1 %v10689_v0 }
 0x117   : > { %9296 = vmatprep.mubr.msk.f32.mxu1 %vm10690_vm0, %v10689_v0  ;;  %9295 = vmatpush3.msra.mxu1 %v11065_v1 }
 0x118   : > { %9292 = vmatmul.mubr.msk.f32.vlgmr.msra.gmra.mrb[18].mxu0 %vm481_vm1, %v8201_v20  ;;  %9297 = vmatmul.mubr.msk.f32.vlgmr.msra.gmra.mrb[18].mxu1 %vm481_vm1, %v8203_v21  ;;  %v9674_v20 = vld [vmem:[%s11044_s15 + $0x154] ss:$12 sps:$4 sm:$0xff]  }
 0x119   : > { %9300 = vmatpush3.msra.mxu0 %v11065_v1  ;;  %9301 = vmatprep.mubr.msk.f32.mxu0 %vm10690_vm0, %v10689_v0  ;;  %v9677_v21 = vld [vmem:[%s11044_s15 + $0x454] ss:$12 sps:$4 sm:$0xff]  }
 0x11a   : > { %9309 = vmatprep.subr.mxu0 %v10689_v0  ;;  %9304 = vmatprep.subr.mxu1 %v10689_v0 }
 0x11b   : > { %9306 = vmatprep.mubr.msk.f32.mxu1 %vm10690_vm0, %v10689_v0  ;;  %9305 = vmatpush3.msra.mxu1 %v11065_v1 }
 0x11c   : > { %9302 = vmatmul.mubr.msk.f32.vlgmr.msra.gmra.mrb[20].mxu0 %vm481_vm1, %v8205_v22  ;;  %9307 = vmatmul.mubr.msk.f32.vlgmr.msra.gmra.mrb[20].mxu1 %vm481_vm1, %v8207_v23  ;;  %v9672_v22 = vld [vmem:[%s11044_s15 + $0x150] ss:$12 sps:$4 sm:$0xff]  }
 0x11d   : > { %9310 = vmatpush3.msra.mxu0 %v11065_v1  ;;  %9311 = vmatprep.mubr.msk.f32.mxu0 %vm10690_vm0, %v10689_v0  ;;  %v9675_v23 = vld [vmem:[%s11044_s15 + $0x450] ss:$12 sps:$4 sm:$0xff]  }
 0x11e   : > { %9319 = vmatprep.subr.mxu0 %v10689_v0  ;;  %9314 = vmatprep.subr.mxu1 %v10689_v0 }
 0x11f   : > { %9316 = vmatprep.mubr.msk.f32.mxu1 %vm10690_vm0, %v10689_v0  ;;  %9315 = vmatpush3.msra.mxu1 %v11065_v1 }
 0x120   : > { %9312 = vmatmul.mubr.msk.f32.vlgmr.msra.gmra.mrb[22].mxu0 %vm481_vm1, %v8209_v24  ;;  %9317 = vmatmul.mubr.msk.f32.vlgmr.msra.gmra.mrb[22].mxu1 %vm481_vm1, %v8211_v26  ;;  %v9680_v24 = vld [vmem:[%s11044_s15 + $0x16c] ss:$12 sps:$4 sm:$0xff]   ;;  %v9678_v26 = vld [vmem:[%s11044_s15 + $0x168] ss:$12 sps:$4 sm:$0xff]  }
 0x121   : > { %9320 = vmatpush3.msra.mxu0 %v11065_v1  ;;  %9321 = vmatprep.mubr.msk.f32.mxu0 %vm10690_vm0, %v10689_v0  ;;  %v9642_v1 = vld [vmem:[%s11044_s15 + $0xd8] ss:$12 sps:$4 sm:$0xff]  }
 0x122   : > { %6686 = vmatprep.subr.bf16.mxu0 %v9590_v25  ;;  %6768 = vmatprep.subr.bf16.mxu1 %v9593_v27  ;;  %v9683_v25 = vld [vmem:[%s11044_s15 + $0x46c] ss:$12 sps:$4 sm:$0xff]   ;;  %v9681_v27 = vld [vmem:[%s11044_s15 + $0x468] ss:$12 sps:$4 sm:$0xff]  }
 0x123   : > { %6769 = vmatpush1.bf16.msra.mxu1 %v9591_v28  ;;  %v9686_v28 = vld [vmem:[%s11044_s15 + $0x184] ss:$12 sps:$4 sm:$0xff]  }
 0x124   : > { %9322 = vmatmul.mubr.msk.f32.vlgmr.msra.gmra.mrb[24].mxu0 %vm481_vm1, %v8213_v29  ;;  %6770 = vmatprep.subr.bf16.mxu1 %v9599_v31  ;;  %v9690_v29 = vld [vmem:[%s11044_s15 + $0x484] ss:$12 sps:$4 sm:$0xff]   ;;  %v11329_v31 = vld [vmem:[#allocation8] ss:$0 sm:$0xff] }
 0x125   : > { %6687 = vmatpush1.bf16.msra.mxu0 %v9588_v30  ;;  %v11327_v30 = vld [vmem:[#allocation6] ss:$0 sm:$0xff] }
 0x126   : > { %6688 = vmatprep.subr.bf16.mxu0 %v9596_v32 }
 0x127   : > { %6771 = vmatpush1.bf16.msra.mxu1 %v9597_v33 }
 0x128   : > { %6772 = vmatprep.subr.bf16.mxu1 %v9605_v35 }
 0x129   : > { %6689 = vmatpush1.bf16.msra.mxu0 %v9594_v34 }
 0x12a   : > { %6690 = vmatprep.subr.bf16.mxu0 %v9602_v36 }
 0x12b   : > { %6773 = vmatpush1.bf16.msra.mxu1 %v9603_v37 }
 0x12c   : > { %6774 = vmatprep.subr.bf16.mxu1 %v9611_v39 }
 0x12d   : > { %6691 = vmatpush1.bf16.msra.mxu0 %v9600_v38 }
 0x12e   : > { %6692 = vmatprep.subr.bf16.mxu0 %v9608_v40 }
 0x12f   : > { %6775 = vmatpush1.bf16.msra.mxu1 %v9609_v41 }
 0x130   : > { %6776 = vmatprep.subr.bf16.mxu1 %v9617_v43 }
 0x131   : > { %6693 = vmatpush1.bf16.msra.mxu0 %v9606_v42 }
 0x132   : > { %6694 = vmatprep.subr.bf16.mxu0 %v9614_v44 }
 0x133   : > { %6777 = vmatpush1.bf16.msra.mxu1 %v9615_v45 }
 0x134   : > { %6778 = vmatprep.subr.bf16.mxu1 %v9623_v47 }
 0x135   : > { %6695 = vmatpush1.bf16.msra.mxu0 %v9612_v46 }
 0x136   : > { %6696 = vmatprep.subr.bf16.mxu0 %v9620_v48 }
 0x137   : > { %6779 = vmatpush1.bf16.msra.mxu1 %v9621_v49 }
 0x138   : > { %6780 = vmatprep.subr.bf16.mxu1 %v9629_v51 }
 0x139   : > { %6697 = vmatpush1.bf16.msra.mxu0 %v9618_v50 }
 0x13a   : > { %6698 = vmatprep.subr.bf16.mxu0 %v9626_v52 }
 0x13b   : > { %6781 = vmatpush1.bf16.msra.mxu1 %v9627_v53 }
 0x13c   : > { %6782 = vmatprep.subr.bf16.mxu1 %v9635_v57 }
 0x13d   : > { %6699 = vmatpush1.bf16.msra.mxu0 %v9624_v54 }
 0x13e   : > { %6700 = vmatprep.subr.bf16.mxu0 %v9632_v55 }
 0x13f   : > { %6783 = vmatpush1.bf16.msra.mxu1 %v9633_v58 }
 0x140   : > { %6784 = vmatprep.subr.bf16.mxu1 %v9641_v61 }
 0x141   : > { %6701 = vmatpush1.bf16.msra.mxu0 %v9630_v56 }
 0x142   : > { %6702 = vmatprep.subr.bf16.mxu0 %v9638_v59 }
 0x143   : > { %6785 = vmatpush1.bf16.msra.mxu1 %v9639_v62 }
 0x144   : > { %6786 = vmatprep.subr.bf16.mxu1 %v9647_v2 }
 0x145   : > { %6703 = vmatpush1.bf16.msra.mxu0 %v9636_v60 }
 0x146   : > { %6704 = vmatprep.subr.bf16.mxu0 %v9644_v63 }
 0x147   : > { %6787 = vmatpush1.bf16.msra.mxu1 %v9645_v3 }
 0x148   : > { %6788 = vmatprep.subr.bf16.mxu1 %v9653_v6 }
 0x149   : > { %6705 = vmatpush1.bf16.msra.mxu0 %v9642_v1 }
 0x14a   : > { %6706 = vmatprep.subr.bf16.mxu0 %v9650_v4 }
 0x14b   : > { %6789 = vmatpush1.bf16.msra.mxu1 %v9651_v7 }
 0x14c   : > { %6790 = vmatprep.subr.bf16.mxu1 %v9659_v10 }
 0x14d   : > { %6707 = vmatpush1.bf16.msra.mxu0 %v9648_v5 }
 0x14e   : > { %6708 = vmatprep.subr.bf16.mxu0 %v9656_v8 }
 0x14f   : > { %6791 = vmatpush1.bf16.msra.mxu1 %v9657_v11 }
 0x150   : > { %6792 = vmatprep.subr.bf16.mxu1 %v9665_v14 }
 0x151   : > { %6709 = vmatpush1.bf16.msra.mxu0 %v9654_v9 }
 0x152   : > { %6710 = vmatprep.subr.bf16.mxu0 %v9662_v12 }
 0x153   : > { %6793 = vmatpush1.bf16.msra.mxu1 %v9663_v15  ;;  %v3304_v15 = vlaneseq }
 0x154   : > { %6794 = vmatprep.subr.bf16.mxu1 %v9671_v19 }
 0x155   : > { %6711 = vmatpush1.bf16.msra.mxu0 %v9660_v13  ;;  %v10691_v13 = vmov 1966171168  }
 0x156   : > { %6712 = vmatprep.subr.bf16.mxu0 %v9668_v17  ;;  %v3302_v14 = vunpack.c.l.s4 %v10691_v13 }
 0x157   : > { %6795 = vmatpush1.bf16.msra.mxu1 %v9669_v18 }
 0x158   : > { %6796 = vmatprep.subr.bf16.mxu1 %v9677_v21 }
 0x159   : > { %6713 = vmatpush1.bf16.msra.mxu0 %v9666_v16 }
 0x15a   : > { %6714 = vmatprep.subr.bf16.mxu0 %v9674_v20 }
 0x15b   : > { %6797 = vmatpush1.bf16.msra.mxu1 %v9675_v23 }
 0x15c   : > { %6798 = vmatprep.subr.bf16.mxu1 %v9683_v25 }
 0x15d   : > { %6715 = vmatpush1.bf16.msra.mxu0 %v9672_v22 }
 0x15e   : > { %6716 = vmatprep.subr.bf16.mxu0 %v9680_v24 }
 0x15f   : > { %6799 = vmatpush1.bf16.msra.mxu1 %v9681_v27  ;;  %v3303_v27 = vunpack.c.0.s8 %v3302_v14  ;;  %v9693_v14 = vld [vmem:[%s11044_s15 + $0x19c] ss:$12 sps:$4 sm:$0xff]  }
 0x160   : > { %6809 = vmatprep.subr.bf16.mxu1 %v9690_v29 }
 0x161   : > { %6717 = vmatpush1.bf16.msra.mxu0 %v9678_v26 }
 0x162   : > { %6727 = vmatprep.subr.bf16.mxu0 %v9686_v28  ;;  %v11350_v28 = vshrl.u32 %v3304_v15, 7 }
 0x1c7   : > { %v551_v32 = vpop.f32.mrb[0].mxu0  ;;  %v643_v33 = vpop.f32.mrb[0].mxu1 }
 0x1c8   : > { %v561_v34 = vmul.f32 %v11327_v30, %v551_v32  ;;  %v647_v35 = vmul.f32 %v11327_v30, %v643_v33  ;;  %v9203_v36 = vpop.f32.mrb[1].mxu0  ;;  %v9208_v37 = vpop.f32.mrb[1].mxu1 }
 0x1ca   : > { %v568_v38 = vadd.f32 %v11329_v31, %v561_v34  ;;  %v648_v39 = vadd.f32 %v11329_v31, %v647_v35 }
 0x1cb   : > { %v723_v40 = vpop.f32.mrb[2].mxu0  ;;  %v803_v41 = vpop.f32.mrb[2].mxu1 }
 0x1cc   : > { %v569_v42 = vmax.f32 %v568_v38, 0.0  ;;  %v649_v43 = vmax.f32 %v648_v39, 0.0  ;;  %v727_v44 = vmul.f32 %v11327_v30, %v723_v40  ;;  %v807_v45 = vmul.f32 %v11327_v30, %v803_v41  ;;  %v9213_v46 = vpop.f32.mrb[3].mxu0  ;;  %v9218_v47 = vpop.f32.mrb[3].mxu1 }
 0x1ce   : > { %v570_v48 = vpack.c.bf16 %v569_v42, %v569_v42  ;;  %v650_v49 = vpack.c.bf16 %v649_v43, %v649_v43  ;;  %v728_v50 = vadd.f32 %v11329_v31, %v727_v44  ;;  %v808_v51 = vadd.f32 %v11329_v31, %v807_v45 }
 0x1cf   : > { %v883_v52 = vpop.f32.mrb[4].mxu0  ;;  %v963_v53 = vpop.f32.mrb[4].mxu1  ;;  %v11357_v42 = vsub.s32 %v3303_v27, %v11350_v28 }
 0x1d0   : > { %571 = vst [vmem:[#allocation2] sm:$0x1] %v570_v48  ;;  %651 = vst [vmem:[#allocation2 + $0x1] sm:$0x1] %v650_v49  ;;  %v729_v54 = vmax.f32 %v728_v50, 0.0  ;;  %v809_v55 = vmax.f32 %v808_v51, 0.0  ;;  %v887_v56 = vmul.f32 %v11327_v30, %v883_v52  ;;  %v967_v57 = vmul.f32 %v11327_v30, %v963_v53 }
 0x1d1   : > { %v9223_v58 = vpop.f32.mrb[5].mxu0  ;;  %v9228_v59 = vpop.f32.mrb[5].mxu1 }
 0x1d2   : > { %v730_v60 = vpack.c.bf16 %v729_v54, %v729_v54  ;;  %v810_v61 = vpack.c.bf16 %v809_v55, %v809_v55  ;;  %v888_v62 = vadd.f32 %v11329_v31, %v887_v56  ;;  %v968_v63 = vadd.f32 %v11329_v31, %v967_v57 }
 0x1d3   : > { %v1043_v1 = vpop.f32.mrb[6].mxu0  ;;  %v1123_v2 = vpop.f32.mrb[6].mxu1 }
 0x1d4   : > { %731 = vst [vmem:[#allocation2 + $0x2] sm:$0x1] %v730_v60  ;;  %811 = vst [vmem:[#allocation2 + $0x3] sm:$0x1] %v810_v61  ;;  %v889_v3 = vmax.f32 %v888_v62, 0.0  ;;  %v969_v4 = vmax.f32 %v968_v63, 0.0  ;;  %v1047_v5 = vmul.f32 %v11327_v30, %v1043_v1  ;;  %v1127_v6 = vmul.f32 %v11327_v30, %v1123_v2 }
 0x1d5   : > { %v9233_v7 = vpop.f32.mrb[7].mxu0  ;;  %v9238_v8 = vpop.f32.mrb[7].mxu1 }
 0x1d6   : > { %v890_v9 = vpack.c.bf16 %v889_v3, %v889_v3  ;;  %v970_v10 = vpack.c.bf16 %v969_v4, %v969_v4  ;;  %v1048_v11 = vadd.f32 %v11329_v31, %v1047_v5  ;;  %v1128_v12 = vadd.f32 %v11329_v31, %v1127_v6 }
 0x1d7   : > { %v1203_v16 = vpop.f32.mrb[8].mxu0  ;;  %v1283_v21 = vpop.f32.mrb[8].mxu1 }
 0x1d8   : > { %891 = vst [vmem:[#allocation2 + $0x4] sm:$0x1] %v890_v9  ;;  %971 = vst [vmem:[#allocation2 + $0x5] sm:$0x1] %v970_v10  ;;  %v1049_v17 = vmax.f32 %v1048_v11, 0.0  ;;  %v1129_v18 = vmax.f32 %v1128_v12, 0.0  ;;  %v1207_v19 = vmul.f32 %v11327_v30, %v1203_v16  ;;  %v1287_v25 = vmul.f32 %v11327_v30, %v1283_v21 }
 0x1d9   : > { %v9243_v20 = vpop.f32.mrb[9].mxu0  ;;  %v9248_v26 = vpop.f32.mrb[9].mxu1  ;;  %v9684_v11 = vld [vmem:[%s11044_s15 + $0x180] ss:$12 sps:$4 sm:$0xff]  }
 0x1da   : > { %v1050_v22 = vpack.c.bf16 %v1049_v17, %v1049_v17  ;;  %v1130_v23 = vpack.c.bf16 %v1129_v18, %v1129_v18  ;;  %v1208_v24 = vadd.f32 %v11329_v31, %v1207_v19  ;;  %v1288_v35 = vadd.f32 %v11329_v31, %v1287_v25 }
 0x1db   : > { %v1363_v29 = vpop.f32.mrb[10].mxu0  ;;  %v1443_v36 = vpop.f32.mrb[10].mxu1 }
 0x1dc   : > { %1051 = vst [vmem:[#allocation2 + $0x6] sm:$0x1] %v1050_v22  ;;  %1131 = vst [vmem:[#allocation2 + $0x7] sm:$0x1] %v1130_v23  ;;  %v1209_v32 = vmax.f32 %v1208_v24, 0.0  ;;  %v1367_v33 = vmul.f32 %v11327_v30, %v1363_v29  ;;  %v9253_v34 = vpop.f32.mrb[11].mxu0  ;;  %v1447_v40 = vmul.f32 %v11327_v30, %v1443_v36 }
 0x1dd   : > { %v1289_v39 = vmax.f32 %v1288_v35, 0.0  ;;  %v9258_v41 = vpop.f32.mrb[11].mxu1  ;;  %v9688_v22 = vld [vmem:[%s11044_s15 + $0x480] ss:$12 sps:$4 sm:$0xff]   ;;  %v9691_v23 = vld [vmem:[%s11044_s15 + $0x198] ss:$12 sps:$4 sm:$0xff]  }
 0x1de   : > { %v1210_v37 = vpack.c.bf16 %v1209_v32, %v1209_v32  ;;  %v1368_v38 = vadd.f32 %v11329_v31, %v1367_v33  ;;  %v1448_v48 = vadd.f32 %v11329_v31, %v1447_v40  ;;  %v9696_v33 = vld [vmem:[%s11044_s15 + $0x49c] ss:$12 sps:$4 sm:$0xff]   ;;  %v9699_v36 = vld [vmem:[%s11044_s15 + $0x1b4] ss:$12 sps:$4 sm:$0xff]  }
 0x1df   : > { %v1523_v43 = vpop.f32.mrb[12].mxu0  ;;  %v1290_v47 = vpack.c.bf16 %v1289_v39, %v1289_v39  ;;  %v1603_v49 = vpop.f32.mrb[12].mxu1  ;;  %v9694_v39 = vld [vmem:[%s11044_s15 + $0x498] ss:$12 sps:$4 sm:$0xff]   ;;  %v9697_v41 = vld [vmem:[%s11044_s15 + $0x1b0] ss:$12 sps:$4 sm:$0xff]  }
 0x1e0   : > { %1211 = vst [vmem:[#allocation2 + $0x8] sm:$0x1] %v1210_v37  ;;  %v1369_v44 = vmax.f32 %v1368_v38, 0.0  ;;  %v1527_v45 = vmul.f32 %v11327_v30, %v1523_v43  ;;  %v9263_v46 = vpop.f32.mrb[13].mxu0  ;;  %v1449_v52 = vmax.f32 %v1448_v48, 0.0  ;;  %v1607_v53 = vmul.f32 %v11327_v30, %v1603_v49  ;;  %v9268_v54 = vpop.f32.mrb[13].mxu1 }
 0x1e1   : > { %1291 = vst [vmem:[#allocation2 + $0x9] sm:$0x1] %v1290_v47  ;;  %v9702_v46 = vld [vmem:[%s11044_s15 + $0x4b4] ss:$12 sps:$4 sm:$0xff]   ;;  %v9700_v54 = vld [vmem:[%s11044_s15 + $0x4b0] ss:$12 sps:$4 sm:$0xff]  }
 0x1e2   : > { %v1370_v50 = vpack.c.bf16 %v1369_v44, %v1369_v44  ;;  %v1528_v51 = vadd.f32 %v11329_v31, %v1527_v45  ;;  %v1450_v62 = vpack.c.bf16 %v1449_v52, %v1449_v52  ;;  %v1608_v63 = vadd.f32 %v11329_v31, %v1607_v53  ;;  %v9705_v52 = vld [vmem:[%s11044_s15 + $0x1cc] ss:$12 sps:$4 sm:$0xff]  }
 0x1e3   : > { %v2492_v55 = vld [vmem:[#allocation2] sm:$0xff]  ;;  %v1683_v56 = vpop.f32.mrb[14].mxu0  ;;  %v1763_v1 = vpop.f32.mrb[14].mxu1 }
 0x1e4   : > { %v3307_v57 = vrot.slane %v2492_v55, %v11357_v42  ;;  %v3300_v58 = vcombine.high %v2492_v55, %v2492_v55  ;;  %1371 = vst [vmem:[#allocation2 + $0xa] sm:$0x1] %v1370_v50  ;;  %v1529_v59 = vmax.f32 %v1528_v51, 0.0  ;;  %v1687_v60 = vmul.f32 %v11327_v30, %v1683_v56  ;;  %v9273_v61 = vpop.f32.mrb[15].mxu0  ;;  %v9278_v5 = vpop.f32.mrb[15].mxu1 }
 0x1e5   : > { %1451 = vst [vmem:[#allocation2 + $0xb] sm:$0x1] %v1450_v62  ;;  %v1609_v8 = vmax.f32 %v1608_v63, 0.0  ;;  %v1767_v9 = vmul.f32 %v11327_v30, %v1763_v1  ;;  %v9708_v63 = vld [vmem:[%s11044_s15 + $0x4cc] ss:$12 sps:$4 sm:$0xff]  }
 0x1e6   : > { %v3315_v2 = vcombine.high %v3307_v57, %v3307_v57  ;;  %v3314_v3 = vrot.slane %v3300_v58, %v11357_v42  ;;  %v1530_v4 = vpack.c.bf16 %v1529_v59, %v1529_v59  ;;  %v1688_v6 = vadd.f32 %v11329_v31, %v1687_v60  ;;  %v9703_v60 = vld [vmem:[%s11044_s15 + $0x1c8] ss:$12 sps:$4 sm:$0xff]  }
 0x1e7   : > { %v1843_v7 = vpop.f32.mrb[16].mxu0  ;;  %v11374_v12 = vrot.slane %v3307_v57, %v11357_v42  ;;  %v1610_v18 = vpack.c.bf16 %v1609_v8, %v1609_v8  ;;  %v1768_v19 = vadd.f32 %v11329_v31, %v1767_v9  ;;  %v1923_v45 = vpop.f32.mrb[16].mxu1 }
 0x1e8   : > { %v11370_v10 = vrot.slane %v3315_v2, %v11357_v42  ;;  %v3316_v13 = vcombine.high %v3314_v3, %v3314_v3  ;;  %1531 = vst [vmem:[#allocation2 + $0xc] sm:$0x1] %v1530_v4  ;;  %v9283_v15 = vpop.f32.mrb[17].mxu0  ;;  %v1689_v16 = vmax.f32 %v1688_v6, 0.0  ;;  %v1847_v17 = vmul.f32 %v11327_v30, %v1843_v7  ;;  %v9288_v51 = vpop.f32.mrb[17].mxu1 }
 0x1e9   : > { %1611 = vst [vmem:[#allocation2 + $0xd] sm:$0x1] %v1610_v18  ;;  %v1769_v27 = vmax.f32 %v1768_v19, 0.0  ;;  %v11393_v29 = vrot.slane %v3314_v3, %v11357_v42  ;;  %v1927_v50 = vmul.f32 %v11327_v30, %v1923_v45  ;;  %v9711_v7 = vld [vmem:[%s11044_s15 + $0x1e4] ss:$12 sps:$4 sm:$0xff]  }
 0x1ea   : > { %6718 = vmatprep.mubr.bf16.mxu0 %v11370_v10  ;;  %v11382_v20 = vcombine.high %v11370_v10, %v11370_v10  ;;  %v11385_v21 = vrot.slane %v3316_v13, %v11357_v42  ;;  %v1690_v24 = vpack.c.bf16 %v1689_v16, %v1689_v16  ;;  %v1848_v25 = vadd.f32 %v11329_v31, %v1847_v17  ;;  %v9709_v19 = vld [vmem:[%s11044_s15 + $0x1e0] ss:$12 sps:$4 sm:$0xff]   ;;  %v9715_v45 = vld [vmem:[%s11044_s15 + $0x1f8] ss:$12 sps:$4 sm:$0xff]  }
 0x1eb   : > { %6719 = vmatmul.mubr.bf16.vlgmr.msra.gmra.mrb[28].mxu0 %v11374_v12  ;;  %v2003_v26 = vpop.f32.mrb[18].mxu0  ;;  %v1770_v38 = vpack.c.bf16 %v1769_v27, %v1769_v27  ;;  %v2083_v53 = vpop.f32.mrb[18].mxu1  ;;  %v1928_v57 = vadd.f32 %v11329_v31, %v1927_v50  ;;  %v9714_v27 = vld [vmem:[%s11044_s15 + $0x4e4] ss:$12 sps:$4 sm:$0xff]  }
 0x1ec   : > { %6728 = vmatpush1.bf16.msra.mxu0 %v9684_v11  ;;  %6759 = vmatprep.mubr.bf16.mxu0 %v11382_v20  ;;  %v11397_v32 = vcombine.high %v11385_v21, %v11385_v21  ;;  %v2007_v34 = vmul.f32 %v11327_v30, %v2003_v26  ;;  %v9293_v35 = vpop.f32.mrb[19].mxu0  ;;  %1691 = vst [vmem:[#allocation2 + $0xe] sm:$0x1] %v1690_v24  ;;  %v1849_v37 = vmax.f32 %v1848_v25, 0.0  ;;  %v9298_v59 = vpop.f32.mrb[19].mxu1 }
 0x1ed   : > { %6800 = vmatprep.mubr.bf16.mxu1 %v11385_v21  ;;  %6729 = vmatprep.subr.bf16.mxu0 %v9693_v14  ;;  %1771 = vst [vmem:[#allocation2 + $0xf] sm:$0x1] %v1770_v38  ;;  %v2087_v58 = vmul.f32 %v11327_v30, %v2083_v53  ;;  %v1929_v4 = vmax.f32 %v1928_v57, 0.0  ;;  %v9706_v11 = vld [vmem:[%s11044_s15 + $0x4c8] ss:$12 sps:$4 sm:$0xff]  }
 0x1ee   : > { %6801 = vmatmul.mubr.bf16.vlgmr.msra.gmra.mrb[24].mxu1 %v11393_v29  ;;  %v2008_v40 = vadd.f32 %v11329_v31, %v2007_v34  ;;  %v1850_v43 = vpack.c.bf16 %v1849_v37, %v1849_v37  ;;  %v9718_v53 = vld [vmem:[%s11044_s15 + $0x4f8] ss:$12 sps:$4 sm:$0xff]   ;;  %v9726_v57 = vld [vmem:[%s11044_s15 + $0x514] ss:$12 sps:$4 sm:$0xff]   ;;  %v9724_v59 = vld [vmem:[%s11044_s15 + $0x510] ss:$12 sps:$4 sm:$0xff]  }
 0x1ef   : > { %6810 = vmatpush1.bf16.msra.mxu1 %v9688_v22  ;;  %6841 = vmatprep.mubr.bf16.mxu1 %v11397_v32  ;;  %v2163_v44 = vpop.f32.mrb[20].mxu0  ;;  %v2243_v62 = vpop.f32.mrb[20].mxu1  ;;  %v2088_v5 = vadd.f32 %v11329_v31, %v2087_v58  ;;  %v1930_v16 = vpack.c.bf16 %v1929_v4, %v1929_v4  ;;  %v9729_v58 = vld [vmem:[%s11044_s15 + $0x22c] ss:$12 sps:$4 sm:$0xff]   ;;  %v9738_v4 = vld [vmem:[%s11044_s15 + $0x544] ss:$12 sps:$4 sm:$0xff]  }
 0x1f0   : > { %6730 = vmatpush1.bf16.msra.mxu0 %v9691_v23  ;;  %6811 = vmatprep.subr.bf16.mxu1 %v9696_v33  ;;  %v2009_v47 = vmax.f32 %v2008_v40, 0.0  ;;  %v2167_v48 = vmul.f32 %v11327_v30, %v2163_v44  ;;  %v9303_v49 = vpop.f32.mrb[21].mxu0  ;;  %1851 = vst [vmem:[#allocation2 + $0x10] sm:$0x1] %v1850_v43  ;;  %v9308_v6 = vpop.f32.mrb[21].mxu1  ;;  %v2247_v8 = vmul.f32 %v11327_v30, %v2243_v62 }
 0x1f1   : > { %6731 = vmatprep.subr.bf16.mxu0 %v9699_v36  ;;  %v2089_v17 = vmax.f32 %v2088_v5, 0.0  ;;  %v9717_v33 = vld [vmem:[%s11044_s15 + $0x1fc] ss:$12 sps:$4 sm:$0xff]   ;;  %1931 = vst [vmem:[#allocation2 + $0x11] sm:$0x1] %v1930_v16 }
 0x1f2   : > { %v2010_v55 = vpack.c.bf16 %v2009_v47, %v2009_v47  ;;  %v2168_v56 = vadd.f32 %v11329_v31, %v2167_v48  ;;  %v2248_v24 = vadd.f32 %v11329_v31, %v2247_v8  ;;  %v9720_v48 = vld [vmem:[%s11044_s15 + $0x4fc] ss:$12 sps:$4 sm:$0xff]   ;;  %v9723_v49 = vld [vmem:[%s11044_s15 + $0x214] ss:$12 sps:$4 sm:$0xff]   ;;  %v9735_v62 = vld [vmem:[%s11044_s15 + $0x244] ss:$12 sps:$4 sm:$0xff]  }
 0x1f3   : > { %6812 = vmatpush1.bf16.msra.mxu1 %v9694_v39  ;;  %v2323_v61 = vpop.f32.mrb[22].mxu0  ;;  %v2403_v9 = vpop.f32.mrb[22].mxu1  ;;  %v2090_v36 = vpack.c.bf16 %v2089_v17, %v2089_v17  ;;  %v9741_v5 = vld [vmem:[%s11044_s15 + $0x25c] ss:$12 sps:$4 sm:$0xff]   ;;  %v9739_v8 = vld [vmem:[%s11044_s15 + $0x258] ss:$12 sps:$4 sm:$0xff]  }
 0x1f4   : > { %6732 = vmatpush1.bf16.msra.mxu0 %v9697_v41  ;;  %6813 = vmatprep.subr.bf16.mxu1 %v9702_v46  ;;  %2011 = vst [vmem:[#allocation2 + $0x12] sm:$0x1] %v2010_v55  ;;  %v2169_v1 = vmax.f32 %v2168_v56, 0.0  ;;  %v2327_v2 = vmul.f32 %v11327_v30, %v2323_v61  ;;  %v9313_v3 = vpop.f32.mrb[23].mxu0  ;;  %v2493_v15 = vld [vmem:[#allocation2 + $0x8] sm:$0xff]  ;;  %v9318_v18 = vpop.f32.mrb[23].mxu1  ;;  %v2407_v25 = vmul.f32 %v11327_v30, %v2403_v9 }
 0x1f5   : > { %6733 = vmatprep.subr.bf16.mxu0 %v9705_v52  ;;  %v11426_v23 = vrot.slane %v2493_v15, %v11357_v42  ;;  %v3349_v26 = vcombine.high %v2493_v15, %v2493_v15  ;;  %v2249_v39 = vmax.f32 %v2248_v24, 0.0  ;;  %v9712_v41 = vld [vmem:[%s11044_s15 + $0x4e0] ss:$12 sps:$4 sm:$0xff]   ;;  %2091 = vst [vmem:[#allocation2 + $0x13] sm:$0x1] %v2090_v36 }
 0x1f6   : > { %v2170_v13 = vpack.c.bf16 %v2169_v1, %v2169_v1  ;;  %v2328_v14 = vadd.f32 %v11329_v31, %v2327_v2  ;;  %v2408_v40 = vadd.f32 %v11329_v31, %v2407_v25  ;;  %v9721_v56 = vld [vmem:[%s11044_s15 + $0x210] ss:$12 sps:$4 sm:$0xff]   ;;  %v9732_v61 = vld [vmem:[%s11044_s15 + $0x52c] ss:$12 sps:$4 sm:$0xff]   ;;  %v9730_v1 = vld [vmem:[%s11044_s15 + $0x528] ss:$12 sps:$4 sm:$0xff]  }
 0x1f7   : > { %6814 = vmatpush1.bf16.msra.mxu1 %v9700_v54  ;;  %v2483_v22 = vpop.f32.mrb[24].mxu0  ;;  %v11435_v38 = vrot.slane %v11426_v23, %v11357_v42  ;;  %v2250_v46 = vpack.c.bf16 %v2249_v39, %v2249_v39  ;;  %v9733_v2 = vld [vmem:[%s11044_s15 + $0x240] ss:$12 sps:$4 sm:$0xff]   ;;  %v9742_v16 = vld [vmem:[%s11044_s15 + $0x558] ss:$12 sps:$4 sm:$0xff]  }
 0x1f8   : > { %6734 = vmatpush1.bf16.msra.mxu0 %v9703_v60  ;;  %6815 = vmatprep.subr.bf16.mxu1 %v9708_v63  ;;  %2171 = vst [vmem:[#allocation2 + $0x14] sm:$0x1] %v2170_v13  ;;  %v2329_v34 = vmax.f32 %v2328_v14, 0.0  ;;  %v2487_v35 = vmul.f32 %v11327_v30, %v2483_v22  ;;  %v9323_v37 = vpop.f32.mrb[25].mxu0  ;;  %v3363_v30 = vrot.slane %v3349_v26, %v11357_v42  ;;  %v2409_v47 = vmax.f32 %v2408_v40, 0.0 }
 0x1f9   : > { %6735 = vmatprep.subr.bf16.mxu0 %v9711_v7  ;;  %2251 = vst [vmem:[#allocation2 + $0x15] sm:$0x1] %v2250_v46  ;;  %v9727_v60 = vld [vmem:[%s11044_s15 + $0x228] ss:$12 sps:$4 sm:$0xff]   ;;  %v9736_v7 = vld [vmem:[%s11044_s15 + $0x540] ss:$12 sps:$4 sm:$0xff]  }
 0x1fa   : > { %v2330_v43 = vpack.c.bf16 %v2329_v34, %v2329_v34  ;;  %v2488_v44 = vadd.f32 %v11329_v31, %v2487_v35  ;;  %v3365_v51 = vcombine.high %v3363_v30, %v3363_v30  ;;  %v11445_v31 = vrot.slane %v3363_v30, %v11357_v42  ;;  %v9744_v13 = vld [vmem:[%s11044_s15 + $0x55c] ss:$12 sps:$4 sm:$0xff]   ;;  %v9747_v14 = vld [vmem:[%s11044_s15 + $0x274] ss:$12 sps:$4 sm:$0xff]   ;;  %v9756_v25 = vld [vmem:[%s11044_s15 + $0x58c] ss:$12 sps:$4 sm:$0xff]  }
 0x1fb   : > { %6816 = vmatpush1.bf16.msra.mxu1 %v9706_v11  ;;  %v2410_v52 = vpack.c.bf16 %v2409_v47, %v2409_v47  ;;  %v9745_v17 = vld [vmem:[%s11044_s15 + $0x270] ss:$12 sps:$4 sm:$0xff]   ;;  %v9750_v18 = vld [vmem:[%s11044_s15 + $0x574] ss:$12 sps:$4 sm:$0xff]   ;;  %v9763_v37 = vld [vmem:[%s11044_s15 + $0x2b8] ss:$12 sps:$4 sm:$0xff]  }
 0x1fc   : > { %6736 = vmatpush1.bf16.msra.mxu0 %v9709_v19  ;;  %6817 = vmatprep.subr.bf16.mxu1 %v9714_v27  ;;  %2331 = vst [vmem:[#allocation2 + $0x16] sm:$0x1] %v2330_v43  ;;  %v2489_v50 = vmax.f32 %v2488_v44, 0.0  ;;  %v11449_v55 = vrot.slane %v3365_v51, %v11357_v42  ;;  %v9753_v19 = vld [vmem:[%s11044_s15 + $0x28c] ss:$12 sps:$4 sm:$0xff]   ;;  %v3364_v51 = vcombine.high %v11426_v23, %v11426_v23 }
 0x1fd   : > { %6737 = vmatprep.subr.bf16.mxu0 %v9717_v33  ;;  %2411 = vst [vmem:[#allocation2 + $0x17] sm:$0x1] %v2410_v52  ;;  %v9748_v22 = vld [vmem:[%s11044_s15 + $0x570] ss:$12 sps:$4 sm:$0xff]   ;;  %v9751_v24 = vld [vmem:[%s11044_s15 + $0x288] ss:$12 sps:$4 sm:$0xff]   ;;  %v11515_v23 = vcombine.high %v11393_v29, %v11393_v29 }
 0x1fe   : > { %v2490_v54 = vpack.c.bf16 %v2489_v50, %v2489_v50  ;;  %v9759_v26 = vld [vmem:[%s11044_s15 + $0x2a4] ss:$12 sps:$4 sm:$0xff]   ;;  %v9754_v27 = vld [vmem:[%s11044_s15 + $0x588] ss:$12 sps:$4 sm:$0xff]   ;;  %v9757_v33 = vld [vmem:[%s11044_s15 + $0x2a0] ss:$12 sps:$4 sm:$0xff]  }
 0x1ff   : > { %6818 = vmatpush1.bf16.msra.mxu1 %v9712_v41  ;;  %v9762_v34 = vld [vmem:[%s11044_s15 + $0x5a4] ss:$12 sps:$4 sm:$0xff]   ;;  %v9765_v35 = vld [vmem:[%s11044_s15 + $0x2bc] ss:$12 sps:$4 sm:$0xff]   ;;  %v9760_v36 = vld [vmem:[%s11044_s15 + $0x5a0] ss:$12 sps:$4 sm:$0xff]  }
 0x200   : > { %6738 = vmatpush1.bf16.msra.mxu0 %v9715_v45  ;;  %6819 = vmatprep.subr.bf16.mxu1 %v9720_v48  ;;  %2491 = vst [vmem:[#allocation2 + $0x18] sm:$0x1] %v2490_v54  ;;  %v9768_v39 = vld [vmem:[%s11044_s15 + $0x5bc] ss:$12 sps:$4 sm:$0xff]   ;;  %v9771_v40 = vld [vmem:[%s11044_s15 + $0x2d4] ss:$12 sps:$4 sm:$0xff]   ;;  %v11505_v54 = vcombine.high %v11374_v12, %v11374_v12 }
 0x201   : > { %6739 = vmatprep.subr.bf16.mxu0 %v9723_v49  ;;  %v9766_v41 = vld [vmem:[%s11044_s15 + $0x5b8] ss:$12 sps:$4 sm:$0xff]   ;;  %v9769_v43 = vld [vmem:[%s11044_s15 + $0x2d0] ss:$12 sps:$4 sm:$0xff]   ;;  %v9774_v44 = vld [vmem:[%s11044_s15 + $0x5d4] ss:$12 sps:$4 sm:$0xff]  }
 0x202   : > { %v9777_v30 = vld [vmem:[%s11044_s15 + $0x2ec] ss:$12 sps:$4 sm:$0xff]   ;;  %v9772_v45 = vld [vmem:[%s11044_s15 + $0x5d0] ss:$12 sps:$4 sm:$0xff]   ;;  %v9775_v46 = vld [vmem:[%s11044_s15 + $0x2e8] ss:$12 sps:$4 sm:$0xff]  }
 0x203   : > { %6820 = vmatpush1.bf16.msra.mxu1 %v9718_v53  ;;  %v9780_v47 = vld [vmem:[%s11044_s15 + $0x5ec] ss:$12 sps:$4 sm:$0xff]   ;;  %v9783_v48 = vld [vmem:[%s11044_s15 + $0x1204] ss:$12 sps:$4 sm:$0xff]   ;;  %v9778_v49 = vld [vmem:[%s11044_s15 + $0x5e8] ss:$12 sps:$4 sm:$0xff]  }
 0x204   : > { %6740 = vmatpush1.bf16.msra.mxu0 %v9721_v56  ;;  %6821 = vmatprep.subr.bf16.mxu1 %v9726_v57  ;;  %v2494_v63 = vld [vmem:[#allocation2 + $0x10] sm:$0xff]  ;;  %v9787_v57 = vld [vmem:[%s11044_s15 + $0x1218] ss:$12 sps:$4 sm:$0xff]  }
 0x205   : > { %6741 = vmatprep.subr.bf16.mxu0 %v9729_v58  ;;  %v3398_v3 = vcombine.high %v2494_v63, %v2494_v63  ;;  %v9781_v50 = vld [vmem:[%s11044_s15 + $0x1200] ss:$12 sps:$4 sm:$0xff]   ;;  %v9786_v52 = vld [vmem:[%s11044_s15 + $0x604] ss:$12 sps:$4 sm:$0xff]   ;;  %v9789_v53 = vld [vmem:[%s11044_s15 + $0x121c] ss:$12 sps:$4 sm:$0xff]   ;;  %v11511_v58 = vrot.slane %v3364_v51, %v11357_v42 }
 0x206   : > { %v9784_v56 = vld [vmem:[%s11044_s15 + $0x600] ss:$12 sps:$4 sm:$0xff]   ;;  %v9793_v63 = vld [vmem:[%s11044_s15 + $0x1230] ss:$12 sps:$4 sm:$0xff]  }
 0x207   : > { %6822 = vmatpush1.bf16.msra.mxu1 %v9724_v59  ;;  %v3412_v6 = vrot.slane %v3398_v3, %v11357_v42  ;;  %v9792_v59 = vld [vmem:[%s11044_s15 + $0x61c] ss:$12 sps:$4 sm:$0xff]   ;;  %v9848_v51 = vld [vmem:[%s11044_s15 + $0x70c] ss:$12 sps:$4 sm:$0xff]  }
 0x208   : > { %6742 = vmatpush1.bf16.msra.mxu0 %v9727_v60  ;;  %6823 = vmatprep.subr.bf16.mxu1 %v9732_v61  ;;  %v9795_v60 = vld [vmem:[%s11044_s15 + $0x1234] ss:$12 sps:$4 sm:$0xff]   ;;  %v10692_v61 = vmov 0   ;;  %v9796_v3 = vld [vmem:[%s11044_s15 + $0x630] ss:$12 sps:$4 sm:$0xff]  }
 0x209   : > { %6743 = vmatprep.subr.bf16.mxu0 %v9735_v62  ;;  %v3414_v9 = vcombine.high %v3412_v6, %v3412_v6  ;;  %v11466_v11 = vrot.slane %v3412_v6, %v11357_v42  ;;  %v9790_v62 = vld [vmem:[%s11044_s15 + $0x618] ss:$12 sps:$4 sm:$0xff]  }
 0x20a   : > { %v9807_v6 = vld [vmem:[%s11044_s15 + $0x1264] ss:$12 sps:$4 sm:$0xff]  }
 0x20b   : > { %6824 = vmatpush1.bf16.msra.mxu1 %v9730_v1  ;;  %v11471_v15 = vrot.slane %v3414_v9, %v11357_v42  ;;  %v9798_v1 = vld [vmem:[%s11044_s15 + $0x634] ss:$12 sps:$4 sm:$0xff]   ;;  %v9810_v9 = vld [vmem:[%s11044_s15 + $0x664] ss:$12 sps:$4 sm:$0xff]  }
 0x20c   : > { %6744 = vmatpush1.bf16.msra.mxu0 %v9733_v2  ;;  %6825 = vmatprep.subr.bf16.mxu1 %v9738_v4  ;;  %v9801_v2 = vld [vmem:[%s11044_s15 + $0x124c] ss:$12 sps:$4 sm:$0xff]   ;;  %v9799_v4 = vld [vmem:[%s11044_s15 + $0x1248] ss:$12 sps:$4 sm:$0xff]  }
 0x20d   : > { %6745 = vmatprep.subr.bf16.mxu0 %v9741_v5  ;;  %v9804_v5 = vld [vmem:[%s11044_s15 + $0x64c] ss:$12 sps:$4 sm:$0xff]  }
 0x20f   : > { %6826 = vmatpush1.bf16.msra.mxu1 %v9736_v7  ;;  %v9802_v7 = vld [vmem:[%s11044_s15 + $0x648] ss:$12 sps:$4 sm:$0xff]  }
 0x210   : > { %6746 = vmatpush1.bf16.msra.mxu0 %v9739_v8  ;;  %6827 = vmatprep.subr.bf16.mxu1 %v9744_v13  ;;  %v9805_v8 = vld [vmem:[%s11044_s15 + $0x1260] ss:$12 sps:$4 sm:$0xff]   ;;  %v9813_v13 = vld [vmem:[%s11044_s15 + $0x127c] ss:$12 sps:$4 sm:$0xff]  }
 0x211   : > { %6747 = vmatprep.subr.bf16.mxu0 %v9747_v14  ;;  %v9808_v14 = vld [vmem:[%s11044_s15 + $0x660] ss:$12 sps:$4 sm:$0xff]  }
 0x213   : > { %6828 = vmatpush1.bf16.msra.mxu1 %v9742_v16  ;;  %v9811_v16 = vld [vmem:[%s11044_s15 + $0x1278] ss:$12 sps:$4 sm:$0xff]  }
 0x214   : > { %6748 = vmatpush1.bf16.msra.mxu0 %v9745_v17  ;;  %6829 = vmatprep.subr.bf16.mxu1 %v9750_v18  ;;  %v9816_v17 = vld [vmem:[%s11044_s15 + $0x67c] ss:$12 sps:$4 sm:$0xff]   ;;  %v9819_v18 = vld [vmem:[%s11044_s15 + $0x1294] ss:$12 sps:$4 sm:$0xff]  }
 0x215   : > { %6749 = vmatprep.subr.bf16.mxu0 %v9753_v19  ;;  %v9814_v19 = vld [vmem:[%s11044_s15 + $0x678] ss:$12 sps:$4 sm:$0xff]  }
 0x217   : > { %6830 = vmatpush1.bf16.msra.mxu1 %v9748_v22  ;;  %v9817_v22 = vld [vmem:[%s11044_s15 + $0x1290] ss:$12 sps:$4 sm:$0xff]  }
 0x218   : > { %6750 = vmatpush1.bf16.msra.mxu0 %v9751_v24  ;;  %6831 = vmatprep.subr.bf16.mxu1 %v9756_v25  ;;  %v9822_v24 = vld [vmem:[%s11044_s15 + $0x694] ss:$12 sps:$4 sm:$0xff]   ;;  %v9825_v25 = vld [vmem:[%s11044_s15 + $0x12ac] ss:$12 sps:$4 sm:$0xff]  }
 0x219   : > { %6751 = vmatprep.subr.bf16.mxu0 %v9759_v26  ;;  %v9820_v26 = vld [vmem:[%s11044_s15 + $0x690] ss:$12 sps:$4 sm:$0xff]  }
 0x21b   : > { %6832 = vmatpush1.bf16.msra.mxu1 %v9754_v27  ;;  %v9823_v27 = vld [vmem:[%s11044_s15 + $0x12a8] ss:$12 sps:$4 sm:$0xff]  }
 0x21c   : > { %6752 = vmatpush1.bf16.msra.mxu0 %v9757_v33  ;;  %6833 = vmatprep.subr.bf16.mxu1 %v9762_v34  ;;  %v9828_v33 = vld [vmem:[%s11044_s15 + $0x6ac] ss:$12 sps:$4 sm:$0xff]   ;;  %v9829_v34 = vld [vmem:[%s11044_s15 + $0xc8] ss:$12 sps:$4 sm:$0xff]  }
 0x21d   : > { %6753 = vmatprep.subr.bf16.mxu0 %v9765_v35  ;;  %v8215_v35 = vld.sshfl [vmem:[#allocation2 + $0x18] sm:$0x1 pattern:$0x75316420] }
 0x21f   : > { %6834 = vmatpush1.bf16.msra.mxu1 %v9760_v36  ;;  %v9826_v36 = vld [vmem:[%s11044_s15 + $0x6a8] ss:$12 sps:$4 sm:$0xff]  }
 0x220   : > { %6754 = vmatpush1.bf16.msra.mxu0 %v9763_v37  ;;  %6835 = vmatprep.subr.bf16.mxu1 %v9768_v39  ;;  %v11547_v37 = vrot.slane %v8215_v35, %v11357_v42  ;;  %v9830_v39 = vld [vmem:[%s11044_s15 + $0x8] ss:$12 sps:$4 sm:$0xff]  }
 0x221   : > { %6755 = vmatprep.subr.bf16.mxu0 %v9771_v40  ;;  %v9833_v40 = vld [vmem:[%s11044_s15 + $0x6c4] ss:$12 sps:$4 sm:$0xff]   ;;  %v9889_v35 = vld [vmem:[%s11044_s15 + $0x2a8] ss:$12 sps:$4 sm:$0xff]  }
 0x223   : > { %6836 = vmatpush1.bf16.msra.mxu1 %v9766_v41  ;;  %v9834_v41 = vld [vmem:[%s11044_s15 + $0xe0] ss:$12 sps:$4 sm:$0xff]  }
 0x224   : > { %6756 = vmatpush1.bf16.msra.mxu0 %v9769_v43  ;;  %6837 = vmatprep.subr.bf16.mxu1 %v9774_v44  ;;  %v9831_v43 = vld [vmem:[%s11044_s15 + $0x6c0] ss:$12 sps:$4 sm:$0xff]  }
 0x225   : > { %6757 = vmatprep.subr.bf16.mxu0 %v9777_v30  ;;  %v9835_v44 = vld [vmem:[%s11044_s15 + $0x20] ss:$12 sps:$4 sm:$0xff]   ;;  %v9838_v30 = vld [vmem:[%s11044_s15 + $0x6dc] ss:$12 sps:$4 sm:$0xff]  }
 0x227   : > { %6838 = vmatpush1.bf16.msra.mxu1 %v9772_v45  ;;  %v9839_v45 = vld [vmem:[%s11044_s15 + $0xf8] ss:$12 sps:$4 sm:$0xff]  }
 0x228   : > { %6758 = vmatpush1.bf16.msra.mxu0 %v9775_v46  ;;  %6839 = vmatprep.subr.bf16.mxu1 %v9780_v47  ;;  %v9836_v46 = vld [vmem:[%s11044_s15 + $0x6d8] ss:$12 sps:$4 sm:$0xff]  }
 0x229   : > { %7178 = vmatprep.subr.bf16.mxu0 %v9783_v48  ;;  %v9840_v47 = vld [vmem:[%s11044_s15 + $0x38] ss:$12 sps:$4 sm:$0xff]   ;;  %v9843_v48 = vld [vmem:[%s11044_s15 + $0x6f4] ss:$12 sps:$4 sm:$0xff]  }
 0x22b   : > { %6840 = vmatpush1.bf16.msra.mxu1 %v9778_v49  ;;  %6760 = vmatmul.mubr.bf16.vlgmr.msra.gmra.mrb[28].mxu0 %v11505_v54  ;;  %v9844_v49 = vld [vmem:[%s11044_s15 + $0x110] ss:$12 sps:$4 sm:$0xff]  }
 0x22c   : > { %7179 = vmatpush1.bf16.msra.mxu0 %v9781_v50  ;;  %6850 = vmatprep.subr.bf16.mxu1 %v9786_v52  ;;  %v9841_v50 = vld [vmem:[%s11044_s15 + $0x6f0] ss:$12 sps:$4 sm:$0xff]   ;;  %v9849_v52 = vld [vmem:[%s11044_s15 + $0x128] ss:$12 sps:$4 sm:$0xff]  }
 0x22d   : > { %7180 = vmatprep.subr.bf16.mxu0 %v9789_v53  ;;  %7210 = vmatprep.mubr.bf16.mxu0 %v10692_v61  ;;  %v9846_v53 = vld [vmem:[%s11044_s15 + $0x708] ss:$12 sps:$4 sm:$0xff]   ;;  %v9855_v61 = vld [vmem:[%s11044_s15 + $0x80] ss:$12 sps:$4 sm:$0xff]  }
 0x22e   : > { %6842 = vmatmul.mubr.bf16.vlgmr.msra.gmra.mrb[24].mxu1 %v11515_v23 }
 0x22f   : > { %6851 = vmatpush1.bf16.msra.mxu1 %v9784_v56  ;;  %6882 = vmatprep.mubr.bf16.mxu1 %v11511_v58  ;;  %v9850_v56 = vld [vmem:[%s11044_s15 + $0x68] ss:$12 sps:$4 sm:$0xff]  }
 0x230   : > { %7181 = vmatpush1.bf16.msra.mxu0 %v9787_v57  ;;  %6852 = vmatprep.subr.bf16.mxu1 %v9792_v59  ;;  %v9853_v57 = vld [vmem:[%s11044_s15 + $0x724] ss:$12 sps:$4 sm:$0xff]   ;;  %v9854_v59 = vld [vmem:[%s11044_s15 + $0x140] ss:$12 sps:$4 sm:$0xff]  }
 0x231   : > { %7182 = vmatprep.subr.bf16.mxu0 %v9795_v60  ;;  %v9851_v60 = vld [vmem:[%s11044_s15 + $0x720] ss:$12 sps:$4 sm:$0xff]  }
 0x233   : > { %6853 = vmatpush1.bf16.msra.mxu1 %v9790_v62  ;;  %v9858_v62 = vld [vmem:[%s11044_s15 + $0x73c] ss:$12 sps:$4 sm:$0xff]  }
 0x234   : > { %7183 = vmatpush1.bf16.msra.mxu0 %v9793_v63  ;;  %6854 = vmatprep.subr.bf16.mxu1 %v9798_v1  ;;  %v9859_v63 = vld [vmem:[%s11044_s15 + $0x158] ss:$12 sps:$4 sm:$0xff]  }
 0x235   : > { %7184 = vmatprep.subr.bf16.mxu0 %v9801_v2  ;;  %v9856_v1 = vld [vmem:[%s11044_s15 + $0x738] ss:$12 sps:$4 sm:$0xff]  }
 0x236   : > { %v9860_v2 = vld [vmem:[%s11044_s15 + $0x98] ss:$12 sps:$4 sm:$0xff]  }
 0x237   : > { %6855 = vmatpush1.bf16.msra.mxu1 %v9796_v3  ;;  %v9863_v3 = vld [vmem:[%s11044_s15 + $0x754] ss:$12 sps:$4 sm:$0xff]  }
 0x238   : > { %7185 = vmatpush1.bf16.msra.mxu0 %v9799_v4  ;;  %6856 = vmatprep.subr.bf16.mxu1 %v9804_v5  ;;  %v9864_v4 = vld [vmem:[%s11044_s15 + $0x170] ss:$12 sps:$4 sm:$0xff]  }
 0x239   : > { %7186 = vmatprep.subr.bf16.mxu0 %v9807_v6  ;;  %v9861_v5 = vld [vmem:[%s11044_s15 + $0x750] ss:$12 sps:$4 sm:$0xff]  }
 0x23a   : > { %v9865_v6 = vld [vmem:[%s11044_s15 + $0xb0] ss:$12 sps:$4 sm:$0xff]  }
 0x23b   : > { %6857 = vmatpush1.bf16.msra.mxu1 %v9802_v7  ;;  %v9868_v7 = vld [vmem:[%s11044_s15 + $0x76c] ss:$12 sps:$4 sm:$0xff]  }
 0x23c   : > { %7187 = vmatpush1.bf16.msra.mxu0 %v9805_v8  ;;  %6858 = vmatprep.subr.bf16.mxu1 %v9810_v9  ;;  %v9869_v8 = vld [vmem:[%s11044_s15 + $0x248] ss:$12 sps:$4 sm:$0xff]  }
 0x23d   : > { %7188 = vmatprep.subr.bf16.mxu0 %v9813_v13  ;;  %v9866_v9 = vld [vmem:[%s11044_s15 + $0x768] ss:$12 sps:$4 sm:$0xff]  }
 0x23e   : > { %v9870_v13 = vld [vmem:[%s11044_s15 + $0x188] ss:$12 sps:$4 sm:$0xff]  }
 0x23f   : > { %6859 = vmatpush1.bf16.msra.mxu1 %v9808_v14  ;;  %v9873_v14 = vld [vmem:[%s11044_s15 + $0x784] ss:$12 sps:$4 sm:$0xff]  }
 0x240   : > { %7189 = vmatpush1.bf16.msra.mxu0 %v9811_v16  ;;  %6860 = vmatprep.subr.bf16.mxu1 %v9816_v17  ;;  %v9874_v16 = vld [vmem:[%s11044_s15 + $0x260] ss:$12 sps:$4 sm:$0xff]  }
 0x241   : > { %7190 = vmatprep.subr.bf16.mxu0 %v9819_v18  ;;  %v9871_v17 = vld [vmem:[%s11044_s15 + $0x780] ss:$12 sps:$4 sm:$0xff]  }
 0x242   : > { %v9875_v18 = vld [vmem:[%s11044_s15 + $0x1a0] ss:$12 sps:$4 sm:$0xff]  }
 0x243   : > { %6861 = vmatpush1.bf16.msra.mxu1 %v9814_v19  ;;  %v9878_v19 = vld [vmem:[%s11044_s15 + $0x79c] ss:$12 sps:$4 sm:$0xff]  }
 0x244   : > { %7191 = vmatpush1.bf16.msra.mxu0 %v9817_v22  ;;  %6862 = vmatprep.subr.bf16.mxu1 %v9822_v24  ;;  %v11593_v22 = vcombine.high %v11511_v58, %v11511_v58  ;;  %v9879_v24 = vld [vmem:[%s11044_s15 + $0x278] ss:$12 sps:$4 sm:$0xff]  }
 0x245   : > { %7192 = vmatprep.subr.bf16.mxu0 %v9825_v25  ;;  %v9883_v25 = vld [vmem:[%s11044_s15 + $0x7b4] ss:$12 sps:$4 sm:$0xff]  }
 0x247   : > { %6863 = vmatpush1.bf16.msra.mxu1 %v9820_v26  ;;  %v9884_v26 = vld [vmem:[%s11044_s15 + $0x290] ss:$12 sps:$4 sm:$0xff]  }
 0x248   : > { %7193 = vmatpush1.bf16.msra.mxu0 %v9823_v27  ;;  %6864 = vmatprep.subr.bf16.mxu1 %v9828_v33  ;;  %v9881_v27 = vld [vmem:[%s11044_s15 + $0x7b0] ss:$12 sps:$4 sm:$0xff]  }
 0x249   : > { %8874 = vmatprep.subr.bf16.mxu0 %v9829_v34  ;;  %v9885_v33 = vld [vmem:[%s11044_s15 + $0x1d0] ss:$12 sps:$4 sm:$0xff]   ;;  %v9888_v34 = vld [vmem:[%s11044_s15 + $0x7cc] ss:$12 sps:$4 sm:$0xff]  }
 0x24b   : > { %6865 = vmatpush1.bf16.msra.mxu1 %v9826_v36  ;;  %7211 = vmatmul.mubr.bf16.vlgmr.msra.gmra.mrb[32].mxu0 %v11547_v37  ;;  %v9886_v36 = vld [vmem:[%s11044_s15 + $0x7c8] ss:$12 sps:$4 sm:$0xff]  }
 0x24c   : > { %8875 = vmatpush3.bf16.msra.mxu0 %v9830_v39  ;;  %7251 = vmatprep.mubr.bf16.mxu0 %v11370_v10  ;;  %v9845_v10 = vld [vmem:[%s11044_s15 + $0x50] ss:$12 sps:$4 sm:$0xff]   ;;  %v9890_v39 = vld [vmem:[%s11044_s15 + $0x1e8] ss:$12 sps:$4 sm:$0xff]  }
 0x24d   : > { %6866 = vmatprep.subr.bf16.mxu1 %v9833_v40  ;;  %8876 = vmatprep.subr.bf16.mxu0 %v9834_v41  ;;  %v9893_v40 = vld [vmem:[%s11044_s15 + $0x7e4] ss:$12 sps:$4 sm:$0xff]   ;;  %v9894_v41 = vld [vmem:[%s11044_s15 + $0x2c0] ss:$12 sps:$4 sm:$0xff]  }
 0x24f   : > { %6867 = vmatpush1.bf16.msra.mxu1 %v9831_v43  ;;  %v9891_v43 = vld [vmem:[%s11044_s15 + $0x7e0] ss:$12 sps:$4 sm:$0xff]  }
 0x250   : > { %8877 = vmatpush3.bf16.msra.mxu0 %v9835_v44  ;;  %6868 = vmatprep.subr.bf16.mxu1 %v9838_v30  ;;  %v9895_v44 = vld [vmem:[%s11044_s15 + $0x200] ss:$12 sps:$4 sm:$0xff]   ;;  %v9898_v30 = vld [vmem:[%s11044_s15 + $0x7fc] ss:$12 sps:$4 sm:$0xff]  }
 0x251   : > { %8878 = vmatprep.subr.bf16.mxu0 %v9839_v45  ;;  %v9899_v45 = vld [vmem:[%s11044_s15 + $0x2d8] ss:$12 sps:$4 sm:$0xff]  }
 0x253   : > { %6869 = vmatpush1.bf16.msra.mxu1 %v9836_v46  ;;  %v9896_v46 = vld [vmem:[%s11044_s15 + $0x7f8] ss:$12 sps:$4 sm:$0xff]  }
 0x254   : > { %8879 = vmatpush3.bf16.msra.mxu0 %v9840_v47  ;;  %6870 = vmatprep.subr.bf16.mxu1 %v9843_v48  ;;  %v9900_v47 = vld [vmem:[%s11044_s15 + $0x218] ss:$12 sps:$4 sm:$0xff]   ;;  %v9903_v48 = vld [vmem:[%s11044_s15 + $0x814] ss:$12 sps:$4 sm:$0xff]  }
 0x255   : > { %8880 = vmatprep.subr.bf16.mxu0 %v9844_v49  ;;  %v9904_v49 = vld [vmem:[%s11044_s15 + $0x2f0] ss:$12 sps:$4 sm:$0xff]  }
 0x257   : > { %6871 = vmatpush1.bf16.msra.mxu1 %v9841_v50  ;;  %v9901_v50 = vld [vmem:[%s11044_s15 + $0x810] ss:$12 sps:$4 sm:$0xff]  }
 0x258   : > { %8881 = vmatpush3.bf16.msra.mxu0 %v9845_v10  ;;  %6872 = vmatprep.subr.bf16.mxu1 %v9848_v51  ;;  %v9905_v10 = vld [vmem:[%s11044_s15 + $0x230] ss:$12 sps:$4 sm:$0xff]   ;;  %v9908_v51 = vld [vmem:[%s11044_s15 + $0x82c] ss:$12 sps:$4 sm:$0xff]  }
 0x259   : > { %8882 = vmatprep.subr.bf16.mxu0 %v9849_v52  ;;  %v9909_v52 = vld [vmem:[%s11044_s15 + $0x3c8] ss:$12 sps:$4 sm:$0xff]  }
 0x25b   : > { %6873 = vmatpush1.bf16.msra.mxu1 %v9846_v53  ;;  %v9906_v53 = vld [vmem:[%s11044_s15 + $0x828] ss:$12 sps:$4 sm:$0xff]  }
 0x25c   : > { %8883 = vmatpush3.bf16.msra.mxu0 %v9850_v56  ;;  %6874 = vmatprep.subr.bf16.mxu1 %v9853_v57  ;;  %v9910_v56 = vld [vmem:[%s11044_s15 + $0x308] ss:$12 sps:$4 sm:$0xff]   ;;  %v9913_v57 = vld [vmem:[%s11044_s15 + $0x844] ss:$12 sps:$4 sm:$0xff]  }
 0x25d   : > { %8884 = vmatprep.subr.bf16.mxu0 %v9854_v59  ;;  %v9914_v59 = vld [vmem:[%s11044_s15 + $0x3e0] ss:$12 sps:$4 sm:$0xff]  }
 0x25f   : > { %6875 = vmatpush1.bf16.msra.mxu1 %v9851_v60  ;;  %v9911_v60 = vld [vmem:[%s11044_s15 + $0x840] ss:$12 sps:$4 sm:$0xff]  }
 0x260   : > { %8885 = vmatpush3.bf16.msra.mxu0 %v9855_v61  ;;  %6876 = vmatprep.subr.bf16.mxu1 %v9858_v62  ;;  %v9915_v61 = vld [vmem:[%s11044_s15 + $0x320] ss:$12 sps:$4 sm:$0xff]   ;;  %v9918_v62 = vld [vmem:[%s11044_s15 + $0x85c] ss:$12 sps:$4 sm:$0xff]  }
 0x261   : > { %8886 = vmatprep.subr.bf16.mxu0 %v9859_v63  ;;  %v9919_v63 = vld [vmem:[%s11044_s15 + $0x3f8] ss:$12 sps:$4 sm:$0xff]  }
 0x263   : > { %6877 = vmatpush1.bf16.msra.mxu1 %v9856_v1  ;;  %v9916_v1 = vld [vmem:[%s11044_s15 + $0x858] ss:$12 sps:$4 sm:$0xff]  }
 0x264   : > { %8887 = vmatpush3.bf16.msra.mxu0 %v9860_v2  ;;  %6878 = vmatprep.subr.bf16.mxu1 %v9863_v3  ;;  %v9923_v2 = vld [vmem:[%s11044_s15 + $0x874] ss:$12 sps:$4 sm:$0xff]   ;;  %v9924_v3 = vld [vmem:[%s11044_s15 + $0x410] ss:$12 sps:$4 sm:$0xff]  }
 0x265   : > { %8888 = vmatprep.subr.bf16.mxu0 %v9864_v4  ;;  %v9925_v4 = vld [vmem:[%s11044_s15 + $0x350] ss:$12 sps:$4 sm:$0xff]  }
 0x267   : > { %6879 = vmatpush1.bf16.msra.mxu1 %v9861_v5  ;;  %v9928_v5 = vld [vmem:[%s11044_s15 + $0x88c] ss:$12 sps:$4 sm:$0xff]  }
 0x268   : > { %8889 = vmatpush3.bf16.msra.mxu0 %v9865_v6  ;;  %6880 = vmatprep.subr.bf16.mxu1 %v9868_v7  ;;  %v9929_v6 = vld [vmem:[%s11044_s15 + $0x428] ss:$12 sps:$4 sm:$0xff]  }
 0x269   : > { %8896 = vmatprep.subr.bf16.mxu0 %v9869_v8  ;;  %v9926_v7 = vld [vmem:[%s11044_s15 + $0x888] ss:$12 sps:$4 sm:$0xff]  }
 0x26a   : > { %v9930_v8 = vld [vmem:[%s11044_s15 + $0x368] ss:$12 sps:$4 sm:$0xff]  }
 0x26b   : > { %6881 = vmatpush1.bf16.msra.mxu1 %v9866_v9  ;;  %7252 = vmatmul.mubr.bf16.vlgmr.msra.gmra.mrb[36].mxu0 %v11374_v12  ;;  %v9876_v12 = vld [vmem:[%s11044_s15 + $0x798] ss:$12 sps:$4 sm:$0xff]  }
 0x26c   : > { %8897 = vmatpush3.bf16.msra.mxu0 %v9870_v13  ;;  %7291 = vmatprep.mubr.bf16.mxu0 %v11382_v20  ;;  %v9880_v20 = vld [vmem:[%s11044_s15 + $0x1b8] ss:$12 sps:$4 sm:$0xff]   ;;  %v9934_v13 = vld [vmem:[%s11044_s15 + $0x440] ss:$12 sps:$4 sm:$0xff]  }
 0x26d   : > { %6891 = vmatprep.subr.bf16.mxu1 %v9873_v14  ;;  %8898 = vmatprep.subr.bf16.mxu0 %v9874_v16  ;;  %v9933_v9 = vld [vmem:[%s11044_s15 + $0x8a4] ss:$12 sps:$4 sm:$0xff]   ;;  %v9931_v14 = vld [vmem:[%s11044_s15 + $0x8a0] ss:$12 sps:$4 sm:$0xff]  }
 0x26e   : > { %6883 = vmatmul.mubr.bf16.vlgmr.msra.gmra.mrb[24].mxu1 %v11435_v38  ;;  %v9935_v16 = vld [vmem:[%s11044_s15 + $0x380] ss:$12 sps:$4 sm:$0xff]  }
 0x26f   : > { %6892 = vmatpush1.bf16.msra.mxu1 %v9871_v17  ;;  %6923 = vmatprep.mubr.bf16.mxu1 %v11593_v22  ;;  %v9938_v17 = vld [vmem:[%s11044_s15 + $0x8bc] ss:$12 sps:$4 sm:$0xff]  }
 0x270   : > { %8899 = vmatpush3.bf16.msra.mxu0 %v9875_v18  ;;  %6893 = vmatprep.subr.bf16.mxu1 %v9878_v19  ;;  %v9939_v18 = vld [vmem:[%s11044_s15 + $0x458] ss:$12 sps:$4 sm:$0xff]  }
 0x271   : > { %8900 = vmatprep.subr.bf16.mxu0 %v9879_v24  ;;  %v9936_v19 = vld [vmem:[%s11044_s15 + $0x8b8] ss:$12 sps:$4 sm:$0xff]  }
 0x272   : > { %v9940_v24 = vld [vmem:[%s11044_s15 + $0x398] ss:$12 sps:$4 sm:$0xff]  }
 0x273   : > { %6894 = vmatpush1.bf16.msra.mxu1 %v9876_v12  ;;  %v9943_v12 = vld [vmem:[%s11044_s15 + $0x8d4] ss:$12 sps:$4 sm:$0xff]  }
 0x274   : > { %8901 = vmatpush3.bf16.msra.mxu0 %v9880_v20  ;;  %6895 = vmatprep.subr.bf16.mxu1 %v9883_v25  ;;  %v9944_v20 = vld [vmem:[%s11044_s15 + $0x470] ss:$12 sps:$4 sm:$0xff]  }
 0x275   : > { %8902 = vmatprep.subr.bf16.mxu0 %v9884_v26  ;;  %v9941_v25 = vld [vmem:[%s11044_s15 + $0x8d0] ss:$12 sps:$4 sm:$0xff]  }
 0x276   : > { %v9945_v26 = vld [vmem:[%s11044_s15 + $0x3b0] ss:$12 sps:$4 sm:$0xff]  }
 0x277   : > { %6896 = vmatpush1.bf16.msra.mxu1 %v9881_v27  ;;  %v9948_v27 = vld [vmem:[%s11044_s15 + $0x8ec] ss:$12 sps:$4 sm:$0xff]  }
 0x278   : > { %8903 = vmatpush3.bf16.msra.mxu0 %v9885_v33  ;;  %6897 = vmatprep.subr.bf16.mxu1 %v9888_v34  ;;  %v9949_v33 = vld [vmem:[%s11044_s15 + $0x548] ss:$12 sps:$4 sm:$0xff]  }
 0x279   : > { %8904 = vmatprep.subr.bf16.mxu0 %v9889_v35  ;;  %v9946_v34 = vld [vmem:[%s11044_s15 + $0x8e8] ss:$12 sps:$4 sm:$0xff]  }
 0x27a   : > { %v9950_v35 = vld [vmem:[%s11044_s15 + $0x488] ss:$12 sps:$4 sm:$0xff]  }
 0x27b   : > { %6898 = vmatpush1.bf16.msra.mxu1 %v9886_v36  ;;  %v9953_v36 = vld [vmem:[%s11044_s15 + $0x904] ss:$12 sps:$4 sm:$0xff]  }
 0x27c   : > { %8905 = vmatpush3.bf16.msra.mxu0 %v9890_v39  ;;  %6899 = vmatprep.subr.bf16.mxu1 %v9893_v40  ;;  %v9955_v39 = vld [vmem:[%s11044_s15 + $0x560] ss:$12 sps:$4 sm:$0xff]  }
 0x27d   : > { %8906 = vmatprep.subr.bf16.mxu0 %v9894_v41  ;;  %v9951_v40 = vld [vmem:[%s11044_s15 + $0x900] ss:$12 sps:$4 sm:$0xff]   ;;  %v11665_v41 = vcombine.high %v11435_v38, %v11435_v38 }
 0x27f   : > { %6900 = vmatpush1.bf16.msra.mxu1 %v9891_v43  ;;  %v9956_v43 = vld [vmem:[%s11044_s15 + $0x4a0] ss:$12 sps:$4 sm:$0xff]  }
 0x280   : > { %8907 = vmatpush3.bf16.msra.mxu0 %v9895_v44  ;;  %6901 = vmatprep.subr.bf16.mxu1 %v9898_v30  ;;  %v9959_v44 = vld [vmem:[%s11044_s15 + $0x91c] ss:$12 sps:$4 sm:$0xff]   ;;  %v9960_v30 = vld [vmem:[%s11044_s15 + $0x578] ss:$12 sps:$4 sm:$0xff]  }
 0x281   : > { %8908 = vmatprep.subr.bf16.mxu0 %v9899_v45  ;;  %v9964_v45 = vld [vmem:[%s11044_s15 + $0x934] ss:$12 sps:$4 sm:$0xff]  }
 0x283   : > { %6902 = vmatpush1.bf16.msra.mxu1 %v9896_v46  ;;  %v9965_v46 = vld [vmem:[%s11044_s15 + $0x590] ss:$12 sps:$4 sm:$0xff]  }
 0x284   : > { %8909 = vmatpush3.bf16.msra.mxu0 %v9900_v47  ;;  %6903 = vmatprep.subr.bf16.mxu1 %v9903_v48  ;;  %v9962_v47 = vld [vmem:[%s11044_s15 + $0x930] ss:$12 sps:$4 sm:$0xff]  }
 0x285   : > { %8910 = vmatprep.subr.bf16.mxu0 %v9904_v49  ;;  %v9966_v48 = vld [vmem:[%s11044_s15 + $0x4d0] ss:$12 sps:$4 sm:$0xff]   ;;  %v9969_v49 = vld [vmem:[%s11044_s15 + $0x94c] ss:$12 sps:$4 sm:$0xff]  }
 0x287   : > { %6904 = vmatpush1.bf16.msra.mxu1 %v9901_v50  ;;  %v9970_v50 = vld [vmem:[%s11044_s15 + $0x5a8] ss:$12 sps:$4 sm:$0xff]  }
 0x288   : > { %8911 = vmatpush3.bf16.msra.mxu0 %v9905_v10  ;;  %6905 = vmatprep.subr.bf16.mxu1 %v9908_v51  ;;  %v9967_v10 = vld [vmem:[%s11044_s15 + $0x948] ss:$12 sps:$4 sm:$0xff]  }
 0x289   : > { %8918 = vmatprep.subr.bf16.mxu0 %v9909_v52  ;;  %v9971_v51 = vld [vmem:[%s11044_s15 + $0x4e8] ss:$12 sps:$4 sm:$0xff]   ;;  %v9974_v52 = vld [vmem:[%s11044_s15 + $0x964] ss:$12 sps:$4 sm:$0xff]  }
 0x28b   : > { %6906 = vmatpush1.bf16.msra.mxu1 %v9906_v53  ;;  %7292 = vmatmul.mubr.bf16.vlgmr.msra.gmra.mrb[40].mxu0 %v11505_v54  ;;  %v9920_v54 = vld [vmem:[%s11044_s15 + $0x338] ss:$12 sps:$4 sm:$0xff]   ;;  %v9975_v53 = vld [vmem:[%s11044_s15 + $0x5c0] ss:$12 sps:$4 sm:$0xff]  }
 0x28c   : > { %8919 = vmatpush3.bf16.msra.mxu0 %v9910_v56  ;;  %7331 = vmatprep.mubr.bf16.mxu0 %v11385_v21  ;;  %v9921_v21 = vld [vmem:[%s11044_s15 + $0x870] ss:$12 sps:$4 sm:$0xff]   ;;  %v9972_v56 = vld [vmem:[%s11044_s15 + $0x960] ss:$12 sps:$4 sm:$0xff]  }
 0x28d   : > { %6907 = vmatprep.subr.bf16.mxu1 %v9913_v57  ;;  %8920 = vmatprep.subr.bf16.mxu0 %v9914_v59  ;;  %v9976_v57 = vld [vmem:[%s11044_s15 + $0x500] ss:$12 sps:$4 sm:$0xff]   ;;  %v9979_v59 = vld [vmem:[%s11044_s15 + $0x97c] ss:$12 sps:$4 sm:$0xff]  }
 0x28f   : > { %6908 = vmatpush1.bf16.msra.mxu1 %v9911_v60  ;;  %v9980_v60 = vld [vmem:[%s11044_s15 + $0x5d8] ss:$12 sps:$4 sm:$0xff]  }
 0x290   : > { %8921 = vmatpush3.bf16.msra.mxu0 %v9915_v61  ;;  %6909 = vmatprep.subr.bf16.mxu1 %v9918_v62  ;;  %v9977_v61 = vld [vmem:[%s11044_s15 + $0x978] ss:$12 sps:$4 sm:$0xff]  }
 0x291   : > { %8922 = vmatprep.subr.bf16.mxu0 %v9919_v63  ;;  %v9981_v62 = vld [vmem:[%s11044_s15 + $0x518] ss:$12 sps:$4 sm:$0xff]   ;;  %v9984_v63 = vld [vmem:[%s11044_s15 + $0x994] ss:$12 sps:$4 sm:$0xff]  }
 0x293   : > { %6910 = vmatpush1.bf16.msra.mxu1 %v9916_v1  ;;  %v9985_v1 = vld [vmem:[%s11044_s15 + $0x5f0] ss:$12 sps:$4 sm:$0xff]  }
 0x294   : > { %8923 = vmatpush3.bf16.msra.mxu0 %v9920_v54  ;;  %6911 = vmatprep.subr.bf16.mxu1 %v9923_v2  ;;  %v9982_v54 = vld [vmem:[%s11044_s15 + $0x990] ss:$12 sps:$4 sm:$0xff]  }
 0x295   : > { %8924 = vmatprep.subr.bf16.mxu0 %v9924_v3  ;;  %v9986_v2 = vld [vmem:[%s11044_s15 + $0x530] ss:$12 sps:$4 sm:$0xff]   ;;  %v9989_v3 = vld [vmem:[%s11044_s15 + $0x9ac] ss:$12 sps:$4 sm:$0xff]  }
 0x297   : > { %6912 = vmatpush1.bf16.msra.mxu1 %v9921_v21  ;;  %v9990_v21 = vld [vmem:[%s11044_s15 + $0x6c8] ss:$12 sps:$4 sm:$0xff]  }
 0x298   : > { %8925 = vmatpush3.bf16.msra.mxu0 %v9925_v4  ;;  %6913 = vmatprep.subr.bf16.mxu1 %v9928_v5  ;;  %v9987_v4 = vld [vmem:[%s11044_s15 + $0x9a8] ss:$12 sps:$4 sm:$0xff]  }
 0x299   : > { %8926 = vmatprep.subr.bf16.mxu0 %v9929_v6  ;;  %v9991_v5 = vld [vmem:[%s11044_s15 + $0x608] ss:$12 sps:$4 sm:$0xff]   ;;  %v9994_v6 = vld [vmem:[%s11044_s15 + $0x9c4] ss:$12 sps:$4 sm:$0xff]  }
 0x29b   : > { %6914 = vmatpush1.bf16.msra.mxu1 %v9926_v7  ;;  %v9995_v7 = vld [vmem:[%s11044_s15 + $0x6e0] ss:$12 sps:$4 sm:$0xff]  }
 0x29c   : > { %8927 = vmatpush3.bf16.msra.mxu0 %v9930_v8  ;;  %6915 = vmatprep.subr.bf16.mxu1 %v9933_v9  ;;  %v9992_v8 = vld [vmem:[%s11044_s15 + $0x9c0] ss:$12 sps:$4 sm:$0xff]  }
 0x29d   : > { %8928 = vmatprep.subr.bf16.mxu0 %v9934_v13  ;;  %v9996_v9 = vld [vmem:[%s11044_s15 + $0x620] ss:$12 sps:$4 sm:$0xff]   ;;  %v9999_v13 = vld [vmem:[%s11044_s15 + $0x9dc] ss:$12 sps:$4 sm:$0xff]  }
 0x29f   : > { %6916 = vmatpush1.bf16.msra.mxu1 %v9931_v14  ;;  %v10000_v14 = vld [vmem:[%s11044_s15 + $0x6f8] ss:$12 sps:$4 sm:$0xff]  }
 0x2a0   : > { %8929 = vmatpush3.bf16.msra.mxu0 %v9935_v16  ;;  %6917 = vmatprep.subr.bf16.mxu1 %v9938_v17  ;;  %v9997_v16 = vld [vmem:[%s11044_s15 + $0x9d8] ss:$12 sps:$4 sm:$0xff]   ;;  %v10004_v17 = vld [vmem:[%s11044_s15 + $0x9f4] ss:$12 sps:$4 sm:$0xff]  }
 0x2a1   : > { %8930 = vmatprep.subr.bf16.mxu0 %v9939_v18  ;;  %v10005_v18 = vld [vmem:[%s11044_s15 + $0x710] ss:$12 sps:$4 sm:$0xff]  }
 0x2a3   : > { %6918 = vmatpush1.bf16.msra.mxu1 %v9936_v19  ;;  %v10006_v19 = vld [vmem:[%s11044_s15 + $0x650] ss:$12 sps:$4 sm:$0xff]  }
 0x2a4   : > { %8931 = vmatpush3.bf16.msra.mxu0 %v9940_v24  ;;  %6919 = vmatprep.subr.bf16.mxu1 %v9943_v12  ;;  %v10009_v24 = vld [vmem:[%s11044_s15 + $0xa0c] ss:$12 sps:$4 sm:$0xff]   ;;  %v10010_v12 = vld [vmem:[%s11044_s15 + $0x728] ss:$12 sps:$4 sm:$0xff]  }
 0x2a5   : > { %8932 = vmatprep.subr.bf16.mxu0 %v9944_v20  ;;  %v10007_v20 = vld [vmem:[%s11044_s15 + $0xa08] ss:$12 sps:$4 sm:$0xff]  }
 0x2a7   : > { %6920 = vmatpush1.bf16.msra.mxu1 %v9941_v25  ;;  %v10011_v25 = vld [vmem:[%s11044_s15 + $0x668] ss:$12 sps:$4 sm:$0xff]  }
 0x2a8   : > { %8933 = vmatpush3.bf16.msra.mxu0 %v9945_v26  ;;  %6921 = vmatprep.subr.bf16.mxu1 %v9948_v27  ;;  %v10014_v26 = vld [vmem:[%s11044_s15 + $0xa24] ss:$12 sps:$4 sm:$0xff]   ;;  %v10015_v27 = vld [vmem:[%s11044_s15 + $0x740] ss:$12 sps:$4 sm:$0xff]  }
 0x2a9   : > { %8940 = vmatprep.subr.bf16.mxu0 %v9949_v33  ;;  %v10012_v33 = vld [vmem:[%s11044_s15 + $0xa20] ss:$12 sps:$4 sm:$0xff]  }
 0x2ab   : > { %6922 = vmatpush1.bf16.msra.mxu1 %v9946_v34  ;;  %7332 = vmatmul.mubr.bf16.vlgmr.msra.gmra.mrb[44].mxu0 %v11393_v29  ;;  %v9957_v29 = vld [vmem:[%s11044_s15 + $0x918] ss:$12 sps:$4 sm:$0xff]   ;;  %v10016_v34 = vld [vmem:[%s11044_s15 + $0x680] ss:$12 sps:$4 sm:$0xff]  }
 0x2ac   : > { %8941 = vmatpush3.bf16.msra.mxu0 %v9950_v35  ;;  %7371 = vmatprep.mubr.bf16.mxu0 %v11397_v32  ;;  %v9961_v32 = vld [vmem:[%s11044_s15 + $0x4b8] ss:$12 sps:$4 sm:$0xff]   ;;  %v10019_v35 = vld [vmem:[%s11044_s15 + $0xa3c] ss:$12 sps:$4 sm:$0xff]  }
 0x2ad   : > { %6932 = vmatprep.subr.bf16.mxu1 %v9953_v36  ;;  %8942 = vmatprep.subr.bf16.mxu0 %v9955_v39  ;;  %v10020_v36 = vld [vmem:[%s11044_s15 + $0x758] ss:$12 sps:$4 sm:$0xff]  }
 0x2ae   : > { %6924 = vmatmul.mubr.bf16.vlgmr.msra.gmra.mrb[24].mxu1 %v11665_v41  ;;  %v10017_v39 = vld [vmem:[%s11044_s15 + $0xa38] ss:$12 sps:$4 sm:$0xff]  }
 0x2af   : > { %6933 = vmatpush1.bf16.msra.mxu1 %v9951_v40  ;;  %6964 = vmatprep.mubr.bf16.mxu1 %v11449_v55  ;;  %v10021_v40 = vld [vmem:[%s11044_s15 + $0x698] ss:$12 sps:$4 sm:$0xff]  }
 0x2b0   : > { %8943 = vmatpush3.bf16.msra.mxu0 %v9956_v43  ;;  %6934 = vmatprep.subr.bf16.mxu1 %v9959_v44  ;;  %v10024_v43 = vld [vmem:[%s11044_s15 + $0xa54] ss:$12 sps:$4 sm:$0xff]   ;;  %v10025_v44 = vld [vmem:[%s11044_s15 + $0x770] ss:$12 sps:$4 sm:$0xff]  }
 0x2b1   : > { %8944 = vmatprep.subr.bf16.mxu0 %v9960_v30  ;;  %v10022_v30 = vld [vmem:[%s11044_s15 + $0xa50] ss:$12 sps:$4 sm:$0xff]  }
 0x2b3   : > { %6935 = vmatpush1.bf16.msra.mxu1 %v9957_v29  ;;  %v10026_v29 = vld [vmem:[%s11044_s15 + $0x6b0] ss:$12 sps:$4 sm:$0xff]  }
 0x2b4   : > { %8945 = vmatpush3.bf16.msra.mxu0 %v9961_v32  ;;  %6936 = vmatprep.subr.bf16.mxu1 %v9964_v45  ;;  %v10029_v32 = vld [vmem:[%s11044_s15 + $0xa6c] ss:$12 sps:$4 sm:$0xff]   ;;  %v10030_v45 = vld [vmem:[%s11044_s15 + $0x848] ss:$12 sps:$4 sm:$0xff]  }
 0x2b5   : > { %8946 = vmatprep.subr.bf16.mxu0 %v9965_v46  ;;  %v10027_v46 = vld [vmem:[%s11044_s15 + $0xa68] ss:$12 sps:$4 sm:$0xff]  }
 0x2b7   : > { %6937 = vmatpush1.bf16.msra.mxu1 %v9962_v47  ;;  %v10031_v47 = vld [vmem:[%s11044_s15 + $0x788] ss:$12 sps:$4 sm:$0xff]  }
 0x2b8   : > { %8947 = vmatpush3.bf16.msra.mxu0 %v9966_v48  ;;  %6938 = vmatprep.subr.bf16.mxu1 %v9969_v49  ;;  %v10034_v48 = vld [vmem:[%s11044_s15 + $0xa84] ss:$12 sps:$4 sm:$0xff]   ;;  %v10035_v49 = vld [vmem:[%s11044_s15 + $0x860] ss:$12 sps:$4 sm:$0xff]  }
 0x2b9   : > { %8948 = vmatprep.subr.bf16.mxu0 %v9970_v50  ;;  %v10032_v50 = vld [vmem:[%s11044_s15 + $0xa80] ss:$12 sps:$4 sm:$0xff]  }
 0x2bb   : > { %6939 = vmatpush1.bf16.msra.mxu1 %v9967_v10  ;;  %v10036_v10 = vld [vmem:[%s11044_s15 + $0x7a0] ss:$12 sps:$4 sm:$0xff]  }
 0x2bc   : > { %8949 = vmatpush3.bf16.msra.mxu0 %v9971_v51  ;;  %6940 = vmatprep.subr.bf16.mxu1 %v9974_v52  ;;  %v10039_v51 = vld [vmem:[%s11044_s15 + $0xa9c] ss:$12 sps:$4 sm:$0xff]   ;;  %v11741_v52 = vcombine.high %v11449_v55, %v11449_v55 }
 0x2bd   : > { %8950 = vmatprep.subr.bf16.mxu0 %v9975_v53  ;;  %v10040_v53 = vld [vmem:[%s11044_s15 + $0x878] ss:$12 sps:$4 sm:$0xff]  }
 0x2bf   : > { %6941 = vmatpush1.bf16.msra.mxu1 %v9972_v56  ;;  %v10044_v56 = vld [vmem:[%s11044_s15 + $0xab4] ss:$12 sps:$4 sm:$0xff]  }
 0x2c0   : > { %8951 = vmatpush3.bf16.msra.mxu0 %v9976_v57  ;;  %6942 = vmatprep.subr.bf16.mxu1 %v9979_v59  ;;  %v10045_v57 = vld [vmem:[%s11044_s15 + $0x890] ss:$12 sps:$4 sm:$0xff]  }
 0x2c1   : > { %8952 = vmatprep.subr.bf16.mxu0 %v9980_v60  ;;  %v10042_v59 = vld [vmem:[%s11044_s15 + $0xab0] ss:$12 sps:$4 sm:$0xff]  }
 0x2c2   : > { %v10046_v60 = vld [vmem:[%s11044_s15 + $0x7d0] ss:$12 sps:$4 sm:$0xff]  }
 0x2c3   : > { %6943 = vmatpush1.bf16.msra.mxu1 %v9977_v61  ;;  %v10049_v61 = vld [vmem:[%s11044_s15 + $0xacc] ss:$12 sps:$4 sm:$0xff]  }
 0x2c4   : > { %8953 = vmatpush3.bf16.msra.mxu0 %v9981_v62  ;;  %6944 = vmatprep.subr.bf16.mxu1 %v9984_v63  ;;  %v10050_v62 = vld [vmem:[%s11044_s15 + $0x8a8] ss:$12 sps:$4 sm:$0xff]  }
 0x2c5   : > { %8954 = vmatprep.subr.bf16.mxu0 %v9985_v1  ;;  %v10047_v63 = vld [vmem:[%s11044_s15 + $0xac8] ss:$12 sps:$4 sm:$0xff]  }
 0x2c6   : > { %v10051_v1 = vld [vmem:[%s11044_s15 + $0x7e8] ss:$12 sps:$4 sm:$0xff]  }
 0x2c7   : > { %6945 = vmatpush1.bf16.msra.mxu1 %v9982_v54  ;;  %v10054_v54 = vld [vmem:[%s11044_s15 + $0xae4] ss:$12 sps:$4 sm:$0xff]  }
 0x2c8   : > { %8955 = vmatpush3.bf16.msra.mxu0 %v9986_v2  ;;  %6946 = vmatprep.subr.bf16.mxu1 %v9989_v3  ;;  %v10055_v2 = vld [vmem:[%s11044_s15 + $0x8c0] ss:$12 sps:$4 sm:$0xff]  }
 0x2c9   : > { %8962 = vmatprep.subr.bf16.mxu0 %v9990_v21  ;;  %v10052_v3 = vld [vmem:[%s11044_s15 + $0xae0] ss:$12 sps:$4 sm:$0xff]  }
 0x2ca   : > { %v10056_v21 = vld [vmem:[%s11044_s15 + $0x800] ss:$12 sps:$4 sm:$0xff]  }
 0x2cb   : > { %6947 = vmatpush1.bf16.msra.mxu1 %v9987_v4  ;;  %7372 = vmatmul.mubr.bf16.vlgmr.msra.gmra.mrb[48].mxu0 %v11515_v23  ;;  %v10001_v23 = vld [vmem:[%s11044_s15 + $0x638] ss:$12 sps:$4 sm:$0xff]   ;;  %v10059_v4 = vld [vmem:[%s11044_s15 + $0xafc] ss:$12 sps:$4 sm:$0xff]  }
 0x2cc   : > { %8963 = vmatpush3.bf16.msra.mxu0 %v9991_v5  ;;  %7411 = vmatprep.mubr.bf16.mxu0 %v11511_v58  ;;  %v10002_v58 = vld [vmem:[%s11044_s15 + $0x9f0] ss:$12 sps:$4 sm:$0xff]   ;;  %v10060_v5 = vld [vmem:[%s11044_s15 + $0x8d8] ss:$12 sps:$4 sm:$0xff]  }
 0x2cd   : > { %6948 = vmatprep.subr.bf16.mxu1 %v9994_v6  ;;  %8964 = vmatprep.subr.bf16.mxu0 %v9995_v7 }
 0x2cf   : > { %6949 = vmatpush1.bf16.msra.mxu1 %v9992_v8  ;;  %v10057_v8 = vld [vmem:[%s11044_s15 + $0xaf8] ss:$12 sps:$4 sm:$0xff]  }
 0x2d0   : > { %8965 = vmatpush3.bf16.msra.mxu0 %v9996_v9  ;;  %6950 = vmatprep.subr.bf16.mxu1 %v9999_v13  ;;  %v10061_v13 = vld [vmem:[%s11044_s15 + $0x818] ss:$12 sps:$4 sm:$0xff]  }
 0x2d1   : > { %8966 = vmatprep.subr.bf16.mxu0 %v10000_v14  ;;  %v10064_v14 = vld [vmem:[%s11044_s15 + $0xb14] ss:$12 sps:$4 sm:$0xff]  }
 0x2d3   : > { %6951 = vmatpush1.bf16.msra.mxu1 %v9997_v16 }
 0x2d4   : > { %8967 = vmatpush3.bf16.msra.mxu0 %v10001_v23  ;;  %6952 = vmatprep.subr.bf16.mxu1 %v10004_v17  ;;  %v10065_v23 = vld [vmem:[%s11044_s15 + $0x8f0] ss:$12 sps:$4 sm:$0xff]  }
 0x2d5   : > { %8968 = vmatprep.subr.bf16.mxu0 %v10005_v18  ;;  %v10062_v17 = vld [vmem:[%s11044_s15 + $0xb10] ss:$12 sps:$4 sm:$0xff]  }
 0x2d6   : > { %v10066_v18 = vld [vmem:[%s11044_s15 + $0x830] ss:$12 sps:$4 sm:$0xff]  }
 0x2d7   : > { %6953 = vmatpush1.bf16.msra.mxu1 %v10002_v58  ;;  %v10069_v58 = vld [vmem:[%s11044_s15 + $0xb2c] ss:$12 sps:$4 sm:$0xff]  }
 0x2d8   : > { %8969 = vmatpush3.bf16.msra.mxu0 %v10006_v19  ;;  %6954 = vmatprep.subr.bf16.mxu1 %v10009_v24  ;;  %v10070_v19 = vld [vmem:[%s11044_s15 + $0x9c8] ss:$12 sps:$4 sm:$0xff]  }
 0x2d9   : > { %8970 = vmatprep.subr.bf16.mxu0 %v10010_v12  ;;  %v10067_v24 = vld [vmem:[%s11044_s15 + $0xb28] ss:$12 sps:$4 sm:$0xff]  }
 0x2da   : > { %v10071_v12 = vld [vmem:[%s11044_s15 + $0x908] ss:$12 sps:$4 sm:$0xff]  }
 0x2db   : > { %6955 = vmatpush1.bf16.msra.mxu1 %v10007_v20  ;;  %v10074_v20 = vld [vmem:[%s11044_s15 + $0xb44] ss:$12 sps:$4 sm:$0xff]  }
 0x2dc   : > { %8971 = vmatpush3.bf16.msra.mxu0 %v10011_v25  ;;  %6956 = vmatprep.subr.bf16.mxu1 %v10014_v26  ;;  %v10075_v25 = vld [vmem:[%s11044_s15 + $0x9e0] ss:$12 sps:$4 sm:$0xff]  }
 0x2dd   : > { %8972 = vmatprep.subr.bf16.mxu0 %v10015_v27  ;;  %v10072_v26 = vld [vmem:[%s11044_s15 + $0xb40] ss:$12 sps:$4 sm:$0xff]  }
 0x2de   : > { %v10076_v27 = vld [vmem:[%s11044_s15 + $0x920] ss:$12 sps:$4 sm:$0xff]  }
 0x2df   : > { %6957 = vmatpush1.bf16.msra.mxu1 %v10012_v33  ;;  %v10079_v33 = vld [vmem:[%s11044_s15 + $0xb5c] ss:$12 sps:$4 sm:$0xff]  }
 0x2e0   : > { %8973 = vmatpush3.bf16.msra.mxu0 %v10016_v34  ;;  %6958 = vmatprep.subr.bf16.mxu1 %v10019_v35  ;;  %v10080_v34 = vld [vmem:[%s11044_s15 + $0x9f8] ss:$12 sps:$4 sm:$0xff]  }
 0x2e1   : > { %8974 = vmatprep.subr.bf16.mxu0 %v10020_v36  ;;  %v10077_v35 = vld [vmem:[%s11044_s15 + $0xb58] ss:$12 sps:$4 sm:$0xff]   ;;  %v10084_v36 = vld [vmem:[%s11044_s15 + $0xb74] ss:$12 sps:$4 sm:$0xff]  }
 0x2e3   : > { %6959 = vmatpush1.bf16.msra.mxu1 %v10017_v39  ;;  %v10085_v39 = vld [vmem:[%s11044_s15 + $0xa10] ss:$12 sps:$4 sm:$0xff]  }
 0x2e4   : > { %8975 = vmatpush3.bf16.msra.mxu0 %v10021_v40  ;;  %6960 = vmatprep.subr.bf16.mxu1 %v10024_v43  ;;  %v10086_v40 = vld [vmem:[%s11044_s15 + $0x950] ss:$12 sps:$4 sm:$0xff]   ;;  %v10089_v43 = vld [vmem:[%s11044_s15 + $0xb8c] ss:$12 sps:$4 sm:$0xff]  }
 0x2e5   : > { %8976 = vmatprep.subr.bf16.mxu0 %v10025_v44  ;;  %v10090_v44 = vld [vmem:[%s11044_s15 + $0xa28] ss:$12 sps:$4 sm:$0xff]  }
 0x2e7   : > { %6961 = vmatpush1.bf16.msra.mxu1 %v10022_v30  ;;  %v10087_v30 = vld [vmem:[%s11044_s15 + $0xb88] ss:$12 sps:$4 sm:$0xff]  }
 0x2e8   : > { %8977 = vmatpush3.bf16.msra.mxu0 %v10026_v29  ;;  %6962 = vmatprep.subr.bf16.mxu1 %v10029_v32  ;;  %v10091_v29 = vld [vmem:[%s11044_s15 + $0x968] ss:$12 sps:$4 sm:$0xff]   ;;  %v10094_v32 = vld [vmem:[%s11044_s15 + $0xba4] ss:$12 sps:$4 sm:$0xff]  }
 0x2e9   : > { %8984 = vmatprep.subr.bf16.mxu0 %v10030_v45  ;;  %v10095_v45 = vld [vmem:[%s11044_s15 + $0xa40] ss:$12 sps:$4 sm:$0xff]  }
 0x2eb   : > { %6963 = vmatpush1.bf16.msra.mxu1 %v10027_v46  ;;  %7412 = vmatmul.mubr.bf16.vlgmr.msra.gmra.mrb[52].mxu0 %v11435_v38  ;;  %v10037_v38 = vld [vmem:[%s11044_s15 + $0xa98] ss:$12 sps:$4 sm:$0xff]   ;;  %v10092_v46 = vld [vmem:[%s11044_s15 + $0xba0] ss:$12 sps:$4 sm:$0xff]  }
 0x2ec   : > { %8985 = vmatpush3.bf16.msra.mxu0 %v10031_v47  ;;  %7451 = vmatprep.mubr.bf16.mxu0 %v11593_v22  ;;  %v10041_v22 = vld [vmem:[%s11044_s15 + $0x7b8] ss:$12 sps:$4 sm:$0xff]   ;;  %v10096_v47 = vld [vmem:[%s11044_s15 + $0x980] ss:$12 sps:$4 sm:$0xff]  }
 0x2ed   : > { %6973 = vmatprep.subr.bf16.mxu1 %v10034_v48  ;;  %8986 = vmatprep.subr.bf16.mxu0 %v10035_v49  ;;  %v10099_v48 = vld [vmem:[%s11044_s15 + $0xbbc] ss:$12 sps:$4 sm:$0xff]   ;;  %v10100_v49 = vld [vmem:[%s11044_s15 + $0xa58] ss:$12 sps:$4 sm:$0xff]  }
 0x2ee   : > { %6965 = vmatmul.mubr.bf16.vlgmr.msra.gmra.mrb[24].mxu1 %v11445_v31 }
 0x2ef   : > { %6974 = vmatpush1.bf16.msra.mxu1 %v10032_v50  ;;  %7005 = vmatprep.mubr.bf16.mxu1 %v11741_v52 }
 0x2f0   : > { %8987 = vmatpush3.bf16.msra.mxu0 %v10036_v10  ;;  %6975 = vmatprep.subr.bf16.mxu1 %v10039_v51  ;;  %v10097_v10 = vld [vmem:[%s11044_s15 + $0xbb8] ss:$12 sps:$4 sm:$0xff]  }
 0x2f1   : > { %8988 = vmatprep.subr.bf16.mxu0 %v10040_v53  ;;  %v10101_v53 = vld [vmem:[%s11044_s15 + $0x998] ss:$12 sps:$4 sm:$0xff]  }
 0x2f3   : > { %6976 = vmatpush1.bf16.msra.mxu1 %v10037_v38  ;;  %v10104_v38 = vld [vmem:[%s11044_s15 + $0xbd4] ss:$12 sps:$4 sm:$0xff]  }
 0x2f4   : > { %8989 = vmatpush3.bf16.msra.mxu0 %v10041_v22  ;;  %6977 = vmatprep.subr.bf16.mxu1 %v10044_v56  ;;  %v10105_v56 = vld [vmem:[%s11044_s15 + $0xa70] ss:$12 sps:$4 sm:$0xff]  }
 0x2f5   : > { %8990 = vmatprep.subr.bf16.mxu0 %v10045_v57 }
 0x2f7   : > { %6978 = vmatpush1.bf16.msra.mxu1 %v10042_v59  ;;  %v10102_v59 = vld [vmem:[%s11044_s15 + $0xbd0] ss:$12 sps:$4 sm:$0xff]  }
 0x2f8   : > { %8991 = vmatpush3.bf16.msra.mxu0 %v10046_v60  ;;  %6979 = vmatprep.subr.bf16.mxu1 %v10049_v61  ;;  %v10106_v60 = vld [vmem:[%s11044_s15 + $0x9b0] ss:$12 sps:$4 sm:$0xff]   ;;  %v10109_v61 = vld [vmem:[%s11044_s15 + $0xbec] ss:$12 sps:$4 sm:$0xff]  }
 0x2f9   : > { %8992 = vmatprep.subr.bf16.mxu0 %v10050_v62  ;;  %v10110_v62 = vld [vmem:[%s11044_s15 + $0xb48] ss:$12 sps:$4 sm:$0xff]  }
 0x2fb   : > { %6980 = vmatpush1.bf16.msra.mxu1 %v10047_v63  ;;  %v11812_v63 = vld.sshfl [vmem:[#allocation2 + $0x10] sm:$0xff pattern:$0x75316420] }
 0x2fc   : > { %8993 = vmatpush3.bf16.msra.mxu0 %v10051_v1  ;;  %6981 = vmatprep.subr.bf16.mxu1 %v10054_v54  ;;  %v10107_v1 = vld [vmem:[%s11044_s15 + $0xbe8] ss:$12 sps:$4 sm:$0xff]  }
 0x2fd   : > { %8994 = vmatprep.subr.bf16.mxu0 %v10055_v2  ;;  %v10111_v54 = vld [vmem:[%s11044_s15 + $0xa88] ss:$12 sps:$4 sm:$0xff]   ;;  %v10114_v2 = vld [vmem:[%s11044_s15 + $0xc04] ss:$12 sps:$4 sm:$0xff]  }
 0x2fe   : > { %v11762_v6 = vpop.f32.mrb[28].mxu0 }
 0x2ff   : > { %6982 = vmatpush1.bf16.msra.mxu1 %v10052_v3  ;;  %v11764_v7 = vpop.f32.mrb[29].mxu0  ;;  %v3413_v3 = vcombine.high %v11812_v63, %v11812_v63 }
 0x300   : > { %v6765_v9 = vpop.f32.mrb[30].mxu0  ;;  %8995 = vmatpush3.bf16.msra.mxu0 %v10056_v21  ;;  %6983 = vmatprep.subr.bf16.mxu1 %v10059_v4  ;;  %v10115_v21 = vld [vmem:[%s11044_s15 + $0xb60] ss:$12 sps:$4 sm:$0xff]  }
 0x301   : > { %v6766_v16 = vpop.f32.mrb[31].mxu0  ;;  %8996 = vmatprep.subr.bf16.mxu0 %v10060_v5  ;;  %v10112_v4 = vld [vmem:[%s11044_s15 + $0xc00] ss:$12 sps:$4 sm:$0xff]   ;;  %v11825_v5 = vcombine.high %v11445_v31, %v11445_v31  ;;  %v10119_v9 = vld [vmem:[%s11044_s15 + $0xc1c] ss:$12 sps:$4 sm:$0xff]  }
 0x302   : > { %v10124_v16 = vld [vmem:[%s11044_s15 + $0xc34] ss:$12 sps:$4 sm:$0xff]  }
 0x303   : > { %6984 = vmatpush1.bf16.msra.mxu1 %v10057_v8  ;;  %v10116_v8 = vld [vmem:[%s11044_s15 + $0xaa0] ss:$12 sps:$4 sm:$0xff]  }
 0x304   : > { %8997 = vmatpush3.bf16.msra.mxu0 %v10061_v13  ;;  %6985 = vmatprep.subr.bf16.mxu1 %v10064_v14  ;;  %v11830_v13 = vrot.slane %v3413_v3, %v11357_v42  ;;  %v10120_v14 = vld [vmem:[%s11044_s15 + $0xb78] ss:$12 sps:$4 sm:$0xff]   ;;  %v10167_v3 = vld [vmem:[%s11044_s15 + $0xd08] ss:$12 sps:$4 sm:$0xff]  }
 0x305   : > { %8998 = vmatprep.subr.bf16.mxu0 %v10065_v23  ;;  %v10125_v23 = vld [vmem:[%s11044_s15 + $0xb90] ss:$12 sps:$4 sm:$0xff]  }
 0x307   : > { %6986 = vmatpush1.bf16.msra.mxu1 %v10062_v17  ;;  %v10122_v17 = vld [vmem:[%s11044_s15 + $0xc30] ss:$12 sps:$4 sm:$0xff]  }
 0x308   : > { %8999 = vmatpush3.bf16.msra.mxu0 %v10066_v18  ;;  %6987 = vmatprep.subr.bf16.mxu1 %v10069_v58  ;;  %v10126_v18 = vld [vmem:[%s11044_s15 + $0xad0] ss:$12 sps:$4 sm:$0xff]   ;;  %v10129_v58 = vld [vmem:[%s11044_s15 + $0xc4c] ss:$12 sps:$4 sm:$0xff]  }
 0x309   : > { %9006 = vmatprep.subr.bf16.mxu0 %v10070_v19  ;;  %v10130_v19 = vld [vmem:[%s11044_s15 + $0xba8] ss:$12 sps:$4 sm:$0xff]  }
 0x30b   : > { %6988 = vmatpush1.bf16.msra.mxu1 %v10067_v24  ;;  %7452 = vmatmul.mubr.bf16.vlgmr.msra.gmra.mrb[56].mxu0 %v11665_v41  ;;  %v10081_v41 = vld [vmem:[%s11044_s15 + $0x938] ss:$12 sps:$4 sm:$0xff]   ;;  %v10127_v24 = vld [vmem:[%s11044_s15 + $0xc48] ss:$12 sps:$4 sm:$0xff]  }
 0x30c   : > { %9007 = vmatpush3.bf16.msra.mxu0 %v10071_v12  ;;  %7491 = vmatprep.mubr.bf16.mxu0 %v11449_v55  ;;  %v10082_v55 = vld [vmem:[%s11044_s15 + $0xb70] ss:$12 sps:$4 sm:$0xff]   ;;  %v10131_v12 = vld [vmem:[%s11044_s15 + $0xae8] ss:$12 sps:$4 sm:$0xff]  }
 0x30d   : > { %6989 = vmatprep.subr.bf16.mxu1 %v10074_v20  ;;  %9008 = vmatprep.subr.bf16.mxu0 %v10075_v25  ;;  %v10134_v20 = vld [vmem:[%s11044_s15 + $0xc64] ss:$12 sps:$4 sm:$0xff]   ;;  %v10135_v25 = vld [vmem:[%s11044_s15 + $0xbc0] ss:$12 sps:$4 sm:$0xff]  }
 0x30f   : > { %6990 = vmatpush1.bf16.msra.mxu1 %v10072_v26  ;;  %v10132_v26 = vld [vmem:[%s11044_s15 + $0xc60] ss:$12 sps:$4 sm:$0xff]  }
 0x310   : > { %9009 = vmatpush3.bf16.msra.mxu0 %v10076_v27  ;;  %6991 = vmatprep.subr.bf16.mxu1 %v10079_v33  ;;  %v10136_v27 = vld [vmem:[%s11044_s15 + $0xb00] ss:$12 sps:$4 sm:$0xff]   ;;  %v10139_v33 = vld [vmem:[%s11044_s15 + $0xc7c] ss:$12 sps:$4 sm:$0xff]  }
 0x311   : > { %9010 = vmatprep.subr.bf16.mxu0 %v10080_v34  ;;  %v10140_v34 = vld [vmem:[%s11044_s15 + $0xbd8] ss:$12 sps:$4 sm:$0xff]  }
 0x313   : > { %6992 = vmatpush1.bf16.msra.mxu1 %v10077_v35 }
 0x314   : > { %9011 = vmatpush3.bf16.msra.mxu0 %v10081_v41  ;;  %6993 = vmatprep.subr.bf16.mxu1 %v10084_v36  ;;  %v10137_v36 = vld [vmem:[%s11044_s15 + $0xc78] ss:$12 sps:$4 sm:$0xff]  }
 0x315   : > { %9012 = vmatprep.subr.bf16.mxu0 %v10085_v39 }
 0x317   : > { %6994 = vmatpush1.bf16.msra.mxu1 %v10082_v55 }
 0x318   : > { %9013 = vmatpush3.bf16.msra.mxu0 %v10086_v40  ;;  %6995 = vmatprep.subr.bf16.mxu1 %v10089_v43  ;;  %v10141_v40 = vld [vmem:[%s11044_s15 + $0xb18] ss:$12 sps:$4 sm:$0xff]   ;;  %v10144_v43 = vld [vmem:[%s11044_s15 + $0xc94] ss:$12 sps:$4 sm:$0xff]  }
 0x319   : > { %9014 = vmatprep.subr.bf16.mxu0 %v10090_v44 }
 0x31b   : > { %6996 = vmatpush1.bf16.msra.mxu1 %v10087_v30  ;;  %v10145_v30 = vld [vmem:[%s11044_s15 + $0xbf0] ss:$12 sps:$4 sm:$0xff]  }
 0x31c   : > { %9015 = vmatpush3.bf16.msra.mxu0 %v10091_v29  ;;  %6997 = vmatprep.subr.bf16.mxu1 %v10094_v32  ;;  %v10142_v29 = vld [vmem:[%s11044_s15 + $0xc90] ss:$12 sps:$4 sm:$0xff]  }
 0x31d   : > { %9016 = vmatprep.subr.bf16.mxu0 %v10095_v45  ;;  %v10146_v32 = vld [vmem:[%s11044_s15 + $0xb30] ss:$12 sps:$4 sm:$0xff]   ;;  %v10149_v45 = vld [vmem:[%s11044_s15 + $0xcac] ss:$12 sps:$4 sm:$0xff]  }
 0x31e   : > { %v11800_v50 = vpop.f32.mrb[32].mxu0 }
 0x31f   : > { %6998 = vmatpush1.bf16.msra.mxu1 %v10092_v46  ;;  %v11803_v51 = vpop.f32.mrb[33].mxu0  ;;  %v10150_v46 = vld [vmem:[%s11044_s15 + $0xcc8] ss:$12 sps:$4 sm:$0xff]  }
 0x320   : > { %9017 = vmatpush3.bf16.msra.mxu0 %v10096_v47  ;;  %6999 = vmatprep.subr.bf16.mxu1 %v10099_v48  ;;  %v7216_v22 = vpop.f32.mrb[34].mxu0  ;;  %v10147_v47 = vld [vmem:[%s11044_s15 + $0xca8] ss:$12 sps:$4 sm:$0xff]  }
 0x321   : > { %9018 = vmatprep.subr.bf16.mxu0 %v10100_v49  ;;  %v7217_v57 = vpop.f32.mrb[35].mxu0  ;;  %v10151_v48 = vld [vmem:[%s11044_s15 + $0xc08] ss:$12 sps:$4 sm:$0xff]   ;;  %v10154_v49 = vld [vmem:[%s11044_s15 + $0xcc4] ss:$12 sps:$4 sm:$0xff]  }
 0x322   : > { %v10159_v22 = vld [vmem:[%s11044_s15 + $0xcdc] ss:$12 sps:$4 sm:$0xff]   ;;  %v10157_v57 = vld [vmem:[%s11044_s15 + $0xcd8] ss:$12 sps:$4 sm:$0xff]  }
 0x323   : > { %7000 = vmatpush1.bf16.msra.mxu1 %v10097_v10  ;;  %v10155_v10 = vld [vmem:[%s11044_s15 + $0xce0] ss:$12 sps:$4 sm:$0xff]  }
 0x324   : > { %9019 = vmatpush3.bf16.msra.mxu0 %v10101_v53  ;;  %7001 = vmatprep.subr.bf16.mxu1 %v10104_v38  ;;  %v10152_v53 = vld [vmem:[%s11044_s15 + $0xcc0] ss:$12 sps:$4 sm:$0xff]  }
 0x325   : > { %9020 = vmatprep.subr.bf16.mxu0 %v10105_v56  ;;  %v10156_v38 = vld [vmem:[%s11044_s15 + $0xc20] ss:$12 sps:$4 sm:$0xff]   ;;  %v10160_v56 = vld [vmem:[%s11044_s15 + $0xcf8] ss:$12 sps:$4 sm:$0xff]  }
 0x327   : > { %7002 = vmatpush1.bf16.msra.mxu1 %v10102_v59  ;;  %v10161_v59 = vld [vmem:[%s11044_s15 + $0xc38] ss:$12 sps:$4 sm:$0xff]  }
 0x328   : > { %9021 = vmatpush3.bf16.msra.mxu0 %v10106_v60  ;;  %7003 = vmatprep.subr.bf16.mxu1 %v10109_v61  ;;  %v10164_v60 = vld [vmem:[%s11044_s15 + $0xcf4] ss:$12 sps:$4 sm:$0xff]   ;;  %v10165_v61 = vld [vmem:[%s11044_s15 + $0xd10] ss:$12 sps:$4 sm:$0xff]  }
 0x329   : > { %9028 = vmatprep.subr.bf16.mxu0 %v10110_v62  ;;  %v10162_v62 = vld [vmem:[%s11044_s15 + $0xcf0] ss:$12 sps:$4 sm:$0xff]  }
 0x32b   : > { %7004 = vmatpush1.bf16.msra.mxu1 %v10107_v1  ;;  %7492 = vmatmul.mubr.bf16.vlgmr.msra.gmra.mrb[60].mxu0 %v11445_v31  ;;  %v10117_v31 = vld [vmem:[%s11044_s15 + $0xc18] ss:$12 sps:$4 sm:$0xff]   ;;  %v10166_v1 = vld [vmem:[%s11044_s15 + $0xc50] ss:$12 sps:$4 sm:$0xff]  }
 0x32c   : > { %9029 = vmatpush3.bf16.msra.mxu0 %v10111_v54  ;;  %7531 = vmatprep.mubr.bf16.mxu0 %v11741_v52  ;;  %v10121_v52 = vld [vmem:[%s11044_s15 + $0xab8] ss:$12 sps:$4 sm:$0xff]  }
 0x32d   : > { %7014 = vmatprep.subr.bf16.mxu1 %v10114_v2  ;;  %9030 = vmatprep.subr.bf16.mxu0 %v10115_v21  ;;  %v10169_v54 = vld [vmem:[%s11044_s15 + $0xd0c] ss:$12 sps:$4 sm:$0xff]   ;;  %v10170_v2 = vld [vmem:[%s11044_s15 + $0xd28] ss:$12 sps:$4 sm:$0xff]  }
 0x32e   : > { %7006 = vmatmul.mubr.bf16.vlgmr.msra.gmra.mrb[24].mxu1 %v11825_v5  ;;  %v10171_v21 = vld [vmem:[%s11044_s15 + $0xc68] ss:$12 sps:$4 sm:$0xff]  }
 0x32f   : > { %7015 = vmatpush1.bf16.msra.mxu1 %v10112_v4  ;;  %7046 = vmatprep.mubr.bf16.mxu1 %v11830_v13  ;;  %v10174_v4 = vld [vmem:[%s11044_s15 + $0xd24] ss:$12 sps:$4 sm:$0xff]  }
 0x330   : > { %9031 = vmatpush3.bf16.msra.mxu0 %v10116_v8  ;;  %7016 = vmatprep.subr.bf16.mxu1 %v10119_v9  ;;  %v10172_v8 = vld [vmem:[%s11044_s15 + $0xd20] ss:$12 sps:$4 sm:$0xff]  }
 0x331   : > { %9032 = vmatprep.subr.bf16.mxu0 %v10120_v14  ;;  %v10176_v9 = vld [vmem:[%s11044_s15 + $0xc80] ss:$12 sps:$4 sm:$0xff]   ;;  %v10179_v14 = vld [vmem:[%s11044_s15 + $0xd3c] ss:$12 sps:$4 sm:$0xff]  }
 0x333   : > { %7017 = vmatpush1.bf16.msra.mxu1 %v10117_v31  ;;  %v10180_v31 = vld [vmem:[%s11044_s15 + $0xd58] ss:$12 sps:$4 sm:$0xff]  }
 0x334   : > { %9033 = vmatpush3.bf16.msra.mxu0 %v10121_v52  ;;  %7018 = vmatprep.subr.bf16.mxu1 %v10124_v16 }
 0x335   : > { %9034 = vmatprep.subr.bf16.mxu0 %v10125_v23  ;;  %v10177_v23 = vld [vmem:[%s11044_s15 + $0xd38] ss:$12 sps:$4 sm:$0xff]  }
 0x337   : > { %7019 = vmatpush1.bf16.msra.mxu1 %v10122_v17 }
 0x338   : > { %9035 = vmatpush3.bf16.msra.mxu0 %v10126_v18  ;;  %7020 = vmatprep.subr.bf16.mxu1 %v10129_v58  ;;  %v10181_v58 = vld [vmem:[%s11044_s15 + $0xc98] ss:$12 sps:$4 sm:$0xff]  }
 0x339   : > { %9036 = vmatprep.subr.bf16.mxu0 %v10130_v19  ;;  %v10184_v19 = vld [vmem:[%s11044_s15 + $0xd54] ss:$12 sps:$4 sm:$0xff]  }
 0x33b   : > { %7021 = vmatpush1.bf16.msra.mxu1 %v10127_v24 }
 0x33c   : > { %9037 = vmatpush3.bf16.msra.mxu0 %v10131_v12  ;;  %7022 = vmatprep.subr.bf16.mxu1 %v10134_v20  ;;  %v10185_v12 = vld [vmem:[%s11044_s15 + $0xd70] ss:$12 sps:$4 sm:$0xff]  }
 0x33d   : > { %9038 = vmatprep.subr.bf16.mxu0 %v10135_v25  ;;  %v10182_v25 = vld [vmem:[%s11044_s15 + $0xd50] ss:$12 sps:$4 sm:$0xff]  }
 0x33e   : > { %v8890_v35 = vpop.f32.mrb[36].mxu0 }
 0x33f   : > { %7023 = vmatpush1.bf16.msra.mxu1 %v10132_v26  ;;  %v8891_v41 = vpop.f32.mrb[37].mxu0  ;;  %v10186_v26 = vld [vmem:[%s11044_s15 + $0xcb0] ss:$12 sps:$4 sm:$0xff]  }
 0x340   : > { %v11852_v39 = vadd.f32 %v8891_v41, %v8890_v35  ;;  %v8893_v55 = vpop.f32.mrb[38].mxu0  ;;  %9039 = vmatpush3.bf16.msra.mxu0 %v10136_v27  ;;  %7024 = vmatprep.subr.bf16.mxu1 %v10139_v33  ;;  %v10189_v27 = vld [vmem:[%s11044_s15 + $0xd6c] ss:$12 sps:$4 sm:$0xff]   ;;  %v10190_v33 = vld [vmem:[%s11044_s15 + $0xe48] ss:$12 sps:$4 sm:$0xff]   ;;  %v11902_v41 = vrot.slane %v11812_v63, %v11357_v42 }
 0x341   : > { %v8894_v44 = vpop.f32.mrb[39].mxu0  ;;  %9040 = vmatprep.subr.bf16.mxu0 %v10140_v34  ;;  %v10187_v34 = vld [vmem:[%s11044_s15 + $0xd68] ss:$12 sps:$4 sm:$0xff]   ;;  %v3445_v55 = vcombine.high %v11830_v13, %v11830_v13  ;;  %v10200_v63 = vld [vmem:[%s11044_s15 + $0xe78] ss:$12 sps:$4 sm:$0xff]  }
 0x342   : > { %v10191_v35 = vld [vmem:[%s11044_s15 + $0xd88] ss:$12 sps:$4 sm:$0xff]   ;;  %v10201_v44 = vld [vmem:[%s11044_s15 + $0xdb8] ss:$12 sps:$4 sm:$0xff]  }
 0x343   : > { %7025 = vmatpush1.bf16.msra.mxu1 %v10137_v36  ;;  %v10194_v36 = vld [vmem:[%s11044_s15 + $0xd84] ss:$12 sps:$4 sm:$0xff]   ;;  %v10199_v42 = vld [vmem:[%s11044_s15 + $0xd9c] ss:$12 sps:$4 sm:$0xff]  }
 0x344   : > { %9041 = vmatpush3.bf16.msra.mxu0 %v10141_v40  ;;  %7026 = vmatprep.subr.bf16.mxu1 %v10144_v43  ;;  %v10192_v40 = vld [vmem:[%s11044_s15 + $0xd80] ss:$12 sps:$4 sm:$0xff]  }
 0x345   : > { %9042 = vmatprep.subr.bf16.mxu0 %v10145_v30  ;;  %v10196_v43 = vld [vmem:[%s11044_s15 + $0xda0] ss:$12 sps:$4 sm:$0xff]  }
 0x346   : > { %v10204_v30 = vld [vmem:[%s11044_s15 + $0xdb4] ss:$12 sps:$4 sm:$0xff]  }
 0x347   : > { %7027 = vmatpush1.bf16.msra.mxu1 %v10142_v29  ;;  %v10205_v29 = vld [vmem:[%s11044_s15 + $0xe90] ss:$12 sps:$4 sm:$0xff]  }
 0x348   : > { %9043 = vmatpush3.bf16.msra.mxu0 %v10146_v32  ;;  %7028 = vmatprep.subr.bf16.mxu1 %v10149_v45  ;;  %v10202_v32 = vld [vmem:[%s11044_s15 + $0xdb0] ss:$12 sps:$4 sm:$0xff]  }
 0x349   : > { %9050 = vmatprep.subr.bf16.mxu0 %v10150_v46  ;;  %v10206_v45 = vld [vmem:[%s11044_s15 + $0xdd0] ss:$12 sps:$4 sm:$0xff]   ;;  %v10209_v46 = vld [vmem:[%s11044_s15 + $0xdcc] ss:$12 sps:$4 sm:$0xff]  }
 0x34b   : > { %7029 = vmatpush1.bf16.msra.mxu1 %v10147_v47  ;;  %7532 = vmatmul.mubr.bf16.vlgmr.msra.gmra.mrb[64].mxu0 %v11825_v5  ;;  %v10175_v5 = vld [vmem:[%s11044_s15 + $0xd40] ss:$12 sps:$4 sm:$0xff]   ;;  %v10210_v47 = vld [vmem:[%s11044_s15 + $0xea8] ss:$12 sps:$4 sm:$0xff]  }
 0x34c   : > { %9051 = vmatpush3.bf16.msra.mxu0 %v10151_v48  ;;  %7571 = vmatprep.mubr.bf16.mxu0 %v11830_v13  ;;  %v10197_v13 = vld [vmem:[%s11044_s15 + $0xd98] ss:$12 sps:$4 sm:$0xff]   ;;  %v10207_v48 = vld [vmem:[%s11044_s15 + $0xdc8] ss:$12 sps:$4 sm:$0xff]  }
 0x34d   : > { %7030 = vmatprep.subr.bf16.mxu1 %v10154_v49  ;;  %9052 = vmatprep.subr.bf16.mxu0 %v10155_v10  ;;  %v10211_v49 = vld [vmem:[%s11044_s15 + $0xde8] ss:$12 sps:$4 sm:$0xff]   ;;  %v10214_v10 = vld [vmem:[%s11044_s15 + $0xde4] ss:$12 sps:$4 sm:$0xff]  }
 0x34f   : > { %7031 = vmatpush1.bf16.msra.mxu1 %v10152_v53  ;;  %v10215_v53 = vld [vmem:[%s11044_s15 + $0xec0] ss:$12 sps:$4 sm:$0xff]  }
 0x350   : > { %9053 = vmatpush3.bf16.msra.mxu0 %v10156_v38  ;;  %7032 = vmatprep.subr.bf16.mxu1 %v10159_v22  ;;  %v10212_v38 = vld [vmem:[%s11044_s15 + $0xde0] ss:$12 sps:$4 sm:$0xff]  }
 0x351   : > { %9054 = vmatprep.subr.bf16.mxu0 %v10160_v56  ;;  %v10216_v22 = vld [vmem:[%s11044_s15 + $0xe00] ss:$12 sps:$4 sm:$0xff]   ;;  %v10219_v56 = vld [vmem:[%s11044_s15 + $0xdfc] ss:$12 sps:$4 sm:$0xff]  }
 0x353   : > { %7033 = vmatpush1.bf16.msra.mxu1 %v10157_v57  ;;  %v10220_v57 = vld [vmem:[%s11044_s15 + $0xed8] ss:$12 sps:$4 sm:$0xff]  }
 0x354   : > { %9055 = vmatpush3.bf16.msra.mxu0 %v10161_v59  ;;  %7034 = vmatprep.subr.bf16.mxu1 %v10164_v60 }
 0x355   : > { %9056 = vmatprep.subr.bf16.mxu0 %v10165_v61  ;;  %v10217_v61 = vld [vmem:[%s11044_s15 + $0xdf8] ss:$12 sps:$4 sm:$0xff]  }
 0x357   : > { %7035 = vmatpush1.bf16.msra.mxu1 %v10162_v62 }
 0x358   : > { %9057 = vmatpush3.bf16.msra.mxu0 %v10166_v1  ;;  %7036 = vmatprep.subr.bf16.mxu1 %v10169_v54  ;;  %v10221_v54 = vld [vmem:[%s11044_s15 + $0xe18] ss:$12 sps:$4 sm:$0xff]  }
 0x359   : > { %9058 = vmatprep.subr.bf16.mxu0 %v10170_v2  ;;  %v10224_v2 = vld [vmem:[%s11044_s15 + $0xe14] ss:$12 sps:$4 sm:$0xff]  }
 0x35b   : > { %7037 = vmatpush1.bf16.msra.mxu1 %v10167_v3 }
 0x35c   : > { %9059 = vmatpush3.bf16.msra.mxu0 %v10171_v21  ;;  %7038 = vmatprep.subr.bf16.mxu1 %v10174_v4  ;;  %v10225_v21 = vld [vmem:[%s11044_s15 + $0xef0] ss:$12 sps:$4 sm:$0xff]  }
 0x35d   : > { %9060 = vmatprep.subr.bf16.mxu0 %v10175_v5  ;;  %v10222_v5 = vld [vmem:[%s11044_s15 + $0xe10] ss:$12 sps:$4 sm:$0xff]  }
 0x35e   : > { %v8912_v52 = vpop.f32.mrb[40].mxu0 }
 0x35f   : > { %7039 = vmatpush1.bf16.msra.mxu1 %v10172_v8  ;;  %v8913_v16 = vpop.f32.mrb[41].mxu0  ;;  %v10226_v8 = vld [vmem:[%s11044_s15 + $0xe30] ss:$12 sps:$4 sm:$0xff]  }
 0x360   : > { %v8914_v17 = vadd.f32 %v8913_v16, %v8912_v52  ;;  %v8915_v18 = vpop.f32.mrb[42].mxu0  ;;  %9061 = vmatpush3.bf16.msra.mxu0 %v10176_v9  ;;  %7040 = vmatprep.subr.bf16.mxu1 %v10179_v14  ;;  %v10229_v9 = vld [vmem:[%s11044_s15 + $0xe2c] ss:$12 sps:$4 sm:$0xff]   ;;  %v10230_v14 = vld [vmem:[%s11044_s15 + $0xfc8] ss:$12 sps:$4 sm:$0xff]   ;;  %v11945_v16 = vcombine.high %v11902_v41, %v11902_v41 }
 0x361   : > { %v8916_v24 = vpop.f32.mrb[43].mxu0  ;;  %9062 = vmatprep.subr.bf16.mxu0 %v10180_v31  ;;  %v10227_v31 = vld [vmem:[%s11044_s15 + $0xe28] ss:$12 sps:$4 sm:$0xff]   ;;  %v10233_v18 = vld [vmem:[%s11044_s15 + $0xe40] ss:$12 sps:$4 sm:$0xff]  }
 0x362   : > { %v11892_v20 = vadd.f32 %v8914_v17, %v11852_v39  ;;  %v10195_v39 = vld [vmem:[%s11044_s15 + $0xe60] ss:$12 sps:$4 sm:$0xff]   ;;  %v10231_v52 = vld [vmem:[%s11044_s15 + $0xf08] ss:$12 sps:$4 sm:$0xff]   ;;  %v10241_v24 = vld [vmem:[%s11044_s15 + $0xff8] ss:$12 sps:$4 sm:$0xff]  }
 0x363   : > { %7041 = vmatpush1.bf16.msra.mxu1 %v10177_v23  ;;  %v10235_v23 = vld [vmem:[%s11044_s15 + $0xe44] ss:$12 sps:$4 sm:$0xff]   ;;  %v10236_v17 = vld [vmem:[%s11044_s15 + $0xfe0] ss:$12 sps:$4 sm:$0xff]  }
 0x364   : > { %9063 = vmatpush3.bf16.msra.mxu0 %v10181_v58  ;;  %7042 = vmatprep.subr.bf16.mxu1 %v10184_v19  ;;  %v10237_v58 = vld [vmem:[%s11044_s15 + $0xf20] ss:$12 sps:$4 sm:$0xff]   ;;  %v10240_v19 = vld [vmem:[%s11044_s15 + $0xe5c] ss:$12 sps:$4 sm:$0xff]  }
 0x365   : > { %9064 = vmatprep.subr.bf16.mxu0 %v10185_v12  ;;  %v10238_v12 = vld [vmem:[%s11044_s15 + $0xe58] ss:$12 sps:$4 sm:$0xff]  }
 0x367   : > { %7043 = vmatpush1.bf16.msra.mxu1 %v10182_v25  ;;  %v10245_v25 = vld [vmem:[%s11044_s15 + $0xe74] ss:$12 sps:$4 sm:$0xff]  }
 0x368   : > { %9065 = vmatpush3.bf16.msra.mxu0 %v10186_v26  ;;  %7044 = vmatprep.subr.bf16.mxu1 %v10189_v27  ;;  %v10246_v26 = vld [vmem:[%s11044_s15 + $0x1010] ss:$12 sps:$4 sm:$0xff]  }
 0x369   : > { %9072 = vmatprep.subr.bf16.mxu0 %v10190_v33  ;;  %v10243_v27 = vld [vmem:[%s11044_s15 + $0xe70] ss:$12 sps:$4 sm:$0xff]  }
 0x36a   : > { %v10247_v33 = vld [vmem:[%s11044_s15 + $0xf50] ss:$12 sps:$4 sm:$0xff]  }
 0x36b   : > { %7045 = vmatpush1.bf16.msra.mxu1 %v10187_v34  ;;  %7572 = vmatmul.mubr.bf16.vlgmr.msra.gmra.mrb[68].mxu0 %v11902_v41  ;;  %v10250_v34 = vld [vmem:[%s11044_s15 + $0xe8c] ss:$12 sps:$4 sm:$0xff]  }
 0x36c   : > { %9073 = vmatpush3.bf16.msra.mxu0 %v10191_v35  ;;  %7611 = vmatprep.mubr.bf16.mxu0 %v3445_v55  ;;  %v10251_v35 = vld [vmem:[%s11044_s15 + $0x1028] ss:$12 sps:$4 sm:$0xff]  }
 0x36d   : > { %7055 = vmatprep.subr.bf16.mxu1 %v10194_v36  ;;  %9074 = vmatprep.subr.bf16.mxu0 %v10195_v39  ;;  %v10252_v36 = vld [vmem:[%s11044_s15 + $0xf68] ss:$12 sps:$4 sm:$0xff]   ;;  %v10255_v39 = vld [vmem:[%s11044_s15 + $0xea4] ss:$12 sps:$4 sm:$0xff]  }
 0x36e   : > { %7047 = vmatmul.mubr.bf16.vlgmr.msra.gmra.mrb[24].mxu1 %v11902_v41  ;;  %v10248_v41 = vld [vmem:[%s11044_s15 + $0xe88] ss:$12 sps:$4 sm:$0xff]  }
 0x36f   : > { %7056 = vmatpush1.bf16.msra.mxu1 %v10192_v40  ;;  %7087 = vmatprep.mubr.bf16.mxu1 %v3445_v55  ;;  %v10256_v55 = vld [vmem:[%s11044_s15 + $0x1040] ss:$12 sps:$4 sm:$0xff]  }
 0x370   : > { %9075 = vmatpush3.bf16.msra.mxu0 %v10196_v43  ;;  %7057 = vmatprep.subr.bf16.mxu1 %v10199_v42  ;;  %v10253_v40 = vld [vmem:[%s11044_s15 + $0xea0] ss:$12 sps:$4 sm:$0xff]   ;;  %v10260_v42 = vld [vmem:[%s11044_s15 + $0xebc] ss:$12 sps:$4 sm:$0xff]  }
 0x371   : > { %9076 = vmatprep.subr.bf16.mxu0 %v10200_v63  ;;  %v10257_v43 = vld [vmem:[%s11044_s15 + $0xf80] ss:$12 sps:$4 sm:$0xff]   ;;  %v10261_v63 = vld [vmem:[%s11044_s15 + $0x1058] ss:$12 sps:$4 sm:$0xff]  }
 0x373   : > { %7058 = vmatpush1.bf16.msra.mxu1 %v10197_v13 }
 0x374   : > { %9077 = vmatpush3.bf16.msra.mxu0 %v10201_v44  ;;  %7059 = vmatprep.subr.bf16.mxu1 %v10204_v30  ;;  %v10258_v30 = vld [vmem:[%s11044_s15 + $0xeb8] ss:$12 sps:$4 sm:$0xff]  }
 0x375   : > { %9078 = vmatprep.subr.bf16.mxu0 %v10205_v29 }
 0x377   : > { %7060 = vmatpush1.bf16.msra.mxu1 %v10202_v32 }
 0x378   : > { %9079 = vmatpush3.bf16.msra.mxu0 %v10206_v45  ;;  %7061 = vmatprep.subr.bf16.mxu1 %v10209_v46  ;;  %v10262_v45 = vld [vmem:[%s11044_s15 + $0xf98] ss:$12 sps:$4 sm:$0xff]   ;;  %v10265_v46 = vld [vmem:[%s11044_s15 + $0xed4] ss:$12 sps:$4 sm:$0xff]  }
 0x379   : > { %9080 = vmatprep.subr.bf16.mxu0 %v10210_v47 }
 0x37b   : > { %7062 = vmatpush1.bf16.msra.mxu1 %v10207_v48  ;;  %v10266_v48 = vld [vmem:[%s11044_s15 + $0x1070] ss:$12 sps:$4 sm:$0xff]  }
 0x37c   : > { %9081 = vmatpush3.bf16.msra.mxu0 %v10211_v49  ;;  %7063 = vmatprep.subr.bf16.mxu1 %v10214_v10  ;;  %v10263_v10 = vld [vmem:[%s11044_s15 + $0xed0] ss:$12 sps:$4 sm:$0xff]  }
 0x37d   : > { %9082 = vmatprep.subr.bf16.mxu0 %v10215_v53  ;;  %v10267_v53 = vld [vmem:[%s11044_s15 + $0xfb0] ss:$12 sps:$4 sm:$0xff]  }
 0x37e   : > { %v8934_v59 = vpop.f32.mrb[44].mxu0 }
 0x37f   : > { %7064 = vmatpush1.bf16.msra.mxu1 %v10212_v38  ;;  %v8935_v60 = vpop.f32.mrb[45].mxu0  ;;  %v10270_v38 = vld [vmem:[%s11044_s15 + $0xeec] ss:$12 sps:$4 sm:$0xff]  }
 0x380   : > { %v8936_v62 = vadd.f32 %v8935_v60, %v8934_v59  ;;  %v8937_v1 = vpop.f32.mrb[46].mxu0  ;;  %9083 = vmatpush3.bf16.msra.mxu0 %v10216_v22  ;;  %7065 = vmatprep.subr.bf16.mxu1 %v10219_v56  ;;  %v10271_v22 = vld [vmem:[%s11044_s15 + $0x1148] ss:$12 sps:$4 sm:$0xff]   ;;  %v10275_v59 = vld [vmem:[%s11044_s15 + $0xf04] ss:$12 sps:$4 sm:$0xff]  }
 0x381   : > { %v8938_v3 = vpop.f32.mrb[47].mxu0  ;;  %9084 = vmatprep.subr.bf16.mxu0 %v10220_v57  ;;  %v10268_v56 = vld [vmem:[%s11044_s15 + $0xee8] ss:$12 sps:$4 sm:$0xff]   ;;  %v10276_v60 = vld [vmem:[%s11044_s15 + $0x1160] ss:$12 sps:$4 sm:$0xff]  }
 0x382   : > { %v11935_v4 = vadd.f32 %v8936_v62, %v11892_v20  ;;  %v10242_v20 = vld [vmem:[%s11044_s15 + $0xf38] ss:$12 sps:$4 sm:$0xff]   ;;  %v10272_v57 = vld [vmem:[%s11044_s15 + $0x1088] ss:$12 sps:$4 sm:$0xff]   ;;  %v10273_v62 = vld [vmem:[%s11044_s15 + $0xf00] ss:$12 sps:$4 sm:$0xff]  }
 0x383   : > { %7066 = vmatpush1.bf16.msra.mxu1 %v10217_v61  ;;  %v11988_v61 = vcombine.high %v11471_v15, %v11471_v15  ;;  %v10277_v1 = vld [vmem:[%s11044_s15 + $0x10a0] ss:$12 sps:$4 sm:$0xff]   ;;  %v10278_v3 = vld [vmem:[%s11044_s15 + $0xf18] ss:$12 sps:$4 sm:$0xff]  }
 0x384   : > { %9085 = vmatpush3.bf16.msra.mxu0 %v10221_v54  ;;  %7067 = vmatprep.subr.bf16.mxu1 %v10224_v2  ;;  %v10280_v54 = vld [vmem:[%s11044_s15 + $0xf1c] ss:$12 sps:$4 sm:$0xff]   ;;  %v10281_v2 = vld [vmem:[%s11044_s15 + $0x1178] ss:$12 sps:$4 sm:$0xff]  }
 0x385   : > { %9086 = vmatprep.subr.bf16.mxu0 %v10225_v21  ;;  %v10282_v21 = vld [vmem:[%s11044_s15 + $0x10b8] ss:$12 sps:$4 sm:$0xff]  }
 0x387   : > { %7068 = vmatpush1.bf16.msra.mxu1 %v10222_v5  ;;  %v10286_v5 = vld [vmem:[%s11044_s15 + $0x1190] ss:$12 sps:$4 sm:$0xff]  }
 0x388   : > { %9087 = vmatpush3.bf16.msra.mxu0 %v10226_v8  ;;  %7069 = vmatprep.subr.bf16.mxu1 %v10229_v9  ;;  %v10283_v8 = vld [vmem:[%s11044_s15 + $0xf30] ss:$12 sps:$4 sm:$0xff]  }
 0x389   : > { %9094 = vmatprep.subr.bf16.mxu0 %v10230_v14  ;;  %v10287_v9 = vld [vmem:[%s11044_s15 + $0x10d0] ss:$12 sps:$4 sm:$0xff]   ;;  %v10290_v14 = vld [vmem:[%s11044_s15 + $0xf4c] ss:$12 sps:$4 sm:$0xff]  }
 0x38b   : > { %7070 = vmatpush1.bf16.msra.mxu1 %v10227_v31  ;;  %7612 = vmatmul.mubr.bf16.vlgmr.msra.gmra.mrb[72].mxu0 %v11945_v16  ;;  %v10288_v31 = vld [vmem:[%s11044_s15 + $0xf48] ss:$12 sps:$4 sm:$0xff]  }
 0x38c   : > { %9095 = vmatpush3.bf16.msra.mxu0 %v10231_v52  ;;  %7651 = vmatprep.mubr.bf16.mxu0 %v11471_v15  ;;  %v10292_v52 = vld [vmem:[%s11044_s15 + $0x10e8] ss:$12 sps:$4 sm:$0xff]  }
 0x38d   : > { %7071 = vmatprep.subr.bf16.mxu1 %v10235_v23  ;;  %9096 = vmatprep.subr.bf16.mxu0 %v10236_v17  ;;  %v10296_v23 = vld [vmem:[%s11044_s15 + $0x11c0] ss:$12 sps:$4 sm:$0xff]  }
 0x38e   : > { %v10293_v17 = vld [vmem:[%s11044_s15 + $0xf60] ss:$12 sps:$4 sm:$0xff]  }
 0x38f   : > { %7072 = vmatpush1.bf16.msra.mxu1 %v10233_v18  ;;  %v10297_v18 = vld [vmem:[%s11044_s15 + $0x1100] ss:$12 sps:$4 sm:$0xff]  }
 0x390   : > { %9097 = vmatpush3.bf16.msra.mxu0 %v10237_v58  ;;  %7073 = vmatprep.subr.bf16.mxu1 %v10240_v19  ;;  %v10300_v58 = vld [vmem:[%s11044_s15 + $0xf7c] ss:$12 sps:$4 sm:$0xff]   ;;  %v10301_v19 = vld [vmem:[%s11044_s15 + $0x11d8] ss:$12 sps:$4 sm:$0xff]  }
 0x391   : > { %9098 = vmatprep.subr.bf16.mxu0 %v10241_v24 }
 0x393   : > { %7074 = vmatpush1.bf16.msra.mxu1 %v10238_v12 }
 0x394   : > { %9099 = vmatpush3.bf16.msra.mxu0 %v10242_v20  ;;  %7075 = vmatprep.subr.bf16.mxu1 %v10245_v25  ;;  %v10298_v20 = vld [vmem:[%s11044_s15 + $0xf78] ss:$12 sps:$4 sm:$0xff]  }
 0x395   : > { %9100 = vmatprep.subr.bf16.mxu0 %v10246_v26 }
 0x397   : > { %7076 = vmatpush1.bf16.msra.mxu1 %v10243_v27  ;;  %v10302_v27 = vld [vmem:[%s11044_s15 + $0x1118] ss:$12 sps:$4 sm:$0xff]  }
 0x398   : > { %9101 = vmatpush3.bf16.msra.mxu0 %v10247_v33  ;;  %7077 = vmatprep.subr.bf16.mxu1 %v10250_v34  ;;  %v10305_v33 = vld [vmem:[%s11044_s15 + $0xf94] ss:$12 sps:$4 sm:$0xff]  }
 0x399   : > { %9102 = vmatprep.subr.bf16.mxu0 %v10251_v35  ;;  %v10306_v35 = vld [vmem:[%s11044_s15 + $0x11f0] ss:$12 sps:$4 sm:$0xff]  }
 0x39b   : > { %7078 = vmatpush1.bf16.msra.mxu1 %v10248_v41 }
 0x39c   : > { %9103 = vmatpush3.bf16.msra.mxu0 %v10252_v36  ;;  %7079 = vmatprep.subr.bf16.mxu1 %v10255_v39  ;;  %v10303_v36 = vld [vmem:[%s11044_s15 + $0xf90] ss:$12 sps:$4 sm:$0xff]  }
 0x39d   : > { %9104 = vmatprep.subr.bf16.mxu0 %v10256_v55  ;;  %v10307_v39 = vld [vmem:[%s11044_s15 + $0x1130] ss:$12 sps:$4 sm:$0xff]   ;;  %v10310_v55 = vld [vmem:[%s11044_s15 + $0xfac] ss:$12 sps:$4 sm:$0xff]  }
 0x39e   : > { %v8956_v13 = vpop.f32.mrb[48].mxu0 }
 0x39f   : > { %7080 = vmatpush1.bf16.msra.mxu1 %v10253_v40  ;;  %v8957_v44 = vpop.f32.mrb[49].mxu0  ;;  %v10308_v40 = vld [vmem:[%s11044_s15 + $0xfa8] ss:$12 sps:$4 sm:$0xff]  }
 0x3a0   : > { %v8958_v29 = vadd.f32 %v8957_v44, %v8956_v13  ;;  %v8959_v32 = vpop.f32.mrb[50].mxu0  ;;  %9105 = vmatpush3.bf16.msra.mxu0 %v10257_v43  ;;  %7081 = vmatprep.subr.bf16.mxu1 %v10260_v42  ;;  %v10311_v43 = vld [vmem:[%s11044_s15 + $0x1208] ss:$12 sps:$4 sm:$0xff]   ;;  %v10314_v42 = vld [vmem:[%s11044_s15 + $0xfc4] ss:$12 sps:$4 sm:$0xff]  }
 0x3a1   : > { %v8960_v47 = vpop.f32.mrb[51].mxu0  ;;  %9106 = vmatprep.subr.bf16.mxu0 %v10261_v63  ;;  %v12029_v63 = vcombine.high %v11466_v11, %v11466_v11  ;;  %v10312_v13 = vld [vmem:[%s11044_s15 + $0xfc0] ss:$12 sps:$4 sm:$0xff]   ;;  %v10319_v32 = vld [vmem:[%s11044_s15 + $0x1238] ss:$12 sps:$4 sm:$0xff]  }
 0x3a2   : > { %v11976_v49 = vadd.f32 %v8958_v29, %v11935_v4  ;;  %v10285_v4 = vld [vmem:[%s11044_s15 + $0xf34] ss:$12 sps:$4 sm:$0xff]   ;;  %v10316_v29 = vld [vmem:[%s11044_s15 + $0xfd8] ss:$12 sps:$4 sm:$0xff]   ;;  %v10323_v47 = vld [vmem:[%s11044_s15 + $0x1250] ss:$12 sps:$4 sm:$0xff]  }
 0x3a3   : > { %7082 = vmatpush1.bf16.msra.mxu1 %v10258_v30  ;;  %v10315_v44 = vld [vmem:[%s11044_s15 + $0x1220] ss:$12 sps:$4 sm:$0xff]   ;;  %v10318_v30 = vld [vmem:[%s11044_s15 + $0xfdc] ss:$12 sps:$4 sm:$0xff]  }
 0x3a4   : > { %9107 = vmatpush3.bf16.msra.mxu0 %v10262_v45  ;;  %7083 = vmatprep.subr.bf16.mxu1 %v10265_v46  ;;  %v10322_v45 = vld [vmem:[%s11044_s15 + $0xff4] ss:$12 sps:$4 sm:$0xff]   ;;  %v10320_v46 = vld [vmem:[%s11044_s15 + $0xff0] ss:$12 sps:$4 sm:$0xff]  }
 0x3a5   : > { %9108 = vmatprep.subr.bf16.mxu0 %v10266_v48  ;;  %v10326_v48 = vld [vmem:[%s11044_s15 + $0x100c] ss:$12 sps:$4 sm:$0xff]  }
 0x3a7   : > { %7084 = vmatpush1.bf16.msra.mxu1 %v10263_v10  ;;  %v10327_v10 = vld [vmem:[%s11044_s15 + $0x1268] ss:$12 sps:$4 sm:$0xff]  }
 0x3a8   : > { %9109 = vmatpush3.bf16.msra.mxu0 %v10267_v53  ;;  %7085 = vmatprep.subr.bf16.mxu1 %v10270_v38  ;;  %v10330_v53 = vld [vmem:[%s11044_s15 + $0x1024] ss:$12 sps:$4 sm:$0xff]   ;;  %v10328_v38 = vld [vmem:[%s11044_s15 + $0x1020] ss:$12 sps:$4 sm:$0xff]  }
 0x3a9   : > { %9116 = vmatprep.subr.bf16.mxu0 %v10271_v22  ;;  %v10331_v22 = vld [vmem:[%s11044_s15 + $0x1280] ss:$12 sps:$4 sm:$0xff]  }
 0x3ab   : > { %7086 = vmatpush1.bf16.msra.mxu1 %v10268_v56  ;;  %7652 = vmatmul.mubr.bf16.vlgmr.msra.gmra.mrb[76].mxu0 %v11466_v11  ;;  %v10334_v56 = vld [vmem:[%s11044_s15 + $0x103c] ss:$12 sps:$4 sm:$0xff]  }
 0x3ac   : > { %9117 = vmatpush3.bf16.msra.mxu0 %v10272_v57  ;;  %7691 = vmatprep.mubr.bf16.mxu0 %v11988_v61 }
 0x3ad   : > { %7096 = vmatprep.subr.bf16.mxu1 %v10275_v59  ;;  %9118 = vmatprep.subr.bf16.mxu0 %v10276_v60  ;;  %v10332_v60 = vld [vmem:[%s11044_s15 + $0x1038] ss:$12 sps:$4 sm:$0xff]  }
 0x3ae   : > { %7088 = vmatmul.mubr.bf16.vlgmr.msra.gmra.mrb[24].mxu1 %v11945_v16  ;;  %v10295_v16 = vld [vmem:[%s11044_s15 + $0xf64] ss:$12 sps:$4 sm:$0xff]  }
 0x3af   : > { %7097 = vmatpush1.bf16.msra.mxu1 %v10273_v62  ;;  %7128 = vmatprep.mubr.bf16.mxu1 %v11471_v15  ;;  %v10291_v15 = vld [vmem:[%s11044_s15 + $0x11a8] ss:$12 sps:$4 sm:$0xff]  }
 0x3b0   : > { %9119 = vmatpush3.bf16.msra.mxu0 %v10277_v1  ;;  %7098 = vmatprep.subr.bf16.mxu1 %v10280_v54  ;;  %v10335_v54 = vld [vmem:[%s11044_s15 + $0x1298] ss:$12 sps:$4 sm:$0xff]  }
 0x3b1   : > { %9120 = vmatprep.subr.bf16.mxu0 %v10281_v2  ;;  %v10338_v2 = vld [vmem:[%s11044_s15 + $0x1054] ss:$12 sps:$4 sm:$0xff]  }
 0x3b3   : > { %7099 = vmatpush1.bf16.msra.mxu1 %v10278_v3 }
 0x3b4   : > { %9121 = vmatpush3.bf16.msra.mxu0 %v10282_v21  ;;  %7100 = vmatprep.subr.bf16.mxu1 %v10285_v4  ;;  %v10336_v4 = vld [vmem:[%s11044_s15 + $0x1050] ss:$12 sps:$4 sm:$0xff]  }
 0x3b5   : > { %9122 = vmatprep.subr.bf16.mxu0 %v10286_v5  ;;  %v10339_v5 = vld [vmem:[%s11044_s15 + $0x12b0] ss:$12 sps:$4 sm:$0xff]  }
 0x3b7   : > { %7101 = vmatpush1.bf16.msra.mxu1 %v10283_v8  ;;  %v10342_v8 = vld [vmem:[%s11044_s15 + $0x106c] ss:$12 sps:$4 sm:$0xff]  }
 0x3b8   : > { %9123 = vmatpush3.bf16.msra.mxu0 %v10287_v9  ;;  %7102 = vmatprep.subr.bf16.mxu1 %v10290_v14  ;;  %v10340_v9 = vld [vmem:[%s11044_s15 + $0x1068] ss:$12 sps:$4 sm:$0xff]   ;;  %v10345_v14 = vld [vmem:[%s11044_s15 + $0x1084] ss:$12 sps:$4 sm:$0xff]  }
 0x3b9   : > { %9124 = vmatprep.subr.bf16.mxu0 %v10291_v15  ;;  %v10343_v15 = vld [vmem:[%s11044_s15 + $0x1080] ss:$12 sps:$4 sm:$0xff]  }
 0x3bb   : > { %7103 = vmatpush1.bf16.msra.mxu1 %v10288_v31  ;;  %v10348_v31 = vld [vmem:[%s11044_s15 + $0x109c] ss:$12 sps:$4 sm:$0xff]  }
 0x3bc   : > { %9125 = vmatpush3.bf16.msra.mxu0 %v10292_v52  ;;  %7104 = vmatprep.subr.bf16.mxu1 %v10295_v16  ;;  %v10346_v52 = vld [vmem:[%s11044_s15 + $0x1098] ss:$12 sps:$4 sm:$0xff]   ;;  %v10351_v16 = vld [vmem:[%s11044_s15 + $0x10b4] ss:$12 sps:$4 sm:$0xff]  }
 0x3bd   : > { %9126 = vmatprep.subr.bf16.mxu0 %v10296_v23  ;;  %v10349_v23 = vld [vmem:[%s11044_s15 + $0x10b0] ss:$12 sps:$4 sm:$0xff]  }
 0x3be   : > { %v8978_v24 = vpop.f32.mrb[52].mxu0 }
 0x3bf   : > { %7105 = vmatpush1.bf16.msra.mxu1 %v10293_v17  ;;  %v8979_v12 = vpop.f32.mrb[53].mxu0  ;;  %v10354_v17 = vld [vmem:[%s11044_s15 + $0x10cc] ss:$12 sps:$4 sm:$0xff]  }
 0x3c0   : > { %v8980_v25 = vadd.f32 %v8979_v12, %v8978_v24  ;;  %v8981_v26 = vpop.f32.mrb[54].mxu0  ;;  %9127 = vmatpush3.bf16.msra.mxu0 %v10297_v18  ;;  %7106 = vmatprep.subr.bf16.mxu1 %v10300_v58  ;;  %v10357_v18 = vld [vmem:[%s11044_s15 + $0x10e4] ss:$12 sps:$4 sm:$0xff]   ;;  %v10360_v58 = vld [vmem:[%s11044_s15 + $0x10fc] ss:$12 sps:$4 sm:$0xff]  }
 0x3c1   : > { %v8982_v34 = vpop.f32.mrb[55].mxu0  ;;  %9128 = vmatprep.subr.bf16.mxu0 %v10301_v19  ;;  %v10358_v24 = vld [vmem:[%s11044_s15 + $0x10f8] ss:$12 sps:$4 sm:$0xff]  }
 0x3c2   : > { %v12019_v41 = vadd.f32 %v8980_v25, %v11976_v49  ;;  %v10324_v49 = vld [vmem:[%s11044_s15 + $0x1008] ss:$12 sps:$4 sm:$0xff]   ;;  %v10366_v34 = vld [vmem:[%s11044_s15 + $0x112c] ss:$12 sps:$4 sm:$0xff]  }
 0x3c3   : > { %7107 = vmatpush1.bf16.msra.mxu1 %v10298_v20  ;;  %v10363_v25 = vld [vmem:[%s11044_s15 + $0x1114] ss:$12 sps:$4 sm:$0xff]  }
 0x3c4   : > { %9129 = vmatpush3.bf16.msra.mxu0 %v10302_v27  ;;  %7108 = vmatprep.subr.bf16.mxu1 %v10305_v33  ;;  %v10361_v33 = vld [vmem:[%s11044_s15 + $0x1110] ss:$12 sps:$4 sm:$0xff]  }
 0x3c5   : > { %9130 = vmatprep.subr.bf16.mxu0 %v10306_v35  ;;  %v10364_v35 = vld [vmem:[%s11044_s15 + $0x1128] ss:$12 sps:$4 sm:$0xff]  }
 0x3c7   : > { %7109 = vmatpush1.bf16.msra.mxu1 %v10303_v36  ;;  %v10367_v36 = vld [vmem:[%s11044_s15 + $0x1140] ss:$12 sps:$4 sm:$0xff]  }
 0x3c8   : > { %9131 = vmatpush3.bf16.msra.mxu0 %v10307_v39  ;;  %7110 = vmatprep.subr.bf16.mxu1 %v10310_v55  ;;  %v10372_v39 = vld [vmem:[%s11044_s15 + $0x115c] ss:$12 sps:$4 sm:$0xff]   ;;  %v10370_v55 = vld [vmem:[%s11044_s15 + $0x1158] ss:$12 sps:$4 sm:$0xff]  }
 0x3c9   : > { %9324 = vmatprep.subr.bf16.mxu0 %v10689_v0 }
 0x3cb   : > { %7111 = vmatpush1.bf16.msra.mxu1 %v10308_v40  ;;  %7692 = vmatmul.mubr.bf16.vlgmr.msra.gmra.mrb[80].mxu0 %v12029_v63  ;;  %v10375_v40 = vld [vmem:[%s11044_s15 + $0x1174] ss:$12 sps:$4 sm:$0xff]  }
 0x3cc   : > { %9325 = vmatpush3.bf16.msra.mxu0 %v10311_v43  ;;  %7112 = vmatprep.subr.bf16.mxu1 %v10314_v42  ;;  %v10373_v43 = vld [vmem:[%s11044_s15 + $0x1170] ss:$12 sps:$4 sm:$0xff]   ;;  %v10378_v42 = vld [vmem:[%s11044_s15 + $0x118c] ss:$12 sps:$4 sm:$0xff]  }
 0x3cd   : > { %9326 = vmatprep.subr.bf16.mxu0 %v10689_v0  ;;  %9340 = vmatprep.mubr.msk.bf16.mxu0 %vm10690_vm0, %v10689_v0 }
 0x3cf   : > { %7113 = vmatpush1.bf16.msra.mxu1 %v10312_v13  ;;  %v10376_v13 = vld [vmem:[%s11044_s15 + $0x1188] ss:$12 sps:$4 sm:$0xff]  }
 0x3d0   : > { %9327 = vmatpush3.bf16.msra.mxu0 %v10315_v44  ;;  %7114 = vmatprep.subr.bf16.mxu1 %v10318_v30  ;;  %v10381_v44 = vld [vmem:[%s11044_s15 + $0x11a4] ss:$12 sps:$4 sm:$0xff]   ;;  %v10379_v30 = vld [vmem:[%s11044_s15 + $0x11a0] ss:$12 sps:$4 sm:$0xff]  }
 0x3d1   : > { %9328 = vmatprep.subr.bf16.mxu0 %v10689_v0 }
 0x3d3   : > { %7115 = vmatpush1.bf16.msra.mxu1 %v10316_v29  ;;  %v10384_v29 = vld [vmem:[%s11044_s15 + $0x11bc] ss:$12 sps:$4 sm:$0xff]  }
 0x3d4   : > { %9329 = vmatpush3.bf16.msra.mxu0 %v10319_v32  ;;  %7116 = vmatprep.subr.bf16.mxu1 %v10322_v45 }
 0x3d5   : > { %9330 = vmatprep.subr.bf16.mxu0 %v10689_v0 }
 0x3d7   : > { %7117 = vmatpush1.bf16.msra.mxu1 %v10320_v46  ;;  %v10382_v46 = vld [vmem:[%s11044_s15 + $0x11b8] ss:$12 sps:$4 sm:$0xff]  }
 0x3d8   : > { %9331 = vmatpush3.bf16.msra.mxu0 %v10323_v47  ;;  %7118 = vmatprep.subr.bf16.mxu1 %v10326_v48 }
 0x3d9   : > { %9332 = vmatprep.subr.bf16.mxu0 %v10689_v0 }
 0x3db   : > { %7119 = vmatpush1.bf16.msra.mxu1 %v10324_v49  ;;  %v10387_v49 = vld [vmem:[%s11044_s15 + $0x11d4] ss:$12 sps:$4 sm:$0xff]  }
 0x3dc   : > { %9333 = vmatpush3.bf16.msra.mxu0 %v10327_v10  ;;  %7120 = vmatprep.subr.bf16.mxu1 %v10330_v53 }
 0x3dd   : > { %9334 = vmatprep.subr.bf16.mxu0 %v10689_v0 }
 0x3de   : > { %v9000_v57 = vpop.f32.mrb[56].mxu0 }
 0x3df   : > { %7121 = vmatpush1.bf16.msra.mxu1 %v10328_v38  ;;  %v9001_v59 = vpop.f32.mrb[57].mxu0  ;;  %v10385_v38 = vld [vmem:[%s11044_s15 + $0x11d0] ss:$12 sps:$4 sm:$0xff]  }
 0x3e0   : > { %v9002_v62 = vadd.f32 %v9001_v59, %v9000_v57  ;;  %v9003_v1 = vpop.f32.mrb[58].mxu0  ;;  %9335 = vmatpush3.bf16.msra.mxu0 %v10331_v22  ;;  %7122 = vmatprep.subr.bf16.mxu1 %v10334_v56  ;;  %v10390_v22 = vld [vmem:[%s11044_s15 + $0x11ec] ss:$12 sps:$4 sm:$0xff]   ;;  %v10388_v56 = vld [vmem:[%s11044_s15 + $0x11e8] ss:$12 sps:$4 sm:$0xff]  }
 0x3e1   : > { %v9004_v3 = vpop.f32.mrb[59].mxu0  ;;  %9336 = vmatprep.subr.bf16.mxu0 %v10689_v0 }
 0x3e2   : > { %v7454_v21 = vadd.f32 %v9002_v62, %v12019_v41  ;;  %v10369_v41 = vld [vmem:[%s11044_s15 + $0x1144] ss:$12 sps:$4 sm:$0xff]  }
 0x3e3   : > { %7123 = vmatpush1.bf16.msra.mxu1 %v10332_v60  ;;  %v7782_v3 = vld [vmem:[%s12102_s4] sm:$0xff] }
 0x3e4   : > { %9337 = vmatpush3.bf16.msra.mxu0 %v10335_v54  ;;  %7124 = vmatprep.subr.bf16.mxu1 %v10338_v2  ;;  %v7799_v2 = vld [vmem:[%s12102_s4 + $0x88] sm:$0xff] }
 0x3e5   : > { %9338 = vmatprep.subr.bf16.mxu0 %v10689_v0 }
 0x3e7   : > { %7125 = vmatpush1.bf16.msra.mxu1 %v10336_v4  ;;  %v7783_v4 = vld [vmem:[%s12102_s4 + $0x8] sm:$0xff] }
 0x3e8   : > { %9339 = vmatpush3.bf16.msra.mxu0 %v10339_v5  ;;  %7126 = vmatprep.subr.bf16.mxu1 %v10342_v8  ;;  %v7800_v5 = vld [vmem:[%s12102_s4 + $0x90] sm:$0xff]  ;;  %v7801_v8 = vld [vmem:[%s12102_s4 + $0x98] sm:$0xff] }
 0x3eb   : > { %7127 = vmatpush1.bf16.msra.mxu1 %v10340_v9  ;;  %9341 = vmatmul.mubr.bf16.vlgmr.msra.gmra.mrb[84].mxu0 %v11547_v37  ;;  %v10352_v37 = vld [vmem:[%s11044_s15 + $0x10c8] ss:$12 sps:$4 sm:$0xff]   ;;  %v9381_v9 = vpack.c.bf16 %v7783_v4, %v7782_v3  ;;  %v10693_v3 = vmov 0.0|0.0  }
 0x3ec   : > { %7137 = vmatprep.subr.bf16.mxu1 %v10345_v14  ;;  %v9383_v14 = vpack.c.bf16 %v7801_v8, %v7800_v5 }
 0x3ee   : > { %7129 = vmatmul.mubr.bf16.vlgmr.msra.gmra.mrb[24].mxu1 %v11466_v11  ;;  %v10355_v11 = vld [vmem:[%s11044_s15 + $0x10e0] ss:$12 sps:$4 sm:$0xff]   ;;  %s12291_s15 = sld [smem:[#allocation25_spill]] }
 0x3ef   : > { %7138 = vmatpush1.bf16.msra.mxu1 %v10343_v15  ;;  %7169 = vmatprep.mubr.bf16.mxu1 %v11988_v61  ;;  %v7784_v15 = vld [vmem:[%s12102_s4 + $0x10] sm:$0xff] }
 0x3f0   : > { %7139 = vmatprep.subr.bf16.mxu1 %v10348_v31  ;;  %v7785_v31 = vld [vmem:[%s12102_s4 + $0x18] sm:$0xff] }
 0x3f3   : > { %7140 = vmatpush1.bf16.msra.mxu1 %v10346_v52  ;;  %v7802_v52 = vld [vmem:[%s12102_s4 + $0xa0] sm:$0xff] }
 0x3f4   : > { %7141 = vmatprep.subr.bf16.mxu1 %v10351_v16  ;;  %v7803_v16 = vld [vmem:[%s12102_s4 + $0xa8] sm:$0xff]  ;;  %p12293_p10 = scmp.ne.s32.totalorder %s12291_s15, 0 }
 0x3f7   : > { %7142 = vmatpush1.bf16.msra.mxu1 %v10349_v23  ;;  %v9385_v23 = vpack.c.bf16 %v7785_v31, %v7784_v15 }
 0x3f8   : > { %7143 = vmatprep.subr.bf16.mxu1 %v10354_v17  ;;  %v9387_v17 = vpack.c.bf16 %v7803_v16, %v7802_v52 }
 0x3fb   : > { %7144 = vmatpush1.bf16.msra.mxu1 %v10352_v37  ;;  %v7786_v37 = vld [vmem:[%s12102_s4 + $0x20] sm:$0xff] }
 0x3fc   : > { %7145 = vmatprep.subr.bf16.mxu1 %v10357_v18  ;;  %v7787_v18 = vld [vmem:[%s12102_s4 + $0x28] sm:$0xff] }
 0x3fe   : > { %v9022_v61 = vpop.f32.mrb[60].mxu0 }
 0x3ff   : > { %7146 = vmatpush1.bf16.msra.mxu1 %v10355_v11  ;;  %v9023_v19 = vpop.f32.mrb[61].mxu0  ;;  %v7804_v11 = vld [vmem:[%s12102_s4 + $0xb0] sm:$0xff] }
 0x400   : > { %v9024_v12 = vadd.f32 %v9023_v19, %v9022_v61  ;;  %v9025_v20 = vpop.f32.mrb[62].mxu0  ;;  %7147 = vmatprep.subr.bf16.mxu1 %v10360_v58  ;;  %v7805_v58 = vld [vmem:[%s12102_s4 + $0xb8] sm:$0xff]  ;;  %v9389_v61 = vpack.c.bf16 %v7787_v18, %v7786_v37  ;;  %v7747_v37 = vsub.s32 1, %v11350_v28 }
 0x401   : > { %v9026_v26 = vpop.f32.mrb[63].mxu0  ;;  %v9391_v19 = vpack.c.bf16 %v7805_v58, %v7804_v11  ;;  %v7806_v20 = vld [vmem:[%s12102_s4 + $0xc0] sm:$0xff]  ;;  %v7739_v18 = vld [vmem:[%s11051_s13] sm:$0x7]  ;;  %s8163_s13 = sshll.u32 %s11041_s21, 1 }
 0x402   : > { %v7494_v27 = vadd.f32 %v9024_v12, %v7454_v21  ;;  %v7789_v12 = vld [vmem:[%s12102_s4 + $0x38] sm:$0xff]  ;;  %s471_s24 = scalar_lea.vmem [#allocation15], %s8163_s13 }
 0x403   : > { %7148 = vmatpush1.bf16.msra.mxu1 %v10358_v24  ;;  %v7788_v24 = vld [vmem:[%s12102_s4 + $0x30] sm:$0xff]  ;;  %s7985_s19 = sshll.u32 %s471_s24, 4  ;;  %s12181_s19 = int_to_ptr.vmem [resolvable:$true] %s7985_s19 }
 0x404   : > { %7149 = vmatprep.subr.bf16.mxu1 %v10363_v25  ;;  %v7807_v25 = vld [vmem:[%s12102_s4 + $0xc8] sm:$0xff]  ;;  %v9393_v26 = vpack.c.bf16 %v7789_v12, %v7788_v24  ;;  %v7759_v24 = vld [vmem:[%s11053_s0] sm:$0x7]  ;;  %s8817_s0 = sshll.u32 %s10761_s9, 5  ;;  %s10597_s16 = scalar_lea.vmem %s12181_s19, 32 }
 0x405   : > { %s12179_s29 = scalar_lea.hbm %s12292_s6, %s8817_s0  ;;  %p10598_p1 = scmp.ne.s32.totalorder %s12181_s19, %s10597_s16 }
 0x406   : > { %s10694_s9 = smov [#allocation15]  }
 0x407   : > { %7150 = vmatpush1.bf16.msra.mxu1 %v10361_v33  ;;  %v7790_v33 = vld [vmem:[%s12102_s4 + $0x40] sm:$0xff]  ;;  %p10599_p6 = pnand %p10598_p1, %p12293_p10  ;;  %s10601_s20 = sshll.u32 %s10694_s9, 4  ;;  %s10602_s20 = int_to_ptr.vmem [resolvable:$false] %s10601_s20 }
 0x408   : > { %7151 = vmatprep.subr.bf16.mxu1 %v10366_v34  ;;  %v7791_v34 = vld [vmem:[%s12102_s4 + $0x48] sm:$0xff]  ;;  %s10603_s11 = scalar_lea.vmem %s10602_s20, 64  ;;  %p10604_p11 = scmp.lt.s32.totalorder %s12181_s19, %s10602_s20 }
 0x409   : > { %p10600_p12 = pneg %p10599_p6  ;;  %p10605_p3 = scmp.lt.s32.totalorder %s10603_s11, %s10597_s16 }
 0x40b   : > { %7152 = vmatpush1.bf16.msra.mxu1 %v10364_v35  ;;  %v9397_v35 = vpack.c.bf16 %v7791_v34, %v7790_v33  ;;  %p10606_p7 = por %p10605_p3, %p10604_p11 }
 0x40c   : > { %7153 = vmatprep.subr.bf16.mxu1 %v10369_v41 }
 0x40d   : > { %p10607_p2 = pnand %p10606_p7, %p10600_p12 }
 0x40f   : > { %7154 = vmatpush1.bf16.msra.mxu1 %v10367_v36 }
 0x410   : > { %7155 = vmatprep.subr.bf16.mxu1 %v10372_v39 }
 0x413   : > { %7156 = vmatpush1.bf16.msra.mxu1 %v10370_v55 }
 0x414   : > { %7157 = vmatprep.subr.bf16.mxu1 %v10375_v40 }
 0x417   : > { %7158 = vmatpush1.bf16.msra.mxu1 %v10373_v43 }
 0x418   : > { %7159 = vmatprep.subr.bf16.mxu1 %v10378_v42 }
 0x41b   : > { %7160 = vmatpush1.bf16.msra.mxu1 %v10376_v13  ;;  %v7808_v13 = vld [vmem:[%s12102_s4 + $0xd0] sm:$0xff] }
 0x41c   : > { %7161 = vmatprep.subr.bf16.mxu1 %v10381_v44  ;;  %v7809_v44 = vld [vmem:[%s12102_s4 + $0xd8] sm:$0xff] }
 0x41e   : > { %v9044_v32 = vpop.f32.mrb[64].mxu0 }
 0x41f   : > { %7162 = vmatpush1.bf16.msra.mxu1 %v10379_v30  ;;  %v9045_v45 = vpop.f32.mrb[65].mxu0 }
 0x420   : > { %v9046_v47 = vadd.f32 %v9045_v45, %v9044_v32  ;;  %v9047_v48 = vpop.f32.mrb[66].mxu0  ;;  %7163 = vmatprep.subr.bf16.mxu1 %v10384_v29  ;;  %v9399_v29 = vpack.c.bf16 %v7809_v44, %v7808_v13  ;;  %v7792_v32 = vld [vmem:[%s12102_s4 + $0x50] sm:$0xff]  ;;  %v7793_v45 = vld [vmem:[%s12102_s4 + $0x58] sm:$0xff]  ;;  %v7818_v44 = vld [vmem:[%s12102_s4 + $0x120] sm:$0xff] }
 0x421   : > { %v9048_v10 = vpop.f32.mrb[67].mxu0  ;;  %v9401_v48 = vpack.c.bf16 %v7793_v45, %v7792_v32  ;;  %v7816_v13 = vld [vmem:[%s12102_s4 + $0x110] sm:$0xff]  ;;  %v7821_v45 = vld [vmem:[%s12102_s4 + $0x138] sm:$0xff] }
 0x422   : > { %v7534_v53 = vadd.f32 %v9046_v47, %v7494_v27  ;;  %v9395_v27 = vpack.c.bf16 %v7807_v25, %v7806_v20  ;;  %v7748_v20 = vrot.slane %v7739_v18, %v7747_v37  ;;  %v7820_v32 = vld [vmem:[%s12102_s4 + $0x130] sm:$0xff] }
 0x423   : > { %7164 = vmatpush1.bf16.msra.mxu1 %v10382_v46 }
 0x424   : > { %7165 = vmatprep.subr.bf16.mxu1 %v10387_v49 }
 0x427   : > { %7166 = vmatpush1.bf16.msra.mxu1 %v10385_v38  ;;  %v7811_v38 = vld [vmem:[%s12102_s4 + $0xe8] sm:$0xff] }
 0x428   : > { %7167 = vmatprep.subr.bf16.mxu1 %v10390_v22 }
 0x42b   : > { %7168 = vmatpush1.bf16.msra.mxu1 %v10388_v56  ;;  %v7794_v56 = vld [vmem:[%s12102_s4 + $0x60] sm:$0xff] }
 0x42e   : > { %7170 = vmatmul.mubr.bf16.vlgmr.msra.gmra.mrb[24].mxu1 %v12029_v63  ;;  %v7798_v63 = vld [vmem:[%s12102_s4 + $0x80] sm:$0xff] }
 0x42f   : > { %v9379_v21 = vpack.c.bf16 %v7799_v2, %v7798_v63  ;;  %v7797_v63 = vld [vmem:[%s12102_s4 + $0x78] sm:$0xff] }
 0x431   : > { %9380 = vmatprep.subr.bf16.mxu0 %v9379_v21 }
 0x432   : > { %9382 = vmatpush3.bf16.msra.mxu0 %v9381_v9 }
 0x433   : > { %9384 = vmatprep.subr.bf16.mxu0 %v9383_v14 }
 0x436   : > { %9386 = vmatpush3.bf16.msra.mxu0 %v9385_v23 }
 0x437   : > { %9388 = vmatprep.subr.bf16.mxu0 %v9387_v17  ;;  %v7743_v17 = vsub.s32 0, %v11350_v28 }
 0x43a   : > { %9390 = vmatpush3.bf16.msra.mxu0 %v9389_v61  ;;  %v7744_v61 = vrot.slane %v7739_v18, %v7743_v17 }
 0x43b   : > { %9392 = vmatprep.subr.bf16.mxu0 %v9391_v19 }
 0x43e   : > { %v9066_v57 = vpop.f32.mrb[68].mxu0  ;;  %9394 = vmatpush3.bf16.msra.mxu0 %v9393_v26 }
 0x43f   : > { %v9067_v59 = vpop.f32.mrb[69].mxu0  ;;  %9396 = vmatprep.subr.bf16.mxu0 %v9395_v27  ;;  %v7764_v27 = vrot.slane %v7759_v24, %v7743_v17 }
 0x440   : > { %v9068_v60 = vadd.f32 %v9067_v59, %v9066_v57  ;;  %v9069_v62 = vpop.f32.mrb[70].mxu0  ;;  %v7795_v57 = vld [vmem:[%s12102_s4 + $0x68] sm:$0xff] }
 0x441   : > { %v9070_v1 = vpop.f32.mrb[71].mxu0  ;;  %v9405_v59 = vpack.c.bf16 %v7795_v57, %v7794_v56  ;;  %v7813_v62 = vld [vmem:[%s12102_s4 + $0xf8] sm:$0xff]  ;;  %v7826_v56 = vld [vmem:[%s12102_s4 + $0x160] sm:$0xff]  ;;  %v7827_v57 = vld [vmem:[%s12102_s4 + $0x168] sm:$0xff] }
 0x442   : > { %v7574_v54 = vadd.f32 %v9068_v60, %v7534_v53  ;;  %9398 = vmatpush3.bf16.msra.mxu0 %v9397_v35  ;;  %v7810_v53 = vld [vmem:[%s12102_s4 + $0xe0] sm:$0xff]  ;;  %v7812_v60 = vld [vmem:[%s12102_s4 + $0xf0] sm:$0xff]  ;;  %v7768_v35 = vrot.slane %v7759_v24, %v7747_v37 }
 0x443   : > { %9400 = vmatprep.subr.bf16.mxu0 %v9399_v29  ;;  %v9403_v22 = vpack.c.bf16 %v7811_v38, %v7810_v53  ;;  %v9407_v1 = vpack.c.bf16 %v7813_v62, %v7812_v60  ;;  %v7825_v53 = vld [vmem:[%s12102_s4 + $0x158] sm:$0xff] }
 0x446   : > { %9402 = vmatpush3.bf16.msra.mxu0 %v9401_v48 }
 0x447   : > { %9404 = vmatprep.subr.bf16.mxu0 %v9403_v22 }
 0x44a   : > { %9406 = vmatpush3.bf16.msra.mxu0 %v9405_v59  ;;  %v9430_v59 = vpack.c.bf16 %v7827_v57, %v7826_v56 }
 0x44b   : > { %9408 = vmatprep.subr.bf16.mxu0 %v9407_v1  ;;  %v7829_v1 = vld [vmem:[%s12102_s4 + $0x178] sm:$0xff] }
 0x45e   : > { %v9088_v41 = vpop.f32.mrb[72].mxu0 }
 0x45f   : > { %v9089_v36 = vpop.f32.mrb[73].mxu0 }
 0x460   : > { %v9090_v39 = vadd.f32 %v9089_v36, %v9088_v41  ;;  %v9091_v55 = vpop.f32.mrb[74].mxu0 }
 0x461   : > { %v9092_v40 = vpop.f32.mrb[75].mxu0  ;;  %v7815_v55 = vld [vmem:[%s12102_s4 + $0x108] sm:$0xff] }
 0x462   : > { %v7614_v43 = vadd.f32 %v9090_v39, %v7574_v54  ;;  %v7796_v54 = vld [vmem:[%s12102_s4 + $0x70] sm:$0xff]  ;;  %v7814_v39 = vld [vmem:[%s12102_s4 + $0x100] sm:$0xff] }
 0x463   : > { %v9409_v2 = vpack.c.bf16 %v7797_v63, %v7796_v54 }
 0x465   : > { %9410 = vmatpush3.bf16.msra.mxu0 %v9409_v2 }
 0x466   : > { %9411 = vmatprep.subr.bf16.mxu0 %v10693_v3 }
 0x47e   : > { %v9110_v42 = vpop.f32.mrb[76].mxu0 }
 0x47f   : > { %v9111_v30 = vpop.f32.mrb[77].mxu0 }
 0x480   : > { %v9112_v46 = vadd.f32 %v9111_v30, %v9110_v42  ;;  %v9113_v47 = vpop.f32.mrb[78].mxu0  ;;  %v7819_v30 = vld [vmem:[%s12102_s4 + $0x128] sm:$0xff] }
 0x481   : > { %v9114_v49 = vpop.f32.mrb[79].mxu0  ;;  %v9418_v29 = vpack.c.bf16 %v7819_v30, %v7818_v44  ;;  %v7822_v47 = vld [vmem:[%s12102_s4 + $0x140] sm:$0xff] }
 0x482   : > { %v7654_v10 = vadd.f32 %v9112_v46, %v7614_v43  ;;  %v9412_v43 = vpack.c.bf16 %v7815_v55, %v7814_v39  ;;  %v9421_v46 = vpack.c.bf16 %v7821_v45, %v7820_v32  ;;  %v7751_v49 = vsub.s32 2, %v11350_v28  ;;  %v7828_v28 = vld [vmem:[%s12102_s4 + $0x170] sm:$0xff] }
 0x483   : > { %v9433_v54 = vpack.c.bf16 %v7829_v1, %v7828_v28 }
 0x484   : > { %v7752_v22 = vrot.slane %v7739_v18, %v7751_v49  ;;  %v7772_v62 = vrot.slane %v7759_v24, %v7751_v49 }
 0x49e   : > { %v9132_v21 = vpop.f32.mrb[80].mxu0 }
 0x49f   : > { %v9133_v4 = vpop.f32.mrb[81].mxu0 }
 0x4a0   : > { %v9134_v5 = vadd.f32 %v9133_v4, %v9132_v21  ;;  %v9135_v8 = vpop.f32.mrb[82].mxu0 }
 0x4a1   : > { %v9136_v9 = vpop.f32.mrb[83].mxu0 }
 0x4a2   : > { %v7694_v14 = vadd.f32 %v9134_v5, %v7654_v10  ;;  %v7824_v10 = vld [vmem:[%s12102_s4 + $0x150] sm:$0xff] }
 0x4a3   : > { %v9427_v38 = vpack.c.bf16 %v7825_v53, %v7824_v10 }
 0x4be   : > { %v7733_v15 = vpop.f32.mrb[84].mxu0 }
 0x4bf   : > { %v12137_v31 = vadd.f32 %v7733_v15, %v7694_v14  ;;  %v9342_v52 = vpop.f32.mrb[85].mxu0 }
 0x4c0   : > { %v7736_v16 = vpop.f32.mrb[86].mxu0 }
 0x4c1   : > { %v9343_v23 = vpop.f32.mrb[87].mxu0  ;;  %v7758_v60 = vmul.f32 %v7752_v22, %v12137_v31 }
 0x4c3   : > { %v7778_v63 = vadd.f32 %v7772_v62, %v7758_v60 }
 0x4c5   : > { %v7781_v2 = vmax.f32 %v7778_v63, 0.0 }
 0x501   : > { %v7171_v11 = vpop.f32.mrb[24].mxu1 }
 0x502   : > { %v9435_v58 = vadd.f32 %v7171_v11, %v11762_v6  ;;  %v7173_v19 = vpop.f32.mrb[25].mxu1 }
 0x503   : > { %v9437_v12 = vadd.f32 %v7173_v19, %v11764_v7  ;;  %v7175_v25 = vpop.f32.mrb[26].mxu1 }
 0x504   : > { %v9436_v26 = vadd.f32 %v9435_v58, %v11800_v50  ;;  %v7176_v33 = vpop.f32.mrb[27].mxu1  ;;  %v7817_v50 = vld [vmem:[%s12102_s4 + $0x118] sm:$0xff] }
 0x505   : > { %v9438_v34 = vadd.f32 %v9437_v12, %v11803_v51  ;;  %v9415_v51 = vpack.c.bf16 %v7817_v50, %v7816_v13 }
 0x506   : > { %v7756_v41 = vmul.f32 %v9436_v26, %v7744_v61 }
 0x507   : > { %v7757_v36 = vmul.f32 %v9438_v34, %v7748_v20 }
 0x508   : > { %v7776_v6 = vadd.f32 %v7764_v27, %v7756_v41 }
 0x509   : > { %v7777_v40 = vadd.f32 %v7768_v35, %v7757_v36 }
 0x50a   : > { %v7779_v42 = vmax.f32 %v7776_v6, 0.0 }
 0x50b   : > { %v7780_v7 = vmax.f32 %v7777_v40, 0.0 }
 0x50d   : > { %7894 = vmatprep.mubr.f32.mxu0 %v7780_v7 }
 0x50e   : > { %7895 = vmatmul.mubr.f32.vlgmr.msra.gmra.mrb[26].mxu0 %v7779_v42 }
 0x50f   : > { %9413 = vmatpush3.bf16.msra.mxu0 %v9412_v43  ;;  %9376 = vmatprep.mubr.msk.f32.mxu0 %vm10690_vm0, %v10689_v0  ;;  %v7823_v0 = vld [vmem:[%s12102_s4 + $0x148] sm:$0xff] }
 0x510   : > { %9414 = vmatprep.subr.bf16.mxu0 %v10693_v3  ;;  %v9424_v48 = vpack.c.bf16 %v7823_v0, %v7822_v47 }
 0x513   : > { %9416 = vmatpush3.bf16.msra.mxu0 %v9415_v51 }
 0x514   : > { %9417 = vmatprep.subr.bf16.mxu0 %v10693_v3 }
 0x517   : > { %9419 = vmatpush3.bf16.msra.mxu0 %v9418_v29 }
 0x518   : > { %9420 = vmatprep.subr.bf16.mxu0 %v10693_v3 }
 0x51b   : > { %9422 = vmatpush3.bf16.msra.mxu0 %v9421_v46 }
 0x51c   : > { %9423 = vmatprep.subr.bf16.mxu0 %v10693_v3 }
 0x51f   : > { %9425 = vmatpush3.bf16.msra.mxu0 %v9424_v48 }
 0x520   : > { %9426 = vmatprep.subr.bf16.mxu0 %v10693_v3 }
 0x523   : > { %9428 = vmatpush3.bf16.msra.mxu0 %v9427_v38 }
 0x524   : > { %9429 = vmatprep.subr.bf16.mxu0 %v10693_v3 }
 0x527   : > { %9431 = vmatpush3.bf16.msra.mxu0 %v9430_v59 }
 0x528   : > { %9432 = vmatprep.subr.bf16.mxu0 %v10693_v3 }
 0x52b   : > { %9434 = vmatpush3.bf16.msra.mxu0 %v9433_v54 }
 0x52e   : > { %9377 = vmatmul.mubr.f32.vlgmr.msra.gmra.mrb[88].mxu0 %v7781_v2 }
 0x5e1   : > { %v9179_v21 = vpop.f32.mrb[26].mxu0 }
 0x5e2   : > { %v9180_v4 = vpop.f32.mrb[27].mxu0 }
 0x5e3   : > { %v9181_v5 = vadd.f32 %v9180_v4, %v9179_v21 }
 0x601   : > { %v7966_v8 = vpop.f32.mrb[88].mxu0 }
 0x602   : > { %v7967_v9 = vadd.f32 %v9181_v5, %v7966_v8  ;;  %v9378_v14 = vpop.f32.mrb[89].mxu0 }
 0x604   : > { %7970 = vst [vmem:[%s471_s24] sm:$0x3] %v7967_v9 }
 0x605   : > { %10610 = shalt.err (!%p10607_p2)
}
 0x606   : > { %s10611_s21 = scalar_lea.hbm %s12179_s29, 32  ;;  %s10615_s8 = scalar_lea.hbm %s12292_s6, 64 }
 0x607   : > { %p10612_p0 = scmp.ne.s32.totalorder %s12179_s29, %s10611_s21  ;;  %p10616_p4 = scmp.lt.u32.totalorder %s12179_s29, %s12292_s6 }
 0x608   : > { %p10617_p5 = scmp.lt.u32.totalorder %s10615_s8, %s10611_s21  ;;  %p10619_p1 = scmp.lt.u32.totalorder %s10611_s21, %s12179_s29 }
 0x609   : > { %p10613_p8 = pnand %p10612_p0, %p12293_p10 }
 0x60a   : > { %p10618_p13 = por %p10617_p5, %p10616_p4 }
 0x60b   : > { %p10614_p9 = pneg %p10613_p8 }
 0x60c   : > { %p10620_p6 = por %p10619_p1, %p10618_p13 }
 0x60e   : > { %p10621_p12 = pnand %p10620_p6, %p10614_p9 }
 0x610   : > { %10624 = shalt.err (!%p10621_p12)
}
 0x611   : > { %9506 = dma.vmem_to_hbm [thread:$0]  (%p12293_p10), %s12181_s19, 32, %s12179_s29, %s7972_s26  }
 0x612 PF: > { %s12294_s17 = sld [smem:[#allocation21_spill]]  ;;  %s12295_s25 = sld [smem:[#allocation26_spill]] }
 0x613   : > { %p12297_p3 = scmp.ge.s32.totalorder %s10675_s30, 2 }
 0x618   : > { %s7997_s23 = sand.u32 1, %s12294_s17   ;;  %p12296_p11 = scmp.ne.s32.totalorder %s12295_s25, 0 }
 0x619   : > { %s7998_s4 = scalar_lea.sflag [#allocation5], %s7997_s23 }
 0x61a   : > { %p9532_p7 = pnand %p12297_p3, %p12296_p11 }
 0x61c   : > { %10658 = dma.done.wait (!%p9532_p7), %s7998_s4, 32  }
 0x61d   : > { %10660 = vsyncadd (!%p9532_p7), %s7998_s4, 4294967264  ;;  %s12298_s30 = sld [smem:[#allocation23_spill]]  ;;  %s12299_s13 = sld [smem:[#allocation22_spill]] }
 0x61e   : > { %s12300_s29 = sld [smem:[#allocation24_spill]]  ;;  %s12301_s27 = smov %s10667_s28 }
 0x623   : > { %p26_p2 = scmp.ge.s32.totalorder %s12298_s30, 4   ;;  %s12302_s28 = smov %s12299_s13 }
 0x625   :  { %28 = sbr.rel (!%p26_p2) target bundleno = 15 (0xf), region = 169 }
 0x62c   :  { %8003 = vsyncpa [#allocation4], 1 }
 0x62d   :  { %8005 = vsyncpa [#allocation4 + $0x1], 1 }
 0x62e   :  { %8006 = vsyncpa [#allocation7], 1 }
 0x62f   :  { %8007 = vsyncpa [#allocation10], 1 }
 0x630   :  { %8009 = vsyncpa [#allocation10 + $0x1], 1 }
 0x631   :  { %8010 = vsyncpa [#allocation13], 1 }
 0x632   :  { %8012 = vsyncpa [#allocation13 + $0x1], 1 }
 0x633   :  { %8013 = vsyncpa [#allocation5], 1 }
 0x634   :  { %8015 = vsyncpa [#allocation5 + $0x1], 1 }

</bundles_post_ra>
